<compile_context>
chip_gen: v5e
topology: v5e:2x2
jax: 0.10.0
libtpu: 0.0.40
codegen_flags: <defaults>
</compile_context>

<pallas_src>
import jax
import jax.numpy as jnp
import numpy as np
from jax.experimental import pallas as pl
from jax.experimental.pallas import tpu as pltpu

# Small synthetic hyperparameters consistent with the module definition.
MAX_QUESTION_SIZE = 16
MAX_ANSWER_SIZE = 16
D_CHAR_VEC = 128          # d_char_vec (512 in original; 128 = one lane width)
N_VOCAB = 96
N_CONV_LAYERS = 4
KERNEL_SIZE = 4
PADDING = 1
L_TOTAL = MAX_QUESTION_SIZE + MAX_ANSWER_SIZE     # 32, multiple of 8
B_BLK = 8                                         # samples per grid step -> M = 256 rows
DATA0 = 8                                         # 8-aligned data offset inside the scratch
L_BUF = 48                                        # DATA0 + 32 data + right pad, 8-aligned


def critic_kernel(x_ref, w_ref, b_ref, wv_ref, bv_ref, out_ref, buf):
    """Fused: 4x conv1d (one im2col matmul each) -> relu -> masked mean -> linear.

    x_ref  : (B_BLK, 32, D) bf16  embedded (src|trg) activations
    w_ref  : (4, K*D, D)    bf16  conv weights, im2col layout (row = k*D + d_in)
    b_ref  : (4, 1, D)      f32   conv biases
    wv_ref : (1, D)         f32   value-head weight (torch Linear layout)
    bv_ref : (1, 1)         f32   value-head bias
    out_ref: (B_BLK, 1)     f32
    buf    : (B_BLK, 48, D) f32   staging scratch; rows 8..39 = data (8-aligned
                                  => unmasked stores), rows 0..7 / 40..47 = zero pad
    """
    Bb, L, D = x_ref.shape
    rows = Bb * L

    # Zero ONLY the pad rows (two aligned 8-row chunks), not the whole buffer.
    buf[:, 0:DATA0, :] = jnp.zeros((Bb, DATA0, D), jnp.float32)
    buf[:, DATA0 + L:, :] = jnp.zeros((Bb, L_BUF - DATA0 - L, D), jnp.float32)

    # TODO(synk): dropout omitted (eval-mode identity); training mode would need
    # pltpu.prng_* masking in-kernel.
    buf[:, DATA0:DATA0 + L, :] = x_ref[...].astype(jnp.float32)   # aligned bulk store

    # position index within each sample (hoisted out of the layer loop)
    t_pos = jax.lax.broadcasted_iota(jnp.int32, (Bb, L, 1), 1)

    # --- 4 conv layers: one (B_BLK*32, K*D) @ (K*D, D) bf16 matmul each -------
    base = DATA0 - PADDING                        # left zero-pad row sits at DATA0-1
    valid_len = L
    y_last = None
    for l in range(N_CONV_LAYERS):                # static unroll
        lhs = jnp.concatenate(
            [buf[:, base + k: base + k + L, :] for k in range(KERNEL_SIZE)],
            axis=-1).reshape(rows, KERNEL_SIZE * D).astype(jnp.bfloat16)
        y = jnp.dot(lhs, w_ref[l], preferred_element_type=jnp.float32)   # (rows, D)
        y = (y + b_ref[l]).reshape(Bb, L, D)
        valid_len = valid_len + 2 * PADDING - KERNEL_SIZE + 1            # 31,30,29,28
        # zero the invalid tail rows; they double as the next layer's right pad
        y_last = jnp.where(t_pos < valid_len, y, 0.0)
        if l + 1 < N_CONV_LAYERS:
            buf[:, DATA0:DATA0 + L, :] = y_last                          # aligned store

    # --- relu -> masked mean over the true final length -> value head ---------
    feat = jnp.sum(jnp.maximum(y_last, 0.0), axis=1) * (1.0 / valid_len)   # (Bb, D)
    val = jnp.sum(feat * wv_ref[...], axis=-1, keepdims=True) + bv_ref[...]
    out_ref[...] = val                                                     # (Bb, 1)


def init_params(key):
    ks = jax.random.split(key, 6)
    src_tab = jax.random.normal(ks[0], (N_VOCAB, D_CHAR_VEC), jnp.float32) * 0.02
    src_tab = src_tab.at[0].set(0.0)      # padding_idx = 0 -> zero row
    trg_tab = jax.random.normal(ks[1], (N_VOCAB, D_CHAR_VEC), jnp.float32) * 0.02
    trg_tab = trg_tab.at[0].set(0.0)
    fan_in = D_CHAR_VEC * KERNEL_SIZE
    # conv_w layout: (layer, k, d_in, d_out) == torch_weight[l, d_out, d_in, k].T
    conv_w = jax.random.normal(
        ks[2], (N_CONV_LAYERS, KERNEL_SIZE, D_CHAR_VEC, D_CHAR_VEC),
        jnp.float32) * (1.0 / jnp.sqrt(fan_in))
    conv_b = jax.random.normal(
        ks[3], (N_CONV_LAYERS, 1, D_CHAR_VEC), jnp.float32) * 0.01
    val_w = jax.random.normal(
        ks[4], (1, D_CHAR_VEC), jnp.float32) * (1.0 / jnp.sqrt(D_CHAR_VEC))
    val_b = jax.random.normal(ks[5], (1, 1), jnp.float32) * 0.01
    return src_tab, trg_tab, conv_w, conv_b, val_w, val_b


def critic_reference(src_seq, trg_seq, params):
    """Pure-JAX f32 reference of the PyTorch forward (eval mode)."""
    src_tab, trg_tab, conv_w, conv_b, val_w, val_b = params
    B = src_seq.shape[0]
    src_pad = jnp.zeros((B, MAX_QUESTION_SIZE), jnp.int32
                        ).at[:, :src_seq.shape[1]].set(src_seq)
    trg_pad = jnp.zeros((B, MAX_ANSWER_SIZE), jnp.int32
                        ).at[:, :trg_seq.shape[1]].set(trg_seq)
    cur = jnp.concatenate([jnp.take(src_tab, src_pad, axis=0),
                           jnp.take(trg_tab, trg_pad, axis=0)], axis=1)  # (B,32,D)
    for l in range(N_CONV_LAYERS):
        L_in = cur.shape[1]
        L_out = L_in + 2 * PADDING - KERNEL_SIZE + 1
        xp = jnp.pad(cur, ((0, 0), (PADDING, PADDING), (0, 0)))
        acc = jnp.zeros((B, L_out, D_CHAR_VEC), jnp.float32)
        for k in range(KERNEL_SIZE):
            acc = acc + jnp.einsum("bld,de->ble", xp[:, k:k + L_out, :], conv_w[l, k])
        cur = acc + conv_b[l][None]
    feat = jnp.mean(jax.nn.relu(cur), axis=1)            # (B, D)
    return feat @ val_w.T + val_b                        # (B, 1)


def critic_forward(src_seq, trg_seq, params):
    src_tab, trg_tab, conv_w, conv_b, val_w, val_b = params
    B = src_seq.shape[0]
    Bp = ((B + B_BLK - 1) // B_BLK) * B_BLK              # pad batch to a grid multiple

    # Glue: pad token ids to the fixed max lengths (pad id 0 -> zero embedding);
    # extra batch rows are all-pad and get sliced off below.
    src_pad = jnp.zeros((Bp, MAX_QUESTION_SIZE), jnp.int32
                        ).at[:B, :src_seq.shape[1]].set(src_seq)
    trg_pad = jnp.zeros((Bp, MAX_ANSWER_SIZE), jnp.int32
                        ).at[:B, :trg_seq.shape[1]].set(trg_seq)

    # Embedding gather hoisted to XLA (per review); dropout is eval-mode identity.
    x = jnp.concatenate([jnp.take(src_tab, src_pad, axis=0),
                         jnp.take(trg_tab, trg_pad, axis=0)], axis=1)    # (Bp, 32, D)
    x = x.astype(jnp.bfloat16)

    # Conv weights in im2col layout (K*D_in, D_out), bf16 for single-pass MXU.
    w_im2col = conv_w.reshape(
        N_CONV_LAYERS, KERNEL_SIZE * D_CHAR_VEC, D_CHAR_VEC).astype(jnp.bfloat16)

    out = pl.pallas_call(
        critic_kernel,
        out_shape=jax.ShapeDtypeStruct((Bp, 1), jnp.float32),
        grid=(Bp // B_BLK,),
        in_specs=[
            # activations: stream one batch block per grid step
            pl.BlockSpec((B_BLK, L_TOTAL, D_CHAR_VEC), lambda i: (i, 0, 0)),
            # parameters: constant index_map -> fetched once, VMEM-resident
            pl.BlockSpec(w_im2col.shape, lambda i: (0, 0, 0)),
            pl.BlockSpec(conv_b.shape,   lambda i: (0, 0, 0)),
            pl.BlockSpec(val_w.shape,    lambda i: (0, 0)),
            pl.BlockSpec(val_b.shape,    lambda i: (0, 0)),
        ],
        out_specs=pl.BlockSpec((B_BLK, 1), lambda i: (i, 0)),
        scratch_shapes=[pltpu.VMEM((B_BLK, L_BUF, D_CHAR_VEC), jnp.float32)],
        compiler_params=pltpu.CompilerParams(dimension_semantics=("parallel",)),
    )(x, w_im2col, conv_b, val_w, val_b)
    return out[:B]


if __name__ == "__main__":
    key = jax.random.PRNGKey(0)
    pkey, skey, tkey = jax.random.split(key, 3)
    params = init_params(pkey)

    # Batched so M = B*32 fills the MXU per grid step and the batch grid axis
    # (grid=(2,), "parallel") can split across v7x's two TensorCores.
    B = 16
    src_seq = jax.random.randint(skey, (B, 10), 1, N_VOCAB, dtype=jnp.int32)
    trg_seq = jax.random.randint(tkey, (B, 12), 1, N_VOCAB, dtype=jnp.int32)

    fwd = jax.jit(critic_forward)
    out = fwd(src_seq, trg_seq, params)
    jax.block_until_ready(out)
    assert out.shape == (B, 1) and out.dtype == jnp.float32

    # Tolerance-checked pure-f32 reference (bf16 matmul operands -> small drift).
    ref = critic_reference(src_seq, trg_seq, params)
    np.testing.assert_allclose(np.asarray(out), np.asarray(ref), rtol=0.0, atol=1e-2)

    # Also exercise the batch-padding path (B not a multiple of B_BLK).
    out3 = jax.jit(critic_forward)(src_seq[:3], trg_seq[:3], params)
    jax.block_until_ready(out3)
    assert out3.shape == (3, 1)
    np.testing.assert_allclose(np.asarray(out3), np.asarray(ref[:3]), rtol=0.0, atol=1e-2)

    print("KERNEL_OK")
</pallas_src>

<mosaic_0001>
module attributes {stable_mosaic.version = 11 : i64} {
  func.func @critic_kernel(%arg0: i32, %arg1: memref<8x32x128xbf16, #tpu.memory_space<vmem>>, %arg2: memref<4x512x128xbf16, #tpu.memory_space<vmem>>, %arg3: memref<4x1x128xf32, #tpu.memory_space<vmem>>, %arg4: memref<1x128xf32, #tpu.memory_space<vmem>>, %arg5: memref<1x1xf32, #tpu.memory_space<vmem>>, %arg6: memref<8x1xf32, #tpu.memory_space<vmem>>, %arg7: memref<8x48x128xf32, #tpu.memory_space<vmem>>) attributes {dimension_semantics = [#tpu.dimension_semantics<parallel>], iteration_bounds = array<i64: 2>, scalar_prefetch = 0 : i64, scratch_operands = 1 : i64, tpu.core_type = #tpu.core_type<tc>, window_params = [{transform_indices = @transform_0, window_bounds = array<i64: 8, 32, 128>}, {pipeline_mode = #tpu.pipeline_mode<synchronous>, transform_indices = @transform_1, window_bounds = array<i64: 4, 512, 128>}, {pipeline_mode = #tpu.pipeline_mode<synchronous>, transform_indices = @transform_2, window_bounds = array<i64: 4, 1, 128>}, {pipeline_mode = #tpu.pipeline_mode<synchronous>, transform_indices = @transform_3, window_bounds = array<i64: 1, 128>}, {pipeline_mode = #tpu.pipeline_mode<synchronous>, transform_indices = @transform_4, window_bounds = array<i64: 1, 1>}, {transform_indices = @transform_5, window_bounds = array<i64: 8, 1>}]} {
    %cst = arith.constant 0.000000e+00 : f32
    %0 = vector.broadcast %cst : f32 to vector<8x8x128xf32>
    %c0 = arith.constant 0 : index
    %c0_0 = arith.constant 0 : index
    %c0_1 = arith.constant 0 : index
    %1 = vector.load %arg7[%c0, %c0_0, %c0_1] : memref<8x48x128xf32, #tpu.memory_space<vmem>>, vector<8x8x128xf32>
    tpu.vector_store %arg7[%c0, %c0_0, %c0_1], %0 {strides = array<i32>} : memref<8x48x128xf32, #tpu.memory_space<vmem>>, vector<8x8x128xf32>,
    %cst_2 = arith.constant 0.000000e+00 : f32
    %2 = vector.broadcast %cst_2 : f32 to vector<8x8x128xf32>
    %c0_3 = arith.constant 0 : index
    %c40 = arith.constant 40 : index
    %c0_4 = arith.constant 0 : index
    %3 = vector.load %arg7[%c0_3, %c40, %c0_4] : memref<8x48x128xf32, #tpu.memory_space<vmem>>, vector<8x8x128xf32>
    tpu.vector_store %arg7[%c0_3, %c40, %c0_4], %2 {strides = array<i32>} : memref<8x48x128xf32, #tpu.memory_space<vmem>>, vector<8x8x128xf32>,
    %c0_5 = arith.constant 0 : index
    %c0_6 = arith.constant 0 : index
    %c0_7 = arith.constant 0 : index
    %4 = vector.load %arg1[%c0_5, %c0_6, %c0_7] : memref<8x32x128xbf16, #tpu.memory_space<vmem>>, vector<8x32x128xbf16>
    %5 = arith.extf %4 : vector<8x32x128xbf16> to vector<8x32x128xf32>
    %c0_8 = arith.constant 0 : index
    %c8 = arith.constant 8 : index
    %c0_9 = arith.constant 0 : index
    %6 = vector.load %arg7[%c0_8, %c8, %c0_9] : memref<8x48x128xf32, #tpu.memory_space<vmem>>, vector<8x32x128xf32>
    tpu.vector_store %arg7[%c0_8, %c8, %c0_9], %5 {strides = array<i32>} : memref<8x48x128xf32, #tpu.memory_space<vmem>>, vector<8x32x128xf32>,
    %7 = tpu.iota {dimensions = array<i32: 1>} : vector<8x32x1xi32>
    %c0_10 = arith.constant 0 : index
    %c7 = arith.constant 7 : index
    %c0_11 = arith.constant 0 : index
    %8 = vector.load %arg7[%c0_10, %c7, %c0_11] : memref<8x48x128xf32, #tpu.memory_space<vmem>>, vector<8x32x128xf32>
    %c0_12 = arith.constant 0 : index
    %c8_13 = arith.constant 8 : index
    %c0_14 = arith.constant 0 : index
    %9 = vector.load %arg7[%c0_12, %c8_13, %c0_14] : memref<8x48x128xf32, #tpu.memory_space<vmem>>, vector<8x32x128xf32>
    %c0_15 = arith.constant 0 : index
    %c9 = arith.constant 9 : index
    %c0_16 = arith.constant 0 : index
    %10 = vector.load %arg7[%c0_15, %c9, %c0_16] : memref<8x48x128xf32, #tpu.memory_space<vmem>>, vector<8x32x128xf32>
    %c0_17 = arith.constant 0 : index
    %c10 = arith.constant 10 : index
    %c0_18 = arith.constant 0 : index
    %11 = vector.load %arg7[%c0_17, %c10, %c0_18] : memref<8x48x128xf32, #tpu.memory_space<vmem>>, vector<8x32x128xf32>
    %12 = tpu.concatenate %8, %9, %10, %11 in 2 : vector<8x32x128xf32>, vector<8x32x128xf32>, vector<8x32x128xf32>, vector<8x32x128xf32> -> vector<8x32x512xf32>
    %13 = vector.shape_cast %12 : vector<8x32x512xf32> to vector<256x512xf32>
    %14 = arith.truncf %13 : vector<256x512xf32> to vector<256x512xbf16>
    %c0_19 = arith.constant 0 : index
    %c0_20 = arith.constant 0 : index
    %c0_21 = arith.constant 0 : index
    %15 = vector.load %arg2[%c0_19, %c0_20, %c0_21] : memref<4x512x128xbf16, #tpu.memory_space<vmem>>, vector<1x512x128xbf16>
    %16 = vector.shape_cast %15 : vector<1x512x128xbf16> to vector<512x128xbf16>
    %cst_22 = arith.constant dense<0.000000e+00> : vector<256x128xf32>
    %17 = tpu.matmul %14, %16, %cst_22 {dimension_numbers = #tpu.dot_dimension_numbers<[1], [0], [0], [1], [0, 0, 1, 1], [], []>} : vector<256x512xbf16>, vector<512x128xbf16>, vector<256x128xf32> -> vector<256x128xf32>
    %c0_23 = arith.constant 0 : index
    %c0_24 = arith.constant 0 : index
    %c0_25 = arith.constant 0 : index
    %18 = vector.load %arg3[%c0_23, %c0_24, %c0_25] : memref<4x1x128xf32, #tpu.memory_space<vmem>>, vector<1x1x128xf32>
    %19 = vector.shape_cast %18 : vector<1x1x128xf32> to vector<1x128xf32>
    %20 = vector.broadcast %19 : vector<1x128xf32> to vector<256x128xf32>
    %21 = arith.addf %17, %20 : vector<256x128xf32>
    %22 = vector.shape_cast %21 : vector<256x128xf32> to vector<8x32x128xf32>
    %c31_i32 = arith.constant 31 : i32
    %23 = vector.broadcast %c31_i32 : i32 to vector<8x32x1xi32>
    %24 = arith.cmpi slt, %7, %23 : vector<8x32x1xi32>
    %cst_26 = arith.constant 0.000000e+00 : f32
    %25 = vector.shape_cast %24 : vector<8x32x1xi1> to vector<8x32x1xi1>
    %26 = vector.broadcast %25 : vector<8x32x1xi1> to vector<8x32x128xi1>
    %27 = vector.broadcast %cst_26 : f32 to vector<8x32x128xf32>
    %28 = arith.select %26, %22, %27 : vector<8x32x128xi1>, vector<8x32x128xf32>
    %c0_27 = arith.constant 0 : index
    %c8_28 = arith.constant 8 : index
    %c0_29 = arith.constant 0 : index
    %29 = vector.load %arg7[%c0_27, %c8_28, %c0_29] : memref<8x48x128xf32, #tpu.memory_space<vmem>>, vector<8x32x128xf32>
    tpu.vector_store %arg7[%c0_27, %c8_28, %c0_29], %28 {strides = array<i32>} : memref<8x48x128xf32, #tpu.memory_space<vmem>>, vector<8x32x128xf32>,
    %c0_30 = arith.constant 0 : index
    %c7_31 = arith.constant 7 : index
    %c0_32 = arith.constant 0 : index
    %30 = vector.load %arg7[%c0_30, %c7_31, %c0_32] : memref<8x48x128xf32, #tpu.memory_space<vmem>>, vector<8x32x128xf32>
    %c0_33 = arith.constant 0 : index
    %c8_34 = arith.constant 8 : index
    %c0_35 = arith.constant 0 : index
    %31 = vector.load %arg7[%c0_33, %c8_34, %c0_35] : memref<8x48x128xf32, #tpu.memory_space<vmem>>, vector<8x32x128xf32>
    %c0_36 = arith.constant 0 : index
    %c9_37 = arith.constant 9 : index
    %c0_38 = arith.constant 0 : index
    %32 = vector.load %arg7[%c0_36, %c9_37, %c0_38] : memref<8x48x128xf32, #tpu.memory_space<vmem>>, vector<8x32x128xf32>
    %c0_39 = arith.constant 0 : index
    %c10_40 = arith.constant 10 : index
    %c0_41 = arith.constant 0 : index
    %33 = vector.load %arg7[%c0_39, %c10_40, %c0_41] : memref<8x48x128xf32, #tpu.memory_space<vmem>>, vector<8x32x128xf32>
    %34 = tpu.concatenate %30, %31, %32, %33 in 2 : vector<8x32x128xf32>, vector<8x32x128xf32>, vector<8x32x128xf32>, vector<8x32x128xf32> -> vector<8x32x512xf32>
    %35 = vector.shape_cast %34 : vector<8x32x512xf32> to vector<256x512xf32>
    %36 = arith.truncf %35 : vector<256x512xf32> to vector<256x512xbf16>
    %c1 = arith.constant 1 : index
    %c0_42 = arith.constant 0 : index
    %c0_43 = arith.constant 0 : index
    %37 = vector.load %arg2[%c1, %c0_42, %c0_43] : memref<4x512x128xbf16, #tpu.memory_space<vmem>>, vector<1x512x128xbf16>
    %38 = vector.shape_cast %37 : vector<1x512x128xbf16> to vector<512x128xbf16>
    %cst_44 = arith.constant dense<0.000000e+00> : vector<256x128xf32>
    %39 = tpu.matmul %36, %38, %cst_44 {dimension_numbers = #tpu.dot_dimension_numbers<[1], [0], [0], [1], [0, 0, 1, 1], [], []>} : vector<256x512xbf16>, vector<512x128xbf16>, vector<256x128xf32> -> vector<256x128xf32>
    %c1_45 = arith.constant 1 : index
    %c0_46 = arith.constant 0 : index
    %c0_47 = arith.constant 0 : index
    %40 = vector.load %arg3[%c1_45, %c0_46, %c0_47] : memref<4x1x128xf32, #tpu.memory_space<vmem>>, vector<1x1x128xf32>
    %41 = vector.shape_cast %40 : vector<1x1x128xf32> to vector<1x128xf32>
    %42 = vector.broadcast %41 : vector<1x128xf32> to vector<256x128xf32>
    %43 = arith.addf %39, %42 : vector<256x128xf32>
    %44 = vector.shape_cast %43 : vector<256x128xf32> to vector<8x32x128xf32>
    %c30_i32 = arith.constant 30 : i32
    %45 = vector.broadcast %c30_i32 : i32 to vector<8x32x1xi32>
    %46 = arith.cmpi slt, %7, %45 : vector<8x32x1xi32>
    %cst_48 = arith.constant 0.000000e+00 : f32
    %47 = vector.shape_cast %46 : vector<8x32x1xi1> to vector<8x32x1xi1>
    %48 = vector.broadcast %47 : vector<8x32x1xi1> to vector<8x32x128xi1>
    %49 = vector.broadcast %cst_48 : f32 to vector<8x32x128xf32>
    %50 = arith.select %48, %44, %49 : vector<8x32x128xi1>, vector<8x32x128xf32>
    %c0_49 = arith.constant 0 : index
    %c8_50 = arith.constant 8 : index
    %c0_51 = arith.constant 0 : index
    %51 = vector.load %arg7[%c0_49, %c8_50, %c0_51] : memref<8x48x128xf32, #tpu.memory_space<vmem>>, vector<8x32x128xf32>
    tpu.vector_store %arg7[%c0_49, %c8_50, %c0_51], %50 {strides = array<i32>} : memref<8x48x128xf32, #tpu.memory_space<vmem>>, vector<8x32x128xf32>,
    %c0_52 = arith.constant 0 : index
    %c7_53 = arith.constant 7 : index
    %c0_54 = arith.constant 0 : index
    %52 = vector.load %arg7[%c0_52, %c7_53, %c0_54] : memref<8x48x128xf32, #tpu.memory_space<vmem>>, vector<8x32x128xf32>
    %c0_55 = arith.constant 0 : index
    %c8_56 = arith.constant 8 : index
    %c0_57 = arith.constant 0 : index
    %53 = vector.load %arg7[%c0_55, %c8_56, %c0_57] : memref<8x48x128xf32, #tpu.memory_space<vmem>>, vector<8x32x128xf32>
    %c0_58 = arith.constant 0 : index
    %c9_59 = arith.constant 9 : index
    %c0_60 = arith.constant 0 : index
    %54 = vector.load %arg7[%c0_58, %c9_59, %c0_60] : memref<8x48x128xf32, #tpu.memory_space<vmem>>, vector<8x32x128xf32>
    %c0_61 = arith.constant 0 : index
    %c10_62 = arith.constant 10 : index
    %c0_63 = arith.constant 0 : index
    %55 = vector.load %arg7[%c0_61, %c10_62, %c0_63] : memref<8x48x128xf32, #tpu.memory_space<vmem>>, vector<8x32x128xf32>
    %56 = tpu.concatenate %52, %53, %54, %55 in 2 : vector<8x32x128xf32>, vector<8x32x128xf32>, vector<8x32x128xf32>, vector<8x32x128xf32> -> vector<8x32x512xf32>
    %57 = vector.shape_cast %56 : vector<8x32x512xf32> to vector<256x512xf32>
    %58 = arith.truncf %57 : vector<256x512xf32> to vector<256x512xbf16>
    %c2 = arith.constant 2 : index
    %c0_64 = arith.constant 0 : index
    %c0_65 = arith.constant 0 : index
    %59 = vector.load %arg2[%c2, %c0_64, %c0_65] : memref<4x512x128xbf16, #tpu.memory_space<vmem>>, vector<1x512x128xbf16>
    %60 = vector.shape_cast %59 : vector<1x512x128xbf16> to vector<512x128xbf16>
    %cst_66 = arith.constant dense<0.000000e+00> : vector<256x128xf32>
    %61 = tpu.matmul %58, %60, %cst_66 {dimension_numbers = #tpu.dot_dimension_numbers<[1], [0], [0], [1], [0, 0, 1, 1], [], []>} : vector<256x512xbf16>, vector<512x128xbf16>, vector<256x128xf32> -> vector<256x128xf32>
    %c2_67 = arith.constant 2 : index
    %c0_68 = arith.constant 0 : index
    %c0_69 = arith.constant 0 : index
    %62 = vector.load %arg3[%c2_67, %c0_68, %c0_69] : memref<4x1x128xf32, #tpu.memory_space<vmem>>, vector<1x1x128xf32>
    %63 = vector.shape_cast %62 : vector<1x1x128xf32> to vector<1x128xf32>
    %64 = vector.broadcast %63 : vector<1x128xf32> to vector<256x128xf32>
    %65 = arith.addf %61, %64 : vector<256x128xf32>
    %66 = vector.shape_cast %65 : vector<256x128xf32> to vector<8x32x128xf32>
    %c29_i32 = arith.constant 29 : i32
    %67 = vector.broadcast %c29_i32 : i32 to vector<8x32x1xi32>
    %68 = arith.cmpi slt, %7, %67 : vector<8x32x1xi32>
    %cst_70 = arith.constant 0.000000e+00 : f32
    %69 = vector.shape_cast %68 : vector<8x32x1xi1> to vector<8x32x1xi1>
    %70 = vector.broadcast %69 : vector<8x32x1xi1> to vector<8x32x128xi1>
    %71 = vector.broadcast %cst_70 : f32 to vector<8x32x128xf32>
    %72 = arith.select %70, %66, %71 : vector<8x32x128xi1>, vector<8x32x128xf32>
    %c0_71 = arith.constant 0 : index
    %c8_72 = arith.constant 8 : index
    %c0_73 = arith.constant 0 : index
    %73 = vector.load %arg7[%c0_71, %c8_72, %c0_73] : memref<8x48x128xf32, #tpu.memory_space<vmem>>, vector<8x32x128xf32>
    tpu.vector_store %arg7[%c0_71, %c8_72, %c0_73], %72 {strides = array<i32>} : memref<8x48x128xf32, #tpu.memory_space<vmem>>, vector<8x32x128xf32>,
    %c0_74 = arith.constant 0 : index
    %c7_75 = arith.constant 7 : index
    %c0_76 = arith.constant 0 : index
    %74 = vector.load %arg7[%c0_74, %c7_75, %c0_76] : memref<8x48x128xf32, #tpu.memory_space<vmem>>, vector<8x32x128xf32>
    %c0_77 = arith.constant 0 : index
    %c8_78 = arith.constant 8 : index
    %c0_79 = arith.constant 0 : index
    %75 = vector.load %arg7[%c0_77, %c8_78, %c0_79] : memref<8x48x128xf32, #tpu.memory_space<vmem>>, vector<8x32x128xf32>
    %c0_80 = arith.constant 0 : index
    %c9_81 = arith.constant 9 : index
    %c0_82 = arith.constant 0 : index
    %76 = vector.load %arg7[%c0_80, %c9_81, %c0_82] : memref<8x48x128xf32, #tpu.memory_space<vmem>>, vector<8x32x128xf32>
    %c0_83 = arith.constant 0 : index
    %c10_84 = arith.constant 10 : index
    %c0_85 = arith.constant 0 : index
    %77 = vector.load %arg7[%c0_83, %c10_84, %c0_85] : memref<8x48x128xf32, #tpu.memory_space<vmem>>, vector<8x32x128xf32>
    %78 = tpu.concatenate %74, %75, %76, %77 in 2 : vector<8x32x128xf32>, vector<8x32x128xf32>, vector<8x32x128xf32>, vector<8x32x128xf32> -> vector<8x32x512xf32>
    %79 = vector.shape_cast %78 : vector<8x32x512xf32> to vector<256x512xf32>
    %80 = arith.truncf %79 : vector<256x512xf32> to vector<256x512xbf16>
    %c3 = arith.constant 3 : index
    %c0_86 = arith.constant 0 : index
    %c0_87 = arith.constant 0 : index
    %81 = vector.load %arg2[%c3, %c0_86, %c0_87] : memref<4x512x128xbf16, #tpu.memory_space<vmem>>, vector<1x512x128xbf16>
    %82 = vector.shape_cast %81 : vector<1x512x128xbf16> to vector<512x128xbf16>
    %cst_88 = arith.constant dense<0.000000e+00> : vector<256x128xf32>
    %83 = tpu.matmul %80, %82, %cst_88 {dimension_numbers = #tpu.dot_dimension_numbers<[1], [0], [0], [1], [0, 0, 1, 1], [], []>} : vector<256x512xbf16>, vector<512x128xbf16>, vector<256x128xf32> -> vector<256x128xf32>
    %c3_89 = arith.constant 3 : index
    %c0_90 = arith.constant 0 : index
    %c0_91 = arith.constant 0 : index
    %84 = vector.load %arg3[%c3_89, %c0_90, %c0_91] : memref<4x1x128xf32, #tpu.memory_space<vmem>>, vector<1x1x128xf32>
    %85 = vector.shape_cast %84 : vector<1x1x128xf32> to vector<1x128xf32>
    %86 = vector.broadcast %85 : vector<1x128xf32> to vector<256x128xf32>
    %87 = arith.addf %83, %86 : vector<256x128xf32>
    %88 = vector.shape_cast %87 : vector<256x128xf32> to vector<8x32x128xf32>
    %c28_i32 = arith.constant 28 : i32
    %89 = vector.broadcast %c28_i32 : i32 to vector<8x32x1xi32>
    %90 = arith.cmpi slt, %7, %89 : vector<8x32x1xi32>
    %cst_92 = arith.constant 0.000000e+00 : f32
    %91 = vector.shape_cast %90 : vector<8x32x1xi1> to vector<8x32x1xi1>
    %92 = vector.broadcast %91 : vector<8x32x1xi1> to vector<8x32x128xi1>
    %93 = vector.broadcast %cst_92 : f32 to vector<8x32x128xf32>
    %94 = arith.select %92, %88, %93 : vector<8x32x128xi1>, vector<8x32x128xf32>
    %cst_93 = arith.constant 0.000000e+00 : f32
    %95 = vector.broadcast %cst_93 : f32 to vector<8x32x128xf32>
    %96 = arith.maximumf %94, %95 : vector<8x32x128xf32>
    %cst_94 = arith.constant dense<0.000000e+00> : vector<8x128xf32>
    %97 = vector.multi_reduction <add>, %96, %cst_94 [1] : vector<8x32x128xf32> to vector<8x128xf32>
    %cst_95 = arith.constant 0.0357142873 : f32
    %98 = vector.broadcast %cst_95 : f32 to vector<8x128xf32>
    %99 = arith.mulf %97, %98 : vector<8x128xf32>
    %c0_96 = arith.constant 0 : index
    %c0_97 = arith.constant 0 : index
    %100 = vector.load %arg4[%c0_96, %c0_97] : memref<1x128xf32, #tpu.memory_space<vmem>>, vector<1x128xf32>
    %101 = vector.broadcast %100 : vector<1x128xf32> to vector<8x128xf32>
    %102 = arith.mulf %99, %101 : vector<8x128xf32>
    %cst_98 = arith.constant dense<0.000000e+00> : vector<8xf32>
    %103 = vector.multi_reduction <add>, %102, %cst_98 [1] : vector<8x128xf32> to vector<8xf32>
    %104 = vector.shape_cast %103 : vector<8xf32> to vector<8x1xf32>
    %c0_99 = arith.constant 0 : index
    %c0_100 = arith.constant 0 : index
    %105 = vector.load %arg5[%c0_99, %c0_100] : memref<1x1xf32, #tpu.memory_space<vmem>>, vector<1x1xf32>
    %106 = vector.broadcast %105 : vector<1x1xf32> to vector<8x1xf32>
    %107 = arith.addf %104, %106 : vector<8x1xf32>
    %c0_101 = arith.constant 0 : index
    %c0_102 = arith.constant 0 : index
    %108 = vector.load %arg6[%c0_101, %c0_102] : memref<8x1xf32, #tpu.memory_space<vmem>>, vector<8x1xf32>
    tpu.vector_store %arg6[%c0_101, %c0_102], %107 {strides = array<i32>} : memref<8x1xf32, #tpu.memory_space<vmem>>, vector<8x1xf32>,
    return
  }
  func.func @transform_0(%arg0: i32) -> (i32, i32, i32) {
    %c0_i32 = arith.constant 0 : i32
    %c0_i32_0 = arith.constant 0 : i32
    %c0_i32_1 = arith.constant 0 : i32
    return %arg0, %c0_i32, %c0_i32_0 : i32, i32, i32
  }
  func.func @transform_1(%arg0: i32) -> (i32, i32, i32) {
    %c0_i32 = arith.constant 0 : i32
    %c0_i32_0 = arith.constant 0 : i32
    %c0_i32_1 = arith.constant 0 : i32
    %c0_i32_2 = arith.constant 0 : i32
    return %c0_i32, %c0_i32_0, %c0_i32_1 : i32, i32, i32
  }
  func.func @transform_2(%arg0: i32) -> (i32, i32, i32) {
    %c0_i32 = arith.constant 0 : i32
    %c0_i32_0 = arith.constant 0 : i32
    %c0_i32_1 = arith.constant 0 : i32
    %c0_i32_2 = arith.constant 0 : i32
    return %c0_i32, %c0_i32_0, %c0_i32_1 : i32, i32, i32
  }
  func.func @transform_3(%arg0: i32) -> (i32, i32) {
    %c0_i32 = arith.constant 0 : i32
    %c0_i32_0 = arith.constant 0 : i32
    %c0_i32_1 = arith.constant 0 : i32
    return %c0_i32, %c0_i32_0 : i32, i32
  }
  func.func @transform_4(%arg0: i32) -> (i32, i32) {
    %c0_i32 = arith.constant 0 : i32
    %c0_i32_0 = arith.constant 0 : i32
    %c0_i32_1 = arith.constant 0 : i32
    return %c0_i32, %c0_i32_0 : i32, i32
  }
  func.func @transform_5(%arg0: i32) -> (i32, i32) {
    %c0_i32 = arith.constant 0 : i32
    %c0_i32_0 = arith.constant 0 : i32
    return %arg0, %c0_i32 : i32, i32
  }
}

</mosaic_0001>

<bundles_post_ra>
// kernel: critic_forward.1
= control target key start
LH: loop header
LB: loop body
LE: loop exit
PB: predicated region body
PF: predicated region fallthrough
CT: control target
= control target key end

     0   :  { %s5148_s20 = smov 0   ;;  %s6355_s0 = inlined_call_operand.vmem [shape: bf16[16,32,128], index: 0, kind: input, shape index: {}]   ;;  %s6356_s1 = inlined_call_operand.vmem [shape: bf16[4,512,128], index: 1, kind: input, shape index: {}]   ;;  %s6357_s2 = inlined_call_operand.vmem [shape: f32[4,1,128], index: 2, kind: input, shape index: {}]   ;;  %s6358_s3 = inlined_call_operand.vmem [shape: f32[1,128], index: 3, kind: input, shape index: {}]   ;;  %s6359_s4 = inlined_call_operand.<no memory space> [shape: f32[1,1], index: 4, kind: input, shape index: {}]   ;;  %s6360_s5 = inlined_call_operand.vmem [shape: f32[16,1], index: 5, kind: output, shape index: {}]  }
   0x1   :  { %v10_v0 = vstv %s6359_s4 }
   0x2   :  { %11 = vst [vmem:[#allocation3] sm:$0x1] %v10_v0 }
   0x3 LB: > { %s5154_s21 = sadd.s32 4294967295, %s5111_s20   ;;  %p4077_p0 = scmp.ge.s32.totalorder %s5111_s20, 1  ;;  %s5111_s20 = sphi %s5148_s20, %s17_s20  }
   0x4   : > { %p191_p1 = scmp.lt.s32.totalorder %s5111_s20, 3 }
   0x6   : > { %p192_p2 = pnand %p4077_p0, %p191_p1 }
   0x7   : > { %s4078_s27 = sshll.u32 (!%p192_p2), %s5154_s21, 3  ;;  %p226_p4 = scmp.lt.s32.totalorder (!%p192_p2), %s5154_s21, 1 }
   0x8   : > { %195 = sbr.rel (%p192_p2) target bundleno = 1342 (0x53e), region = 40  ;;  %p220_p3 = scmp.lt.s32.totalorder (!%p192_p2), %s4078_s27, 15 }
   0xd   : > { %v4799_v1 = vld [vmem:[%s6356_s1 + $0x38] sm:$0xff]  ;;  %v5113_v5 = vmov 0.0   ;;  %v4798_v6 = vld [vmem:[%s6356_s1 + $0x30] sm:$0xff]  ;;  %s6368_s27 = smov (!%p220_p3, %s4078_s27), 15  ;;  %v4797_v10 = vld [vmem:[%s6356_s1 + $0x28] sm:$0xff]  ;;  %vm5114_vm1 = vmmov 1  }
   0xe   : > { %v4807_v2 = vld [vmem:[%s6356_s1 + $0x78] sm:$0xff]  ;;  %230 = vst [vmem:[#allocation2] sm:$0xff] %v5113_v5  ;;  %799 = vmatpush.bf16.msra.mxu0 %v4799_v1  ;;  %v4806_v7 = vld [vmem:[%s6356_s1 + $0x70] sm:$0xff]  ;;  %s4791_s13 = sshll.u32 %s6368_s27, 4  ;;  %v4805_v11 = vld [vmem:[%s6356_s1 + $0x68] sm:$0xff]  ;;  %vm3990_vm8 = vcmask 1041409  }
   0xf   : > { %v4815_v3 = vld [vmem:[%s6356_s1 + $0xb8] sm:$0xff]  ;;  %888 = vmatpush.bf16.msra.mxu1 %v4807_v2  ;;  %231 = vst [vmem:[#allocation2 + $0x30] sm:$0xff] %v5113_v5  ;;  %v4814_v8 = vld [vmem:[%s6356_s1 + $0xb0] sm:$0xff]  ;;  %v4813_v12 = vld [vmem:[%s6356_s1 + $0xa8] sm:$0xff]  ;;  %s5198_s25 = scalar_lea.vmem %s6355_s0, %s4791_s13  ;;  %vm3993_vm9 = vcmask 1042434   ;;  %vm3996_vm10 = vcmask 1043459  }
  0x10   : > { %v4823_v4 = vld [vmem:[%s6356_s1 + $0xf8] sm:$0xff]  ;;  %977 = vmatpush.bf16.msra.mxu2 %v4815_v3  ;;  %v4822_v9 = vld [vmem:[%s6356_s1 + $0xf0] sm:$0xff]  ;;  %232 = vst [vmem:[#allocation2 + $0x60] sm:$0xff] %v5113_v5  ;;  %v4821_v13 = vld [vmem:[%s6356_s1 + $0xe8] sm:$0xff]  ;;  %vm3999_vm11 = vcmask 1044484   ;;  %vm4002_vm12 = vcmask 1045509  }
  0x11   : > { %1066 = vmatpush.bf16.msra.mxu3 %v4823_v4  ;;  %233 = vst [vmem:[#allocation2 + $0x90] sm:$0xff] %v5113_v5  ;;  %v4796_v14 = vld [vmem:[%s6356_s1 + $0x20] sm:$0xff]  ;;  %v4795_v21 = vld [vmem:[%s6356_s1 + $0x18] sm:$0xff]  ;;  %v4984_v22 = vld [vmem:[%s5198_s25 + $0x8] sm:$0xff]   ;;  %vm4005_vm13 = vcmask 1046534   ;;  %vm4008_vm14 = vcmask 1047559  }
  0x12   : > { %234 = vst [vmem:[#allocation2 + $0xc0] sm:$0xff] %v5113_v5  ;;  %800 = vmatpush.bf16.msra.mxu0 %v4798_v6  ;;  %v4804_v15 = vld [vmem:[%s6356_s1 + $0x60] sm:$0xff]  ;;  %v4803_v23 = vld [vmem:[%s6356_s1 + $0x58] sm:$0xff]  ;;  %v4926_v26 = vunpack.c.l.bf16 %v4984_v22  ;;  %v4927_v27 = vunpack.c.h.bf16 %v4984_v22  ;;  %v4794_v28 = vld [vmem:[%s6356_s1 + $0x10] sm:$0xff]  ;;  %s6370_s21 = smov (!%p226_p4, %s5154_s21), 1  ;;  %vm4018_vm15 = vcmask 7168  }
  0x13   : > { %889 = vmatpush.bf16.msra.mxu1 %v4806_v7  ;;  %235 = vst [vmem:[#allocation2 + $0xf0] sm:$0xff] %v5113_v5  ;;  %v4921_v16 = vld [vmem:[%s5198_s25] sm:$0xff]   ;;  %v4811_v24 = vld [vmem:[%s6356_s1 + $0x98] sm:$0xff]  ;;  %v4802_v29 = vld [vmem:[%s6356_s1 + $0x50] sm:$0xff]  ;;  %s4081_s13 = sshll.u32 %s6370_s21, 3 }
  0x14   : > { %978 = vmatpush.bf16.msra.mxu2 %v4814_v8  ;;  %236 = vst [vmem:[#allocation2 + $0x120] sm:$0xff] %v5113_v5  ;;  %v4812_v17 = vld [vmem:[%s6356_s1 + $0xa0] sm:$0xff]  ;;  %v4922_v19 = vunpack.c.l.bf16 %v4921_v16  ;;  %v4923_v20 = vunpack.c.h.bf16 %v4921_v16  ;;  %v4819_v25 = vld [vmem:[%s6356_s1 + $0xd8] sm:$0xff]  ;;  %v4985_v30 = vld [vmem:[%s5198_s25 + $0x10] sm:$0xff]   ;;  %s229_s16 = scalar_lea.vmem %s6360_s5, %s4081_s13 }
  0x15   : > { %1067 = vmatpush.bf16.msra.mxu3 %v4822_v9  ;;  %237 = vst [vmem:[#allocation2 + $0x150] sm:$0xff] %v5113_v5  ;;  %v4820_v18 = vld [vmem:[%s6356_s1 + $0xe0] sm:$0xff]  ;;  %v4810_v31 = vld [vmem:[%s6356_s1 + $0x90] sm:$0xff]  ;;  %v4930_v33 = vunpack.c.l.bf16 %v4985_v30  ;;  %v4931_v34 = vunpack.c.h.bf16 %v4985_v30  ;;  %v4793_v35 = vld [vmem:[%s6356_s1 + $0x8] sm:$0xff] }
  0x16   : > { %238 = vst [vmem:[#allocation2 + $0x28] sm:$0xff] %v5113_v5  ;;  %801 = vmatpush.bf16.msra.mxu0 %v4797_v10  ;;  %v4818_v32 = vld [vmem:[%s6356_s1 + $0xd0] sm:$0xff]  ;;  %v4801_v36 = vld [vmem:[%s6356_s1 + $0x48] sm:$0xff]  ;;  %v4986_v37 = vld [vmem:[%s5198_s25 + $0x18] sm:$0xff]  }
  0x17   : > { %890 = vmatpush.bf16.msra.mxu1 %v4805_v11  ;;  %239 = vst [vmem:[#allocation2 + $0x58] sm:$0xff] %v5113_v5  ;;  %v4809_v38 = vld [vmem:[%s6356_s1 + $0x88] sm:$0xff]  ;;  %v4934_v40 = vunpack.c.l.bf16 %v4986_v37  ;;  %v4792_v41 = vld [vmem:[%s6356_s1] sm:$0xff]  ;;  %v4847_v51 = vld [vmem:[%s6356_s1 + $0x1b8] sm:$0xff]  ;;  %v4935_v61 = vunpack.c.h.bf16 %v4986_v37 }
  0x18   : > { %979 = vmatpush.bf16.msra.mxu2 %v4813_v12  ;;  %240 = vst [vmem:[#allocation2 + $0x88] sm:$0xff] %v5113_v5  ;;  %v4817_v39 = vld [vmem:[%s6356_s1 + $0xc8] sm:$0xff]  ;;  %v4800_v42 = vld [vmem:[%s6356_s1 + $0x40] sm:$0xff]  ;;  %v4831_v52 = vld [vmem:[%s6356_s1 + $0x138] sm:$0xff] }
  0x19   : > { %1068 = vmatpush.bf16.msra.mxu3 %v4821_v13  ;;  %241 = vst [vmem:[#allocation2 + $0xb8] sm:$0xff] %v5113_v5  ;;  %v4808_v43 = vld [vmem:[%s6356_s1 + $0x80] sm:$0xff]  ;;  %v4855_v57 = vld [vmem:[%s6356_s1 + $0x1f8] sm:$0xff]  ;;  %v4846_v59 = vld [vmem:[%s6356_s1 + $0x1b0] sm:$0xff] }
  0x1a   : > { %310 = vst [vmem:[#allocation2 + $0x8] sm:$0xff] %v4922_v19  ;;  %802 = vmatpush.bf16.msra.mxu0 %v4796_v14  ;;  %v4816_v44 = vld [vmem:[%s6356_s1 + $0xc0] sm:$0xff]  ;;  %v4839_v58 = vld [vmem:[%s6356_s1 + $0x178] sm:$0xff]  ;;  %v4830_v60 = vld [vmem:[%s6356_s1 + $0x130] sm:$0xff] }
  0x1b   : > { %891 = vmatpush.bf16.msra.mxu1 %v4804_v15  ;;  %311 = vst [vmem:[#allocation2 + $0x10] sm:$0xff] %v4923_v20  ;;  %v5008_v54 = vld [vmem:[%s5198_s25] sm:$0xff]  ;;  %v4854_v62 = vld [vmem:[%s6356_s1 + $0x1f0] sm:$0xff]  ;;  %v5009_v7 = vld [vmem:[%s5198_s25 + $0x8] sm:$0xff] }
  0x1c   : > { %980 = vmatpush.bf16.msra.mxu2 %v4812_v17  ;;  %242 = vst [vmem:[#allocation2 + $0xe8] sm:$0xff] %v5113_v5  ;;  %v4838_v63 = vld [vmem:[%s6356_s1 + $0x170] sm:$0xff]  ;;  %v4987_v10 = vld [vmem:[%s5198_s25 + $0x20] sm:$0xff]   ;;  %v4988_v13 = vld [vmem:[%s5198_s25 + $0x28] sm:$0xff]  }
  0x1d   : > { %1069 = vmatpush.bf16.msra.mxu3 %v4820_v18  ;;  %243 = vst [vmem:[#allocation2 + $0x118] sm:$0xff] %v5113_v5  ;;  %v4938_v11 = vunpack.c.l.bf16 %v4987_v10  ;;  %v4939_v12 = vunpack.c.h.bf16 %v4987_v10  ;;  %v4942_v14 = vunpack.c.l.bf16 %v4988_v13  ;;  %v5010_v22 = vld [vmem:[%s5198_s25 + $0x10] sm:$0xff]  ;;  %v5011_v37 = vld [vmem:[%s5198_s25 + $0x18] sm:$0xff] }
  0x1e   : > { %244 = vst [vmem:[#allocation2 + $0x148] sm:$0xff] %v5113_v5  ;;  %803 = vmatpush.bf16.msra.mxu0 %v4795_v21 }
  0x1f   : > { %892 = vmatpush.bf16.msra.mxu1 %v4803_v23  ;;  %245 = vst [vmem:[#allocation2 + $0x178] sm:$0xff] %v5113_v5 }
  0x20   : > { %981 = vmatpush.bf16.msra.mxu2 %v4811_v24  ;;  %312 = vst [vmem:[#allocation2 + $0x18] sm:$0xff] %v4926_v26  ;;  %v4829_v26 = vld [vmem:[%s6356_s1 + $0x128] sm:$0xff] }
  0x21   : > { %1070 = vmatpush.bf16.msra.mxu3 %v4819_v25  ;;  %313 = vst [vmem:[#allocation2 + $0x20] sm:$0xff] %v4927_v27  ;;  %v347_v45 = vld [vmem:[#allocation2 + $0x7] sm:$0xff] }
  0x22   : > { %314 = vst [vmem:[#allocation2 + $0x38] sm:$0xff] %v4930_v33  ;;  %804 = vmatpush.bf16.msra.mxu0 %v4794_v28  ;;  %v348_v46 = vld [vmem:[#allocation2 + $0xf] sm:$0xff]  ;;  %v4943_v28 = vunpack.c.h.bf16 %v4988_v13 }
  0x23   : > { %893 = vmatpush.bf16.msra.mxu1 %v4802_v29  ;;  %315 = vst [vmem:[#allocation2 + $0x40] sm:$0xff] %v4931_v34  ;;  %v411_v47 = vld [vmem:[#allocation2 + $0x9] sm:$0xff]  ;;  %v475_v53 = vpack.c.bf16 %v348_v46, %v347_v45 }
  0x24   : > { %982 = vmatpush.bf16.msra.mxu2 %v4810_v31  ;;  %316 = vst [vmem:[#allocation2 + $0x48] sm:$0xff] %v4934_v40  ;;  %v443_v49 = vld [vmem:[#allocation2 + $0xa] sm:$0xff] }
  0x25   : > { %1071 = vmatpush.bf16.msra.mxu3 %v4818_v32  ;;  %317 = vst [vmem:[#allocation2 + $0x50] sm:$0xff] %v4935_v61  ;;  %v4845_v25 = vld [vmem:[%s6356_s1 + $0x1a8] sm:$0xff]  ;;  %v4989_v40 = vld [vmem:[%s5198_s25 + $0x30] sm:$0xff]  }
  0x26   : > { %805 = vmatpush.bf16.msra.mxu0 %v4793_v35  ;;  %318 = vst [vmem:[#allocation2 + $0x68] sm:$0xff] %v4938_v11  ;;  %v4853_v27 = vld [vmem:[%s6356_s1 + $0x1e8] sm:$0xff] }
  0x27   : > { %894 = vmatpush.bf16.msra.mxu1 %v4801_v36  ;;  %v412_v48 = vld [vmem:[#allocation2 + $0x11] sm:$0xff]  ;;  %319 = vst [vmem:[#allocation2 + $0x70] sm:$0xff] %v4939_v12  ;;  %v4837_v29 = vld [vmem:[%s6356_s1 + $0x168] sm:$0xff] }
  0x28   : > { %983 = vmatpush.bf16.msra.mxu2 %v4809_v38  ;;  %v444_v50 = vld [vmem:[#allocation2 + $0x12] sm:$0xff]  ;;  %v477_v55 = vpack.c.bf16 %v412_v48, %v411_v47  ;;  %v350_v1 = vld [vmem:[#allocation2 + $0x1f] sm:$0xff]  ;;  %320 = vst [vmem:[#allocation2 + $0x78] sm:$0xff] %v4942_v14 }
  0x29   : > { %1072 = vmatpush.bf16.msra.mxu3 %v4817_v39  ;;  %v478_v56 = vpack.c.bf16 %v444_v50, %v443_v49  ;;  %v349_v0 = vld [vmem:[#allocation2 + $0x17] sm:$0xff]  ;;  %v414_v3 = vld [vmem:[#allocation2 + $0x21] sm:$0xff]  ;;  %321 = vst [vmem:[#allocation2 + $0x80] sm:$0xff] %v4943_v28 }
  0x2a   : > { %806 = vmatpush.bf16.msra.mxu0 %v4792_v41  ;;  %v413_v2 = vld [vmem:[#allocation2 + $0x19] sm:$0xff]  ;;  %v446_v5 = vld [vmem:[#allocation2 + $0x22] sm:$0xff]  ;;  %v479_v6 = vpack.c.bf16 %v350_v1, %v349_v0  ;;  %v4946_v41 = vunpack.c.l.bf16 %v4989_v40 }
  0x2b   : > { %895 = vmatpush.bf16.msra.mxu1 %v4800_v42  ;;  %v445_v4 = vld [vmem:[#allocation2 + $0x1a] sm:$0xff]  ;;  %v481_v8 = vpack.c.bf16 %v414_v3, %v413_v2  ;;  %v448_v20 = vld [vmem:[#allocation2 + $0x42] sm:$0xff]  ;;  %v4947_v42 = vunpack.c.h.bf16 %v4989_v40 }
  0x2c   : > { %984 = vmatpush.bf16.msra.mxu2 %v4808_v43  ;;  %v482_v9 = vpack.c.bf16 %v446_v5, %v445_v4  ;;  %v351_v15 = vld [vmem:[#allocation2 + $0x37] sm:$0xff]  ;;  %v352_v16 = vld [vmem:[#allocation2 + $0x3f] sm:$0xff]  ;;  %v353_v30 = vld [vmem:[#allocation2 + $0x47] sm:$0xff]  ;;  %322 = vst [vmem:[#allocation2 + $0x98] sm:$0xff] %v4946_v41 }
  0x2d   : > { %1073 = vmatpush.bf16.msra.mxu3 %v4816_v44  ;;  %807 = vmatmul.bf16.vlgmr.msra.gmra.mxu0 %v475_v53  ;;  %v415_v17 = vld [vmem:[#allocation2 + $0x39] sm:$0xff]  ;;  %v416_v18 = vld [vmem:[#allocation2 + $0x41] sm:$0xff]  ;;  %v483_v21 = vpack.c.bf16 %v352_v16, %v351_v15  ;;  %v354_v31 = vld [vmem:[#allocation2 + $0x4f] sm:$0xff]  ;;  %323 = vst [vmem:[#allocation2 + $0xa0] sm:$0xff] %v4947_v42 }
  0x2e   : > { %1685 = vmatpush.bf16.msrb.mxu0 %v4831_v52  ;;  %896 = vmatmul.bf16.vlgmr.msra.gmra.mxu1 %v5008_v54  ;;  %v447_v19 = vld [vmem:[#allocation2 + $0x3a] sm:$0xff]  ;;  %v485_v23 = vpack.c.bf16 %v416_v18, %v415_v17  ;;  %v417_v32 = vld [vmem:[#allocation2 + $0x49] sm:$0xff]  ;;  %v418_v33 = vld [vmem:[#allocation2 + $0x51] sm:$0xff]  ;;  %v487_v36 = vpack.c.bf16 %v354_v31, %v353_v30 }
  0x2f   : > { %985 = vmatmul.bf16.vlgmr.msra.gmra.mxu2 %v477_v55  ;;  %1774 = vmatpush.bf16.msrb.mxu1 %v4839_v58  ;;  %v486_v24 = vpack.c.bf16 %v448_v20, %v447_v19  ;;  %v449_v34 = vld [vmem:[#allocation2 + $0x4a] sm:$0xff]  ;;  %v450_v35 = vld [vmem:[#allocation2 + $0x52] sm:$0xff]  ;;  %v489_v38 = vpack.c.bf16 %v418_v33, %v417_v32  ;;  %v5012_v52 = vld [vmem:[%s5198_s25 + $0x20] sm:$0xff] }
  0x30   : > { %1863 = vmatpush.bf16.msrb.mxu2 %v4847_v51  ;;  %1074 = vmatmul.bf16.vlgmr.msra.gmra.mxu3 %v478_v56  ;;  %v490_v39 = vpack.c.bf16 %v450_v35, %v449_v34  ;;  %v4990_v43 = vld [vmem:[%s5198_s25 + $0x38] sm:$0xff]   ;;  %v355_v45 = vld [vmem:[#allocation2 + $0x67] sm:$0xff]  ;;  %v356_v46 = vld [vmem:[#allocation2 + $0x6f] sm:$0xff] }
  0x31   : > { %1952 = vmatpush.bf16.msrb.mxu3 %v4855_v57  ;;  %v4950_v44 = vunpack.c.l.bf16 %v4990_v43  ;;  %v419_v47 = vld [vmem:[#allocation2 + $0x69] sm:$0xff]  ;;  %v420_v48 = vld [vmem:[#allocation2 + $0x71] sm:$0xff]  ;;  %v491_v51 = vpack.c.bf16 %v356_v46, %v355_v45  ;;  %v4844_v55 = vld [vmem:[%s6356_s1 + $0x1a0] sm:$0xff]  ;;  %v4951_v58 = vunpack.c.h.bf16 %v4990_v43 }
  0x32   : > { %1686 = vmatpush.bf16.msrb.mxu0 %v4830_v60  ;;  %v451_v49 = vld [vmem:[#allocation2 + $0x6a] sm:$0xff]  ;;  %v452_v50 = vld [vmem:[#allocation2 + $0x72] sm:$0xff]  ;;  %v493_v53 = vpack.c.bf16 %v420_v48, %v419_v47  ;;  %v4828_v56 = vld [vmem:[%s6356_s1 + $0x120] sm:$0xff] }
  0x33   : > { %1775 = vmatpush.bf16.msrb.mxu1 %v4838_v63  ;;  %324 = vst [vmem:[#allocation2 + $0xa8] sm:$0xff] %v4950_v44  ;;  %v494_v54 = vpack.c.bf16 %v452_v50, %v451_v49  ;;  %v4852_v57 = vld [vmem:[%s6356_s1 + $0x1e0] sm:$0xff]  ;;  %v357_v60 = vld [vmem:[#allocation2 + $0x77] sm:$0xff]  ;;  %v5013_v3 = vld [vmem:[%s5198_s25 + $0x28] sm:$0xff] }
  0x34   : > { %1864 = vmatpush.bf16.msrb.mxu2 %v4846_v59  ;;  %v4836_v59 = vld [vmem:[%s6356_s1 + $0x160] sm:$0xff]  ;;  %325 = vst [vmem:[#allocation2 + $0xb0] sm:$0xff] %v4951_v58  ;;  %v359_v11 = vld [vmem:[#allocation2 + $0x97] sm:$0xff] }
  0x35   : > { %1953 = vmatpush.bf16.msrb.mxu3 %v4854_v62  ;;  %v358_v61 = vld [vmem:[#allocation2 + $0x7f] sm:$0xff]  ;;  %v5014_v18 = vld [vmem:[%s5198_s25 + $0x30] sm:$0xff] }
  0x36   : > { %1687 = vmatpush.bf16.msrb.mxu0 %v4829_v26  ;;  %v421_v62 = vld [vmem:[#allocation2 + $0x79] sm:$0xff]  ;;  %v422_v63 = vld [vmem:[#allocation2 + $0x81] sm:$0xff]  ;;  %v495_v2 = vpack.c.bf16 %v358_v61, %v357_v60  ;;  %v4850_v58 = vld [vmem:[%s6356_s1 + $0x1d0] sm:$0xff] }
  0x37   : > { %1776 = vmatpush.bf16.msrb.mxu1 %v4837_v29  ;;  %v453_v0 = vld [vmem:[#allocation2 + $0x7a] sm:$0xff]  ;;  %v454_v1 = vld [vmem:[#allocation2 + $0x82] sm:$0xff]  ;;  %v497_v4 = vpack.c.bf16 %v422_v63, %v421_v62 }
  0x38   : > { %1865 = vmatpush.bf16.msrb.mxu2 %v4845_v25  ;;  %v498_v5 = vpack.c.bf16 %v454_v1, %v453_v0  ;;  %v360_v12 = vld [vmem:[#allocation2 + $0x9f] sm:$0xff] }
  0x39   : > { %1954 = vmatpush.bf16.msrb.mxu3 %v4853_v27  ;;  %v423_v13 = vld [vmem:[#allocation2 + $0x99] sm:$0xff]  ;;  %v499_v17 = vpack.c.bf16 %v360_v12, %v359_v11 }
  0x3a   : > { %1688 = vmatpush.bf16.msrb.mxu0 %v4828_v56  ;;  %v424_v14 = vld [vmem:[#allocation2 + $0xa1] sm:$0xff]  ;;  %v4835_v28 = vld [vmem:[%s6356_s1 + $0x158] sm:$0xff]  ;;  %v5343_v41 = vld [vmem:[%s6357_s2] ss:$0 sm:$0xff] }
  0x3b   : > { %1777 = vmatpush.bf16.msrb.mxu1 %v4836_v59  ;;  %v455_v15 = vld [vmem:[#allocation2 + $0x9a] sm:$0xff]  ;;  %v456_v16 = vld [vmem:[#allocation2 + $0xa2] sm:$0xff]  ;;  %v501_v19 = vpack.c.bf16 %v424_v14, %v423_v13  ;;  %v362_v26 = vld [vmem:[#allocation2 + $0xaf] sm:$0xff] }
  0x3c   : > { %1866 = vmatpush.bf16.msrb.mxu2 %v4844_v55  ;;  %v502_v20 = vpack.c.bf16 %v456_v16, %v455_v15  ;;  %v361_v25 = vld [vmem:[#allocation2 + $0xa7] sm:$0xff]  ;;  %v426_v29 = vld [vmem:[#allocation2 + $0xb1] sm:$0xff] }
  0x3d   : > { %812 = vmatmul.bf16.gmra.mxu0 %v479_v6  ;;  %1955 = vmatpush.bf16.msrb.mxu3 %v4852_v57  ;;  %v4991_v6 = vld [vmem:[%s5198_s25 + $0x40] sm:$0xff]   ;;  %v425_v27 = vld [vmem:[#allocation2 + $0xa9] sm:$0xff]  ;;  %v458_v31 = vld [vmem:[#allocation2 + $0xb2] sm:$0xff]  ;;  %v503_v32 = vpack.c.bf16 %v362_v26, %v361_v25 }
  0x3e   : > { %901 = vmatmul.bf16.gmra.mxu1 %v5009_v7  ;;  %v4992_v7 = vld [vmem:[%s5198_s25 + $0x48] sm:$0xff]   ;;  %v5015_v33 = vld [vmem:[%s5198_s25 + $0x38] sm:$0xff]  ;;  %v505_v34 = vpack.c.bf16 %v426_v29, %v425_v27  ;;  %v5017_v49 = vld [vmem:[%s5198_s25 + $0x40] sm:$0xff] }
  0x3f   : > { %990 = vmatmul.bf16.gmra.mxu2 %v481_v8  ;;  %v4954_v8 = vunpack.c.l.bf16 %v4991_v6  ;;  %v4958_v10 = vunpack.c.l.bf16 %v4992_v7  ;;  %v457_v30 = vld [vmem:[#allocation2 + $0xaa] sm:$0xff]  ;;  %1778 = vmatpush.bf16.msrb.mxu1 %v4835_v28  ;;  %v4995_v27 = vld [vmem:[%s5198_s25 + $0x60] sm:$0xff]  }
  0x40   : > { %1079 = vmatmul.bf16.gmra.mxu3 %v482_v9  ;;  %v4955_v9 = vunpack.c.h.bf16 %v4991_v6  ;;  %v506_v35 = vpack.c.bf16 %v458_v31, %v457_v30  ;;  %v4842_v56 = vld [vmem:[%s6356_s1 + $0x190] sm:$0xff]  ;;  %v5018_v14 = vld [vmem:[%s5198_s25 + $0x48] sm:$0xff] }
  0x41   : > { %326 = vst [vmem:[#allocation2 + $0xc8] sm:$0xff] %v4954_v8  ;;  %v4826_v57 = vld [vmem:[%s6356_s1 + $0x110] sm:$0xff]  ;;  %v4996_v28 = vld [vmem:[%s5198_s25 + $0x68] sm:$0xff]  }
  0x42   : > { %327 = vst [vmem:[#allocation2 + $0xd0] sm:$0xff] %v4955_v9  ;;  %v4834_v6 = vld [vmem:[%s6356_s1 + $0x150] sm:$0xff] }
  0x43   : > { %328 = vst [vmem:[#allocation2 + $0xd8] sm:$0xff] %v4958_v10  ;;  %1779 = vmatpush.bf16.msrb.mxu1 %v4834_v6 }
  0x48   : > { %v363_v42 = vld [vmem:[#allocation2 + $0xc7] sm:$0xff] }
  0x49   : > { %v364_v43 = vld [vmem:[#allocation2 + $0xcf] sm:$0xff] }
  0x4a   : > { %v427_v44 = vld [vmem:[#allocation2 + $0xc9] sm:$0xff]  ;;  %v428_v45 = vld [vmem:[#allocation2 + $0xd1] sm:$0xff]  ;;  %v507_v48 = vpack.c.bf16 %v364_v43, %v363_v42 }
  0x4b   : > { %v459_v46 = vld [vmem:[#allocation2 + $0xca] sm:$0xff]  ;;  %v460_v47 = vld [vmem:[#allocation2 + $0xd2] sm:$0xff] }
  0x4d   : > { %817 = vmatmul.bf16.gmra.mxu0 %v483_v21  ;;  %v4843_v21 = vld [vmem:[%s6356_s1 + $0x198] sm:$0xff] }
  0x4e   : > { %906 = vmatmul.bf16.gmra.mxu1 %v5010_v22  ;;  %v4827_v22 = vld [vmem:[%s6356_s1 + $0x118] sm:$0xff]  ;;  %1867 = vmatpush.bf16.msrb.mxu2 %v4843_v21 }
  0x4f   : > { %995 = vmatmul.bf16.gmra.mxu2 %v485_v23  ;;  %v4851_v23 = vld [vmem:[%s6356_s1 + $0x1d8] sm:$0xff]  ;;  %1689 = vmatpush.bf16.msrb.mxu0 %v4827_v22 }
  0x50   : > { %1084 = vmatmul.bf16.gmra.mxu3 %v486_v24  ;;  %v4959_v24 = vunpack.c.h.bf16 %v4992_v7 }
  0x51   : > { %1956 = vmatpush.bf16.msrb.mxu3 %v4851_v23 }
  0x52   : > { %329 = vst [vmem:[#allocation2 + $0xe0] sm:$0xff] %v4959_v24  ;;  %1868 = vmatpush.bf16.msrb.mxu2 %v4842_v56  ;;  %v342_v24 = vlaneseq }
  0x53   : > { %1690 = vmatpush.bf16.msrb.mxu0 %v4826_v57 }
  0x55   : > { %1957 = vmatpush.bf16.msrb.mxu3 %v4850_v58 }
  0x59   : > { %v430_v7 = vld [vmem:[#allocation2 + $0xe1] sm:$0xff] }
  0x5a   : > { %v461_v8 = vld [vmem:[#allocation2 + $0xda] sm:$0xff]  ;;  %v462_v9 = vld [vmem:[#allocation2 + $0xe2] sm:$0xff] }
  0x5d   : > { %822 = vmatmul.bf16.gmra.mxu0 %v487_v36  ;;  %v4993_v36 = vld [vmem:[%s5198_s25 + $0x50] sm:$0xff]  }
  0x5e   : > { %911 = vmatmul.bf16.gmra.mxu1 %v5011_v37  ;;  %v4994_v37 = vld [vmem:[%s5198_s25 + $0x58] sm:$0xff]  }
  0x5f   : > { %1000 = vmatmul.bf16.gmra.mxu2 %v489_v38  ;;  %v4962_v38 = vunpack.c.l.bf16 %v4993_v36  ;;  %v4966_v40 = vunpack.c.l.bf16 %v4994_v37  ;;  %v4967_v0 = vunpack.c.h.bf16 %v4994_v37 }
  0x60   : > { %1089 = vmatmul.bf16.gmra.mxu3 %v490_v39  ;;  %v4963_v39 = vunpack.c.h.bf16 %v4993_v36 }
  0x61   : > { %330 = vst [vmem:[#allocation2 + $0xf8] sm:$0xff] %v4962_v38 }
  0x62   : > { %331 = vst [vmem:[#allocation2 + $0x100] sm:$0xff] %v4963_v39 }
  0x63   : > { %332 = vst [vmem:[#allocation2 + $0x108] sm:$0xff] %v4966_v40 }
  0x64   : > { %333 = vst [vmem:[#allocation2 + $0x110] sm:$0xff] %v4967_v0 }
  0x68   : > { %v367_v38 = vld [vmem:[#allocation2 + $0xf7] sm:$0xff] }
  0x69   : > { %v368_v39 = vld [vmem:[#allocation2 + $0xff] sm:$0xff] }
  0x6a   : > { %v431_v40 = vld [vmem:[#allocation2 + $0xf9] sm:$0xff]  ;;  %v432_v43 = vld [vmem:[#allocation2 + $0x101] sm:$0xff] }
  0x6d   : > { %827 = vmatmul.bf16.gmra.mxu0 %v491_v51 }
  0x6e   : > { %916 = vmatmul.bf16.gmra.mxu1 %v5012_v52  ;;  %v509_v52 = vpack.c.bf16 %v428_v45, %v427_v44  ;;  %v463_v44 = vld [vmem:[#allocation2 + $0xfa] sm:$0xff]  ;;  %v464_v45 = vld [vmem:[#allocation2 + $0x102] sm:$0xff] }
  0x6f   : > { %1005 = vmatmul.bf16.gmra.mxu2 %v493_v53  ;;  %v510_v53 = vpack.c.bf16 %v460_v47, %v459_v46 }
  0x70   : > { %1094 = vmatmul.bf16.gmra.mxu3 %v494_v54 }
  0x7d   : > { %832 = vmatmul.bf16.gmra.mxu0 %v495_v2 }
  0x7e   : > { %921 = vmatmul.bf16.gmra.mxu1 %v5013_v3  ;;  %v365_v3 = vld [vmem:[#allocation2 + $0xd7] sm:$0xff] }
  0x7f   : > { %1010 = vmatmul.bf16.gmra.mxu2 %v497_v4  ;;  %v366_v4 = vld [vmem:[#allocation2 + $0xdf] sm:$0xff] }
  0x80   : > { %1099 = vmatmul.bf16.gmra.mxu3 %v498_v5  ;;  %v429_v5 = vld [vmem:[#allocation2 + $0xd9] sm:$0xff]  ;;  %v511_v13 = vpack.c.bf16 %v366_v4, %v365_v3 }
  0x8d   : > { %837 = vmatmul.bf16.gmra.mxu0 %v499_v17 }
  0x8e   : > { %926 = vmatmul.bf16.gmra.mxu1 %v5014_v18  ;;  %v513_v18 = vpack.c.bf16 %v430_v7, %v429_v5  ;;  %v4975_v5 = vunpack.c.h.bf16 %v4996_v28 }
  0x8f   : > { %1015 = vmatmul.bf16.gmra.mxu2 %v501_v19  ;;  %v514_v19 = vpack.c.bf16 %v462_v9, %v461_v8  ;;  %v369_v8 = vld [vmem:[#allocation2 + $0x107] sm:$0xff]  ;;  %v370_v9 = vld [vmem:[#allocation2 + $0x10f] sm:$0xff] }
  0x90   : > { %1104 = vmatmul.bf16.gmra.mxu3 %v502_v20  ;;  %337 = vst [vmem:[#allocation2 + $0x140] sm:$0xff] %v4975_v5  ;;  %v4824_v5 = vld [vmem:[%s6356_s1 + $0x100] sm:$0xff] }
  0x9d   : > { %842 = vmatmul.bf16.gmra.mxu0 %v503_v32  ;;  %v4970_v32 = vunpack.c.l.bf16 %v4995_v27 }
  0x9e   : > { %931 = vmatmul.bf16.gmra.mxu1 %v5015_v33  ;;  %v4971_v33 = vunpack.c.h.bf16 %v4995_v27 }
  0x9f   : > { %1020 = vmatmul.bf16.gmra.mxu2 %v505_v34  ;;  %v343_v34 = vshrl.u32 %v342_v24, 7  ;;  %334 = vst [vmem:[#allocation2 + $0x128] sm:$0xff] %v4970_v32 }
  0xa0   : > { %1109 = vmatmul.bf16.gmra.mxu3 %v506_v35  ;;  %v4974_v35 = vunpack.c.l.bf16 %v4996_v28  ;;  %335 = vst [vmem:[#allocation2 + $0x130] sm:$0xff] %v4971_v33  ;;  %v4997_v33 = vld [vmem:[%s5198_s25 + $0x70] sm:$0xff]  }
  0xa1   : > { %v5376_v42 = vadd.s32 24, %v343_v34  ;;  %v4998_v34 = vld [vmem:[%s5198_s25 + $0x78] sm:$0xff]  }
  0xa2   : > { %336 = vst [vmem:[#allocation2 + $0x138] sm:$0xff] %v4974_v35 }
  0xa3   : > { %vm1158_vm0 = vcmp.lt.s32.totalorder %v5376_v42, 31  ;;  %vm2044_vm3 = vcmp.lt.s32.totalorder %v5376_v42, 30  ;;  %vm2930_vm5 = vcmp.lt.s32.totalorder %v5376_v42, 29  ;;  %vm3816_vm7 = vcmp.lt.s32.totalorder %v5376_v42, 28 }
  0xa4   : > { %vm5514_vm2 = vmpackc.low %vm1158_vm0, %vm5114_vm1 }
  0xa5   : > { %vm5844_vm4 = vmpackc.low %vm2044_vm3, %vm5114_vm1 }
  0xa6   : > { %vm6144_vm6 = vmpackc.low %vm2930_vm5, %vm5114_vm1 }
  0xaa   : > { %v808_v50 = vpop.f32.mrf.mxu0 }
  0xab   : > { %v897_v51 = vpop.f32.mrf.mxu1  ;;  %v809_v54 = vadd.f32 %v5343_v41, %v808_v50  ;;  %v5019_v50 = vld [vmem:[%s5198_s25 + $0x50] sm:$0xff] }
  0xad   : > { %847 = vmatmul.bf16.gmra.mxu0 %v507_v48  ;;  %v898_v55 = vadd.f32 %v897_v51, %v809_v54  ;;  %v517_v54 = vpack.c.bf16 %v432_v43, %v431_v40  ;;  %v4979_v40 = vunpack.c.h.bf16 %v4997_v33  ;;  %v4982_v43 = vunpack.c.l.bf16 %v4998_v34 }
  0xae   : > { %936 = vmatmul.bf16.gmra.mxu1 %v5017_v49  ;;  %v515_v49 = vpack.c.bf16 %v368_v39, %v367_v38  ;;  %v4978_v39 = vunpack.c.l.bf16 %v4997_v33 }
  0xaf   : > { %1025 = vmatmul.bf16.gmra.mxu2 %v509_v52  ;;  %339 = vst [vmem:[#allocation2 + $0x160] sm:$0xff] %v4979_v40 }
  0xb0   : > { %1114 = vmatmul.bf16.gmra.mxu3 %v510_v53  ;;  %338 = vst [vmem:[#allocation2 + $0x158] sm:$0xff] %v4978_v39 }
  0xb1   : > { %340 = vst [vmem:[#allocation2 + $0x168] sm:$0xff] %v4982_v43 }
  0xb2   : > { %v986_v59 = vpop.f32.mrf.mxu2  ;;  %v810_v62 = vpop.f32.mrf.mxu0 }
  0xb3   : > { %v1075_v60 = vpop.f32.mrf.mxu3  ;;  %v987_v61 = vadd.f32 %v986_v59, %v898_v55  ;;  %v899_v63 = vpop.f32.mrf.mxu1  ;;  %v811_v2 = vadd.f32 %v5343_v41, %v810_v62  ;;  %v518_v55 = vpack.c.bf16 %v464_v45, %v463_v44  ;;  %v4849_v62 = vld [vmem:[%s6356_s1 + $0x1c8] sm:$0xff] }
  0xb4   : > { %1958 = vmatpush.bf16.msrb.mxu3 %v4849_v62 }
  0xb5   : > { %v5356_v1 = vadd.f32 %v1075_v60, %v987_v61  ;;  %v900_v10 = vadd.f32 %v899_v63, %v811_v2  ;;  %v4841_v60 = vld [vmem:[%s6356_s1 + $0x188] sm:$0xff] }
  0xb6   : > { %v4825_v61 = vld [vmem:[%s6356_s1 + $0x108] sm:$0xff]  ;;  %1869 = vmatpush.bf16.msrb.mxu2 %v4841_v60 }
  0xb7   : > { %1199 = vst [vmem:[#allocation2 + $0x8] sm:$0xff] %v5356_v1  ;;  %1691 = vmatpush.bf16.msrb.mxu0 %v4825_v61 }
  0xba   : > { %v988_v11 = vpop.f32.mrf.mxu2  ;;  %v813_v16 = vpop.f32.mrf.mxu0 }
  0xbb   : > { %v1077_v12 = vpop.f32.mrf.mxu3  ;;  %v989_v15 = vadd.f32 %v988_v11, %v900_v10  ;;  %v902_v17 = vpop.f32.mrf.mxu1  ;;  %v814_v20 = vadd.f32 %v5343_v41, %v813_v16  ;;  %v433_v10 = vld [vmem:[#allocation2 + $0x109] sm:$0xff]  ;;  %1692 = vmatpush.bf16.msrb.mxu0 %v4824_v5 }
  0xbc   : > { %v4833_v11 = vld [vmem:[%s6356_s1 + $0x148] sm:$0xff] }
  0xbd   : > { %v5365_v21 = vadd.f32 %v1077_v12, %v989_v15  ;;  %852 = vmatmul.bf16.gmra.mxu0 %v511_v13  ;;  %v903_v22 = vadd.f32 %v902_v17, %v814_v20  ;;  %v434_v12 = vld [vmem:[#allocation2 + $0x111] sm:$0xff]  ;;  %1780 = vmatpush.bf16.msrb.mxu1 %v4833_v11 }
  0xbe   : > { %941 = vmatmul.bf16.gmra.mxu1 %v5018_v14  ;;  %v465_v13 = vld [vmem:[#allocation2 + $0x10a] sm:$0xff]  ;;  %v466_v14 = vld [vmem:[#allocation2 + $0x112] sm:$0xff] }
  0xbf   : > { %1200 = vst [vmem:[#allocation2 + $0x10] sm:$0xff] %v5365_v21  ;;  %1030 = vmatmul.bf16.gmra.mxu2 %v513_v18  ;;  %v1360_v23 = vpack.c.bf16 %v5365_v21, %v5356_v1  ;;  %v519_v18 = vpack.c.bf16 %v370_v9, %v369_v8  ;;  %v4886_v1 = vld [vmem:[%s6356_s1 + $0x2f0] sm:$0xff] }
  0xc0   : > { %1119 = vmatmul.bf16.gmra.mxu3 %v514_v19  ;;  %v5020_v19 = vld [vmem:[%s5198_s25 + $0x58] sm:$0xff] }
  0xc2   : > { %v991_v25 = vpop.f32.mrf.mxu2  ;;  %v815_v30 = vpop.f32.mrf.mxu0 }
  0xc3   : > { %v1080_v26 = vpop.f32.mrf.mxu3  ;;  %v992_v29 = vadd.f32 %v991_v25, %v903_v22  ;;  %v904_v31 = vpop.f32.mrf.mxu1  ;;  %v816_v37 = vadd.f32 %v5343_v41, %v815_v30  ;;  %v521_v25 = vpack.c.bf16 %v434_v12, %v433_v10 }
  0xc5   : > { %v5372_v36 = vadd.f32 %v1080_v26, %v992_v29  ;;  %v905_v46 = vadd.f32 %v904_v31, %v816_v37  ;;  %v522_v26 = vpack.c.bf16 %v466_v14, %v465_v13  ;;  %v4983_v13 = vunpack.c.h.bf16 %v4998_v34 }
  0xc7   : > { %1201 = vst [vmem:[#allocation2 + $0x18] sm:$0xff] %v5372_v36 }
  0xc8   : > { %341 = vst [vmem:[#allocation2 + $0x170] sm:$0xff] %v4983_v13  ;;  %v4863_v13 = vld [vmem:[%s6356_s1 + $0x238] sm:$0xff] }
  0xc9   : > { %2571 = vmatpush.bf16.msra.mxu0 %v4863_v13 }
  0xca   : > { %v993_v47 = vpop.f32.mrf.mxu2  ;;  %v818_v52 = vpop.f32.mrf.mxu0 }
  0xcb   : > { %v1082_v48 = vpop.f32.mrf.mxu3  ;;  %v994_v51 = vadd.f32 %v993_v47, %v905_v46  ;;  %v907_v53 = vpop.f32.mrf.mxu1  ;;  %v819_v56 = vadd.f32 %v5343_v41, %v818_v52  ;;  %v371_v46 = vld [vmem:[#allocation2 + $0x127] sm:$0xff]  ;;  %v372_v47 = vld [vmem:[#allocation2 + $0x12f] sm:$0xff] }
  0xcd   : > { %v5381_v57 = vadd.f32 %v1082_v48, %v994_v51  ;;  %857 = vmatmul.bf16.gmra.mxu0 %v515_v49  ;;  %v908_v59 = vadd.f32 %v907_v53, %v819_v56  ;;  %v435_v48 = vld [vmem:[#allocation2 + $0x129] sm:$0xff]  ;;  %v436_v49 = vld [vmem:[#allocation2 + $0x131] sm:$0xff]  ;;  %v5021_v56 = vld [vmem:[%s5198_s25 + $0x60] sm:$0xff] }
  0xce   : > { %946 = vmatmul.bf16.gmra.mxu1 %v5019_v50  ;;  %v467_v50 = vld [vmem:[#allocation2 + $0x12a] sm:$0xff]  ;;  %v468_v51 = vld [vmem:[#allocation2 + $0x132] sm:$0xff]  ;;  %v525_v61 = vpack.c.bf16 %v436_v49, %v435_v48 }
  0xcf   : > { %v1170_v58 = vsel %vm1158_vm0, %v5381_v57, 0.0  ;;  %1035 = vmatmul.bf16.gmra.mxu2 %v517_v54  ;;  %v526_v62 = vpack.c.bf16 %v468_v51, %v467_v50 }
  0xd0   : > { %1124 = vmatmul.bf16.gmra.mxu3 %v518_v55  ;;  %1202 = vst [vmem:[#allocation2 + $0x20] sm:$0xff] %v1170_v58  ;;  %v523_v55 = vpack.c.bf16 %v372_v47, %v371_v46 }
  0xd2   : > { %v996_v63 = vpop.f32.mrf.mxu2  ;;  %v820_v3 = vpop.f32.mrf.mxu0 }
  0xd3   : > { %v1085_v0 = vpop.f32.mrf.mxu3  ;;  %v997_v2 = vadd.f32 %v996_v63, %v908_v59  ;;  %v909_v4 = vpop.f32.mrf.mxu1  ;;  %v821_v7 = vadd.f32 %v5343_v41, %v820_v3 }
  0xd5   : > { %v5395_v6 = vadd.f32 %v1085_v0, %v997_v2  ;;  %v910_v15 = vadd.f32 %v909_v4, %v821_v7  ;;  %v4840_v4 = vld [vmem:[%s6356_s1 + $0x180] sm:$0xff] }
  0xd6   : > { %v4848_v7 = vld [vmem:[%s6356_s1 + $0x1c0] sm:$0xff]  ;;  %1870 = vmatpush.bf16.msrb.mxu2 %v4840_v4 }
  0xd7   : > { %1203 = vst [vmem:[#allocation2 + $0x38] sm:$0xff] %v5395_v6  ;;  %1959 = vmatpush.bf16.msrb.mxu3 %v4848_v7 }
  0xda   : > { %v998_v16 = vpop.f32.mrf.mxu2  ;;  %v823_v22 = vpop.f32.mrf.mxu0 }
  0xdb   : > { %v1087_v17 = vpop.f32.mrf.mxu3  ;;  %v999_v20 = vadd.f32 %v998_v16, %v910_v15  ;;  %v912_v24 = vpop.f32.mrf.mxu1  ;;  %v824_v27 = vadd.f32 %v5343_v41, %v823_v22  ;;  %v373_v16 = vld [vmem:[#allocation2 + $0x137] sm:$0xff] }
  0xdc   : > { %v469_v22 = vld [vmem:[#allocation2 + $0x13a] sm:$0xff] }
  0xdd   : > { %v5404_v28 = vadd.f32 %v1087_v17, %v999_v20  ;;  %862 = vmatmul.bf16.gmra.mxu0 %v519_v18  ;;  %v913_v29 = vadd.f32 %v912_v24, %v824_v27  ;;  %v374_v17 = vld [vmem:[#allocation2 + $0x13f] sm:$0xff] }
  0xde   : > { %951 = vmatmul.bf16.gmra.mxu1 %v5020_v19  ;;  %v437_v18 = vld [vmem:[#allocation2 + $0x139] sm:$0xff]  ;;  %v438_v20 = vld [vmem:[#allocation2 + $0x141] sm:$0xff] }
  0xdf   : > { %1204 = vst [vmem:[#allocation2 + $0x40] sm:$0xff] %v5404_v28  ;;  %1040 = vmatmul.bf16.gmra.mxu2 %v521_v25  ;;  %v1368_v30 = vpack.c.bf16 %v5404_v28, %v5395_v6  ;;  %v4832_v19 = vld [vmem:[%s6356_s1 + $0x140] sm:$0xff]  ;;  %v4885_v6 = vld [vmem:[%s6356_s1 + $0x2e8] sm:$0xff] }
  0xe0   : > { %1129 = vmatmul.bf16.gmra.mxu3 %v522_v26  ;;  %v470_v24 = vld [vmem:[#allocation2 + $0x142] sm:$0xff]  ;;  %1781 = vmatpush.bf16.msrb.mxu1 %v4832_v19 }
  0xe2   : > { %v1001_v31 = vpop.f32.mrf.mxu2  ;;  %v825_v37 = vpop.f32.mrf.mxu0 }
  0xe3   : > { %v1090_v32 = vpop.f32.mrf.mxu3  ;;  %v1002_v35 = vadd.f32 %v1001_v31, %v913_v29  ;;  %v914_v38 = vpop.f32.mrf.mxu1  ;;  %v826_v45 = vadd.f32 %v5343_v41, %v825_v37  ;;  %v527_v29 = vpack.c.bf16 %v374_v17, %v373_v16  ;;  %v5022_v31 = vld [vmem:[%s5198_s25 + $0x68] sm:$0xff]  ;;  %v530_v37 = vpack.c.bf16 %v470_v24, %v469_v22 }
  0xe5   : > { %v5411_v44 = vadd.f32 %v1090_v32, %v1002_v35  ;;  %v915_v52 = vadd.f32 %v914_v38, %v826_v45  ;;  %v529_v35 = vpack.c.bf16 %v438_v20, %v437_v18 }
  0xe7   : > { %1205 = vst [vmem:[#allocation2 + $0x48] sm:$0xff] %v5411_v44 }
  0xea   : > { %v1003_v53 = vpop.f32.mrf.mxu2  ;;  %v828_v59 = vpop.f32.mrf.mxu0 }
  0xeb   : > { %v1092_v54 = vpop.f32.mrf.mxu3  ;;  %v1004_v58 = vadd.f32 %v1003_v53, %v915_v52  ;;  %v917_v60 = vpop.f32.mrf.mxu1  ;;  %v829_v63 = vadd.f32 %v5343_v41, %v828_v59  ;;  %v375_v52 = vld [vmem:[#allocation2 + $0x157] sm:$0xff]  ;;  %v376_v53 = vld [vmem:[#allocation2 + $0x15f] sm:$0xff] }
  0xed   : > { %v5417_v0 = vadd.f32 %v1092_v54, %v1004_v58  ;;  %867 = vmatmul.bf16.gmra.mxu0 %v523_v55  ;;  %v918_v3 = vadd.f32 %v917_v60, %v829_v63  ;;  %v439_v54 = vld [vmem:[#allocation2 + $0x159] sm:$0xff]  ;;  %v440_v55 = vld [vmem:[#allocation2 + $0x161] sm:$0xff]  ;;  %v5023_v63 = vld [vmem:[%s5198_s25 + $0x70] sm:$0xff] }
  0xee   : > { %956 = vmatmul.bf16.gmra.mxu1 %v5021_v56  ;;  %v471_v56 = vld [vmem:[#allocation2 + $0x15a] sm:$0xff]  ;;  %v472_v58 = vld [vmem:[#allocation2 + $0x162] sm:$0xff]  ;;  %v533_v5 = vpack.c.bf16 %v440_v55, %v439_v54 }
  0xef   : > { %v1174_v2 = vsel %vm1158_vm0, %v5417_v0, 0.0  ;;  %1045 = vmatmul.bf16.gmra.mxu2 %v525_v61  ;;  %v534_v7 = vpack.c.bf16 %v472_v58, %v471_v56 }
  0xf0   : > { %1134 = vmatmul.bf16.gmra.mxu3 %v526_v62  ;;  %1206 = vst [vmem:[#allocation2 + $0x50] sm:$0xff] %v1174_v2  ;;  %v531_v62 = vpack.c.bf16 %v376_v53, %v375_v52 }
  0xf2   : > { %v1006_v8 = vpop.f32.mrf.mxu2  ;;  %v830_v11 = vpop.f32.mrf.mxu0 }
  0xf3   : > { %v1095_v9 = vpop.f32.mrf.mxu3  ;;  %v1007_v10 = vadd.f32 %v1006_v8, %v918_v3  ;;  %v919_v12 = vpop.f32.mrf.mxu1  ;;  %v831_v15 = vadd.f32 %v5343_v41, %v830_v11 }
  0xf5   : > { %v5431_v14 = vadd.f32 %v1095_v9, %v1007_v10  ;;  %v920_v25 = vadd.f32 %v919_v12, %v831_v15  ;;  %v4879_v12 = vld [vmem:[%s6356_s1 + $0x2b8] sm:$0xff] }
  0xf6   : > { %v4887_v15 = vld [vmem:[%s6356_s1 + $0x2f8] sm:$0xff]  ;;  %2749 = vmatpush.bf16.msra.mxu2 %v4879_v12  ;;  %v1231_v12 = vld [vmem:[#allocation2 + $0x7] sm:$0xff] }
  0xf7   : > { %1207 = vst [vmem:[#allocation2 + $0x68] sm:$0xff] %v5431_v14  ;;  %2838 = vmatpush.bf16.msra.mxu3 %v4887_v15 }
  0xfa   : > { %v1008_v26 = vpop.f32.mrf.mxu2  ;;  %v833_v33 = vpop.f32.mrf.mxu0 }
  0xfb   : > { %v1097_v27 = vpop.f32.mrf.mxu3  ;;  %v1009_v32 = vadd.f32 %v1008_v26, %v920_v25  ;;  %v922_v34 = vpop.f32.mrf.mxu1  ;;  %v834_v38 = vadd.f32 %v5343_v41, %v833_v33  ;;  %v377_v25 = vld [vmem:[#allocation2 + $0x167] sm:$0xff]  ;;  %v378_v26 = vld [vmem:[#allocation2 + $0x16f] sm:$0xff]  ;;  %2839 = vmatpush.bf16.msra.mxu3 %v4886_v1 }
  0xfc   : > { %v474_v33 = vld [vmem:[#allocation2 + $0x172] sm:$0xff] }
  0xfd   : > { %v5440_v39 = vadd.f32 %v1097_v27, %v1009_v32  ;;  %872 = vmatmul.bf16.gmra.mxu0 %v527_v29  ;;  %v923_v40 = vadd.f32 %v922_v34, %v834_v38  ;;  %v441_v27 = vld [vmem:[#allocation2 + $0x169] sm:$0xff]  ;;  %v4871_v29 = vld [vmem:[%s6356_s1 + $0x278] sm:$0xff]  ;;  %v535_v38 = vpack.c.bf16 %v378_v26, %v377_v25 }
  0xfe   : > { %961 = vmatmul.bf16.gmra.mxu1 %v5022_v31  ;;  %v442_v31 = vld [vmem:[#allocation2 + $0x171] sm:$0xff] }
  0xff   : > { %1208 = vst [vmem:[#allocation2 + $0x70] sm:$0xff] %v5440_v39  ;;  %1050 = vmatmul.bf16.gmra.mxu2 %v529_v35  ;;  %v1376_v43 = vpack.c.bf16 %v5440_v39, %v5431_v14  ;;  %v473_v32 = vld [vmem:[#allocation2 + $0x16a] sm:$0xff]  ;;  %2660 = vmatpush.bf16.msra.mxu1 %v4871_v29  ;;  %v4884_v14 = vld [vmem:[%s6356_s1 + $0x2e0] sm:$0xff] }
 0x100   : > { %1139 = vmatmul.bf16.gmra.mxu3 %v530_v37  ;;  %v4878_v26 = vld [vmem:[%s6356_s1 + $0x2b0] sm:$0xff] }
 0x101   : > { %2750 = vmatpush.bf16.msra.mxu2 %v4878_v26  ;;  %2840 = vmatpush.bf16.msra.mxu3 %v4885_v6 }
 0x102   : > { %v1011_v45 = vpop.f32.mrf.mxu2  ;;  %v835_v48 = vpop.f32.mrf.mxu0 }
 0x103   : > { %v1100_v46 = vpop.f32.mrf.mxu3  ;;  %v1012_v47 = vadd.f32 %v1011_v45, %v923_v40  ;;  %v924_v49 = vpop.f32.mrf.mxu1  ;;  %v836_v51 = vadd.f32 %v5343_v41, %v835_v48  ;;  %v5024_v40 = vld [vmem:[%s5198_s25 + $0x78] sm:$0xff]  ;;  %v537_v48 = vpack.c.bf16 %v442_v31, %v441_v27  ;;  %v4862_v27 = vld [vmem:[%s6356_s1 + $0x230] sm:$0xff] }
 0x104   : > { %2572 = vmatpush.bf16.msra.mxu0 %v4862_v27  ;;  %v1235_v27 = vld [vmem:[#allocation2 + $0x37] sm:$0xff] }
 0x105   : > { %v5445_v50 = vadd.f32 %v1100_v46, %v1012_v47  ;;  %v925_v59 = vadd.f32 %v924_v49, %v836_v51  ;;  %v538_v49 = vpack.c.bf16 %v474_v33, %v473_v32  ;;  %2841 = vmatpush.bf16.msra.mxu3 %v4884_v14 }
 0x107   : > { %1209 = vst [vmem:[#allocation2 + $0x78] sm:$0xff] %v5445_v50 }
 0x10a   : > { %v1013_v60 = vpop.f32.mrf.mxu2  ;;  %v838_v3 = vpop.f32.mrf.mxu0 }
 0x10b   : > { %v1102_v61 = vpop.f32.mrf.mxu3  ;;  %v1014_v2 = vadd.f32 %v1013_v60, %v925_v59  ;;  %v927_v4 = vpop.f32.mrf.mxu1  ;;  %v839_v8 = vadd.f32 %v5343_v41, %v838_v3 }
 0x10d   : > { %v5451_v9 = vadd.f32 %v1102_v61, %v1014_v2  ;;  %877 = vmatmul.bf16.gmra.mxu0 %v531_v62  ;;  %v928_v11 = vadd.f32 %v927_v4, %v839_v8  ;;  %v1232_v2 = vld [vmem:[#allocation2 + $0xf] sm:$0xff] }
 0x10e   : > { %966 = vmatmul.bf16.gmra.mxu1 %v5023_v63  ;;  %v1359_v15 = vpack.c.bf16 %v1232_v2, %v1231_v12 }
 0x10f   : > { %v1178_v10 = vsel %vm1158_vm0, %v5451_v9, 0.0  ;;  %1055 = vmatmul.bf16.gmra.mxu2 %v533_v5  ;;  %v1296_v5 = vld [vmem:[#allocation2 + $0x11] sm:$0xff] }
 0x110   : > { %1144 = vmatmul.bf16.gmra.mxu3 %v534_v7  ;;  %1210 = vst [vmem:[#allocation2 + $0x80] sm:$0xff] %v1178_v10  ;;  %v1328_v7 = vld [vmem:[#allocation2 + $0x12] sm:$0xff] }
 0x112   : > { %v1016_v16 = vpop.f32.mrf.mxu2  ;;  %v840_v19 = vpop.f32.mrf.mxu0 }
 0x113   : > { %v1105_v17 = vpop.f32.mrf.mxu3  ;;  %v1017_v18 = vadd.f32 %v1016_v16, %v928_v11  ;;  %v929_v20 = vpop.f32.mrf.mxu1  ;;  %v841_v24 = vadd.f32 %v5343_v41, %v840_v19  ;;  %v1295_v16 = vld [vmem:[#allocation2 + $0x9] sm:$0xff] }
 0x114   : > { %v1361_v19 = vpack.c.bf16 %v1296_v5, %v1295_v16 }
 0x115   : > { %v5465_v22 = vadd.f32 %v1105_v17, %v1017_v18  ;;  %v930_v34 = vadd.f32 %v929_v20, %v841_v24  ;;  %v1327_v17 = vld [vmem:[#allocation2 + $0xa] sm:$0xff] }
 0x116   : > { %v1362_v20 = vpack.c.bf16 %v1328_v7, %v1327_v17 }
 0x117   : > { %1211 = vst [vmem:[#allocation2 + $0x98] sm:$0xff] %v5465_v22 }
 0x11a   : > { %v1018_v35 = vpop.f32.mrf.mxu2  ;;  %v843_v46 = vpop.f32.mrf.mxu0 }
 0x11b   : > { %v1107_v37 = vpop.f32.mrf.mxu3  ;;  %v1019_v45 = vadd.f32 %v1018_v35, %v930_v34  ;;  %v932_v47 = vpop.f32.mrf.mxu1  ;;  %v844_v51 = vadd.f32 %v5343_v41, %v843_v46  ;;  %v4870_v35 = vld [vmem:[%s6356_s1 + $0x270] sm:$0xff] }
 0x11c   : > { %2661 = vmatpush.bf16.msra.mxu1 %v4870_v35 }
 0x11d   : > { %v5474_v52 = vadd.f32 %v1107_v37, %v1019_v45  ;;  %882 = vmatmul.bf16.gmra.mxu0 %v535_v38  ;;  %v933_v53 = vadd.f32 %v932_v47, %v844_v51  ;;  %v1234_v38 = vld [vmem:[#allocation2 + $0x1f] sm:$0xff] }
 0x11e   : > { %971 = vmatmul.bf16.gmra.mxu1 %v5024_v40  ;;  %v1297_v40 = vld [vmem:[#allocation2 + $0x19] sm:$0xff]  ;;  %v1298_v47 = vld [vmem:[#allocation2 + $0x21] sm:$0xff] }
 0x11f   : > { %1212 = vst [vmem:[#allocation2 + $0xa0] sm:$0xff] %v5474_v52  ;;  %1060 = vmatmul.bf16.gmra.mxu2 %v537_v48  ;;  %v1384_v54 = vpack.c.bf16 %v5474_v52, %v5465_v22  ;;  %v1329_v48 = vld [vmem:[#allocation2 + $0x1a] sm:$0xff] }
 0x120   : > { %1149 = vmatmul.bf16.gmra.mxu3 %v538_v49  ;;  %v1330_v49 = vld [vmem:[#allocation2 + $0x22] sm:$0xff]  ;;  %v4883_v22 = vld [vmem:[%s6356_s1 + $0x2d8] sm:$0xff] }
 0x121   : > { %2842 = vmatpush.bf16.msra.mxu3 %v4883_v22 }
 0x122   : > { %v1021_v55 = vpop.f32.mrf.mxu2  ;;  %v845_v59 = vpop.f32.mrf.mxu0 }
 0x123   : > { %v1110_v56 = vpop.f32.mrf.mxu3  ;;  %v1022_v58 = vadd.f32 %v1021_v55, %v933_v53  ;;  %v934_v60 = vpop.f32.mrf.mxu1  ;;  %v846_v62 = vadd.f32 %v5343_v41, %v845_v59 }
 0x125   : > { %v5479_v61 = vadd.f32 %v1110_v56, %v1022_v58  ;;  %v935_v63 = vadd.f32 %v934_v60, %v846_v62  ;;  %v1233_v56 = vld [vmem:[#allocation2 + $0x17] sm:$0xff]  ;;  %v1365_v62 = vpack.c.bf16 %v1298_v47, %v1297_v40  ;;  %v4861_v40 = vld [vmem:[%s6356_s1 + $0x228] sm:$0xff] }
 0x126   : > { %v1363_v59 = vpack.c.bf16 %v1234_v38, %v1233_v56  ;;  %v4877_v38 = vld [vmem:[%s6356_s1 + $0x2a8] sm:$0xff]  ;;  %2573 = vmatpush.bf16.msra.mxu0 %v4861_v40 }
 0x127   : > { %1213 = vst [vmem:[#allocation2 + $0xa8] sm:$0xff] %v5479_v61  ;;  %2751 = vmatpush.bf16.msra.mxu2 %v4877_v38  ;;  %v1301_v56 = vld [vmem:[#allocation2 + $0x49] sm:$0xff] }
 0x128   : > { %v1239_v40 = vld [vmem:[#allocation2 + $0x67] sm:$0xff] }
 0x12a   : > { %v1023_v3 = vpop.f32.mrf.mxu2  ;;  %v848_v10 = vpop.f32.mrf.mxu0 }
 0x12b   : > { %v1112_v4 = vpop.f32.mrf.mxu3  ;;  %v1024_v8 = vadd.f32 %v1023_v3, %v935_v63  ;;  %v937_v11 = vpop.f32.mrf.mxu1  ;;  %v849_v13 = vadd.f32 %v5343_v41, %v848_v10  ;;  %v1366_v63 = vpack.c.bf16 %v1330_v49, %v1329_v48  ;;  %v5034_v3 = vpack.c.bf16 %v5381_v57, %v5372_v36 }
 0x12d   : > { %v5484_v18 = vadd.f32 %v1112_v4, %v1024_v8  ;;  %1693 = vmatmul.bf16.vlgmr.msrb.gmra.mxu0 %v1359_v15  ;;  %v938_v25 = vadd.f32 %v937_v11, %v849_v13  ;;  %v1236_v15 = vld [vmem:[#allocation2 + $0x3f] sm:$0xff] }
 0x12e   : > { %1782 = vmatmul.bf16.vlgmr.msrb.gmra.mxu1 %v1360_v23 }
 0x12f   : > { %v1182_v24 = vsel %vm1158_vm0, %v5484_v18, 0.0  ;;  %1871 = vmatmul.bf16.vlgmr.msrb.gmra.mxu2 %v1361_v19  ;;  %v1300_v19 = vld [vmem:[#allocation2 + $0x41] sm:$0xff] }
 0x130   : > { %1960 = vmatmul.bf16.vlgmr.msrb.gmra.mxu3 %v1362_v20  ;;  %1214 = vst [vmem:[#allocation2 + $0xb0] sm:$0xff] %v1182_v24  ;;  %v1332_v20 = vld [vmem:[#allocation2 + $0x42] sm:$0xff] }
 0x132   : > { %v1026_v21 = vpop.f32.mrf.mxu2  ;;  %v850_v31 = vpop.f32.mrf.mxu0 }
 0x133   : > { %v1115_v23 = vpop.f32.mrf.mxu3  ;;  %v1027_v29 = vadd.f32 %v1026_v21, %v938_v25  ;;  %v939_v32 = vpop.f32.mrf.mxu1  ;;  %v851_v34 = vadd.f32 %v5343_v41, %v850_v31  ;;  %v1367_v21 = vpack.c.bf16 %v1236_v15, %v1235_v27 }
 0x135   : > { %v5501_v33 = vadd.f32 %v1115_v23, %v1027_v29  ;;  %v940_v37 = vadd.f32 %v939_v32, %v851_v34  ;;  %v1299_v23 = vld [vmem:[#allocation2 + $0x39] sm:$0xff] }
 0x136   : > { %v1331_v29 = vld [vmem:[#allocation2 + $0x3a] sm:$0xff]  ;;  %v1369_v32 = vpack.c.bf16 %v1300_v19, %v1299_v23 }
 0x137   : > { %1215 = vst [vmem:[#allocation2 + $0xc8] sm:$0xff] %v5501_v33  ;;  %v1370_v34 = vpack.c.bf16 %v1332_v20, %v1331_v29 }
 0x13a   : > { %v1028_v45 = vpop.f32.mrf.mxu2  ;;  %v853_v53 = vpop.f32.mrf.mxu0 }
 0x13b   : > { %v1117_v46 = vpop.f32.mrf.mxu3  ;;  %v1029_v51 = vadd.f32 %v1028_v45, %v940_v37  ;;  %v942_v55 = vpop.f32.mrf.mxu1  ;;  %v854_v58 = vadd.f32 %v5343_v41, %v853_v53 }
 0x13d   : > { %v5509_v60 = vadd.f32 %v1117_v46, %v1029_v51  ;;  %1698 = vmatmul.bf16.gmra.mxu0 %v1363_v59  ;;  %v943_v4 = vadd.f32 %v942_v55, %v854_v58  ;;  %v4869_v51 = vld [vmem:[%s6356_s1 + $0x268] sm:$0xff] }
 0x13e   : > { %5035 = vmatmul.msk.bf16.gmra.mxu1 %vm5514_vm2, %v5034_v3  ;;  %v1238_v55 = vld [vmem:[#allocation2 + $0x4f] sm:$0xff]  ;;  %v1247_v22 = vld [vmem:[#allocation2 + $0xc7] sm:$0xff] }
 0x13f   : > { %1216 = vst [vmem:[#allocation2 + $0xd0] sm:$0xff] %v5509_v60  ;;  %1876 = vmatmul.bf16.gmra.mxu2 %v1365_v62  ;;  %v1392_v5 = vpack.c.bf16 %v5509_v60, %v5501_v33  ;;  %2662 = vmatpush.bf16.msra.mxu1 %v4869_v51  ;;  %v1302_v62 = vld [vmem:[#allocation2 + $0x51] sm:$0xff] }
 0x140   : > { %1965 = vmatmul.bf16.gmra.mxu3 %v1366_v63  ;;  %v1333_v63 = vld [vmem:[#allocation2 + $0x4a] sm:$0xff]  ;;  %v1334_v3 = vld [vmem:[#allocation2 + $0x52] sm:$0xff] }
 0x141   : > { %v1374_v15 = vpack.c.bf16 %v1334_v3, %v1333_v63  ;;  %v4882_v33 = vld [vmem:[%s6356_s1 + $0x2d0] sm:$0xff] }
 0x142   : > { %v1031_v7 = vpop.f32.mrf.mxu2  ;;  %v855_v11 = vpop.f32.mrf.mxu0  ;;  %2843 = vmatpush.bf16.msra.mxu3 %v4882_v33 }
 0x143   : > { %v1120_v8 = vpop.f32.mrf.mxu3  ;;  %v1032_v10 = vadd.f32 %v1031_v7, %v943_v4  ;;  %v944_v12 = vpop.f32.mrf.mxu1  ;;  %v856_v36 = vadd.f32 %v5343_v41, %v855_v11 }
 0x145   : > { %v5525_v13 = vadd.f32 %v1120_v8, %v1032_v10  ;;  %v945_v57 = vadd.f32 %v944_v12, %v856_v36  ;;  %v1237_v10 = vld [vmem:[#allocation2 + $0x47] sm:$0xff] }
 0x146   : > { %v1371_v12 = vpack.c.bf16 %v1238_v55, %v1237_v10  ;;  %v4876_v55 = vld [vmem:[%s6356_s1 + $0x2a0] sm:$0xff] }
 0x147   : > { %1217 = vst [vmem:[#allocation2 + $0xd8] sm:$0xff] %v5525_v13  ;;  %2752 = vmatpush.bf16.msra.mxu2 %v4876_v55  ;;  %v1305_v10 = vld [vmem:[#allocation2 + $0x79] sm:$0xff] }
 0x14a   : > { %v1033_v16 = vpop.f32.mrf.mxu2  ;;  %v858_v25 = vpop.f32.mrf.mxu0 }
 0x14b   : > { %v1122_v17 = vpop.f32.mrf.mxu3  ;;  %v1034_v24 = vadd.f32 %v1033_v16, %v945_v57  ;;  %v947_v26 = vpop.f32.mrf.mxu1  ;;  %v859_v1 = vadd.f32 %v5343_v41, %v858_v25  ;;  %v1373_v57 = vpack.c.bf16 %v1302_v62, %v1301_v56  ;;  %v5037_v16 = vpack.c.bf16 %v5417_v0, %v5411_v44  ;;  %v4860_v56 = vld [vmem:[%s6356_s1 + $0x220] sm:$0xff] }
 0x14c   : > { %2574 = vmatpush.bf16.msra.mxu0 %v4860_v56  ;;  %v1243_v56 = vld [vmem:[#allocation2 + $0x97] sm:$0xff] }
 0x14d   : > { %v5530_v31 = vadd.f32 %v1122_v17, %v1034_v24  ;;  %1703 = vmatmul.bf16.gmra.mxu0 %v1367_v21  ;;  %v948_v37 = vadd.f32 %v947_v26, %v859_v1  ;;  %v1240_v21 = vld [vmem:[#allocation2 + $0x6f] sm:$0xff] }
 0x14e   : > { %1792 = vmatmul.bf16.gmra.mxu1 %v1368_v30 }
 0x14f   : > { %v1186_v35 = vsel %vm1158_vm0, %v5530_v31, 0.0  ;;  %1881 = vmatmul.bf16.gmra.mxu2 %v1369_v32  ;;  %v1304_v32 = vld [vmem:[#allocation2 + $0x71] sm:$0xff] }
 0x150   : > { %1970 = vmatmul.bf16.gmra.mxu3 %v1370_v34  ;;  %1218 = vst [vmem:[#allocation2 + $0xe0] sm:$0xff] %v1186_v35  ;;  %v1336_v34 = vld [vmem:[#allocation2 + $0x72] sm:$0xff] }
 0x152   : > { %v1036_v28 = vpop.f32.mrf.mxu2  ;;  %v860_v46 = vpop.f32.mrf.mxu0 }
 0x153   : > { %v1125_v30 = vpop.f32.mrf.mxu3  ;;  %v1037_v45 = vadd.f32 %v1036_v28, %v948_v37  ;;  %v949_v47 = vpop.f32.mrf.mxu1  ;;  %v861_v49 = vadd.f32 %v5343_v41, %v860_v46  ;;  %v1375_v28 = vpack.c.bf16 %v1240_v21, %v1239_v40 }
 0x155   : > { %v5547_v48 = vadd.f32 %v1125_v30, %v1037_v45  ;;  %v950_v53 = vadd.f32 %v949_v47, %v861_v49  ;;  %v1303_v30 = vld [vmem:[#allocation2 + $0x69] sm:$0xff] }
 0x156   : > { %v1335_v45 = vld [vmem:[#allocation2 + $0x6a] sm:$0xff]  ;;  %v1377_v47 = vpack.c.bf16 %v1304_v32, %v1303_v30 }
 0x157   : > { %1219 = vst [vmem:[#allocation2 + $0xf8] sm:$0xff] %v5547_v48  ;;  %v1378_v49 = vpack.c.bf16 %v1336_v34, %v1335_v45 }
 0x15a   : > { %v1038_v58 = vpop.f32.mrf.mxu2  ;;  %v863_v7 = vpop.f32.mrf.mxu0 }
 0x15b   : > { %v1127_v59 = vpop.f32.mrf.mxu3  ;;  %v1039_v4 = vadd.f32 %v1038_v58, %v950_v53  ;;  %v952_v8 = vpop.f32.mrf.mxu1  ;;  %v864_v11 = vadd.f32 %v5343_v41, %v863_v7 }
 0x15d   : > { %v5555_v36 = vadd.f32 %v1127_v59, %v1039_v4  ;;  %1708 = vmatmul.bf16.gmra.mxu0 %v1371_v12  ;;  %v953_v17 = vadd.f32 %v952_v8, %v864_v11  ;;  %v4868_v4 = vld [vmem:[%s6356_s1 + $0x260] sm:$0xff] }
 0x15e   : > { %5038 = vmatmul.msk.bf16.gmra.mxu1 %vm5514_vm2, %v5037_v16  ;;  %v1242_v8 = vld [vmem:[#allocation2 + $0x7f] sm:$0xff]  ;;  %v1251_v33 = vld [vmem:[#allocation2 + $0xf7] sm:$0xff] }
 0x15f   : > { %1220 = vst [vmem:[#allocation2 + $0x100] sm:$0xff] %v5555_v36  ;;  %1886 = vmatmul.bf16.gmra.mxu2 %v1373_v57  ;;  %v1400_v19 = vpack.c.bf16 %v5555_v36, %v5547_v48  ;;  %2663 = vmatpush.bf16.msra.mxu1 %v4868_v4  ;;  %v1306_v57 = vld [vmem:[#allocation2 + $0x81] sm:$0xff] }
 0x160   : > { %1975 = vmatmul.bf16.gmra.mxu3 %v1374_v15  ;;  %v1337_v15 = vld [vmem:[#allocation2 + $0x7a] sm:$0xff]  ;;  %v1338_v16 = vld [vmem:[#allocation2 + $0x82] sm:$0xff] }
 0x161   : > { %v1382_v21 = vpack.c.bf16 %v1338_v16, %v1337_v15  ;;  %v4881_v48 = vld [vmem:[%s6356_s1 + $0x2c8] sm:$0xff] }
 0x162   : > { %v1041_v20 = vpop.f32.mrf.mxu2  ;;  %v865_v26 = vpop.f32.mrf.mxu0  ;;  %2844 = vmatpush.bf16.msra.mxu3 %v4881_v48 }
 0x163   : > { %v1130_v24 = vpop.f32.mrf.mxu3  ;;  %v1042_v25 = vadd.f32 %v1041_v20, %v953_v17  ;;  %v954_v27 = vpop.f32.mrf.mxu1  ;;  %v866_v44 = vadd.f32 %v5343_v41, %v865_v26 }
 0x165   : > { %v5564_v1 = vadd.f32 %v1130_v24, %v1042_v25  ;;  %v955_v0 = vadd.f32 %v954_v27, %v866_v44  ;;  %v1241_v25 = vld [vmem:[#allocation2 + $0x77] sm:$0xff] }
 0x166   : > { %v1379_v27 = vpack.c.bf16 %v1242_v8, %v1241_v25  ;;  %v4875_v8 = vld [vmem:[%s6356_s1 + $0x298] sm:$0xff]  ;;  %v1309_v25 = vld [vmem:[#allocation2 + $0xa9] sm:$0xff] }
 0x167   : > { %1221 = vst [vmem:[#allocation2 + $0x108] sm:$0xff] %v5564_v1  ;;  %2753 = vmatpush.bf16.msra.mxu2 %v4875_v8 }
 0x16a   : > { %v1043_v23 = vpop.f32.mrf.mxu2  ;;  %v868_v37 = vpop.f32.mrf.mxu0 }
 0x16b   : > { %v1132_v29 = vpop.f32.mrf.mxu3  ;;  %v1044_v35 = vadd.f32 %v1043_v23, %v955_v0  ;;  %v957_v38 = vpop.f32.mrf.mxu1  ;;  %v869_v6 = vadd.f32 %v5343_v41, %v868_v37  ;;  %v1381_v0 = vpack.c.bf16 %v1306_v57, %v1305_v10  ;;  %v5040_v23 = vpack.c.bf16 %v5451_v9, %v5445_v50  ;;  %v4859_v10 = vld [vmem:[%s6356_s1 + $0x218] sm:$0xff] }
 0x16c   : > { %2575 = vmatpush.bf16.msra.mxu0 %v4859_v10 }
 0x16d   : > { %v5569_v46 = vadd.f32 %v1132_v29, %v1044_v35  ;;  %1713 = vmatmul.bf16.gmra.mxu0 %v1375_v28  ;;  %v958_v53 = vadd.f32 %v957_v38, %v869_v6  ;;  %v1244_v28 = vld [vmem:[#allocation2 + $0x9f] sm:$0xff] }
 0x16e   : > { %1802 = vmatmul.bf16.gmra.mxu1 %v1376_v43 }
 0x16f   : > { %v1190_v51 = vsel %vm1158_vm0, %v5569_v46, 0.0  ;;  %1891 = vmatmul.bf16.gmra.mxu2 %v1377_v47  ;;  %v1308_v47 = vld [vmem:[#allocation2 + $0xa1] sm:$0xff] }
 0x170   : > { %1980 = vmatmul.bf16.gmra.mxu3 %v1378_v49  ;;  %1222 = vst [vmem:[#allocation2 + $0x110] sm:$0xff] %v1190_v51  ;;  %v1340_v49 = vld [vmem:[#allocation2 + $0xa2] sm:$0xff] }
 0x172   : > { %v1046_v39 = vpop.f32.mrf.mxu2  ;;  %v870_v59 = vpop.f32.mrf.mxu0 }
 0x173   : > { %v1135_v43 = vpop.f32.mrf.mxu3  ;;  %v1047_v58 = vadd.f32 %v1046_v39, %v958_v53  ;;  %v959_v62 = vpop.f32.mrf.mxu1  ;;  %v871_v3 = vadd.f32 %v5343_v41, %v870_v59  ;;  %v5596_v41 = vld [vmem:[%s6357_s2] ss:$0 sm:$0xff]  ;;  %v1383_v39 = vpack.c.bf16 %v1244_v28, %v1243_v56 }
 0x175   : > { %v5586_v63 = vadd.f32 %v1135_v43, %v1047_v58  ;;  %v960_v7 = vadd.f32 %v959_v62, %v871_v3  ;;  %v1307_v43 = vld [vmem:[#allocation2 + $0x99] sm:$0xff] }
 0x176   : > { %v1339_v58 = vld [vmem:[#allocation2 + $0x9a] sm:$0xff]  ;;  %v1385_v62 = vpack.c.bf16 %v1308_v47, %v1307_v43  ;;  %v1248_v43 = vld [vmem:[#allocation2 + $0xcf] sm:$0xff] }
 0x177   : > { %1223 = vst [vmem:[#allocation2 + $0x128] sm:$0xff] %v5586_v63  ;;  %v1386_v3 = vpack.c.bf16 %v1340_v49, %v1339_v58 }
 0x17a   : > { %v1048_v11 = vpop.f32.mrf.mxu2  ;;  %v873_v20 = vpop.f32.mrf.mxu0 }
 0x17b   : > { %v1137_v12 = vpop.f32.mrf.mxu3  ;;  %v1049_v17 = vadd.f32 %v1048_v11, %v960_v7  ;;  %v962_v24 = vpop.f32.mrf.mxu1  ;;  %v874_v26 = vadd.f32 %v5596_v41, %v873_v20 }
 0x17d   : > { %v5599_v44 = vadd.f32 %v1137_v12, %v1049_v17  ;;  %1718 = vmatmul.bf16.gmra.mxu0 %v1379_v27  ;;  %v963_v29 = vadd.f32 %v962_v24, %v874_v26  ;;  %v4867_v17 = vld [vmem:[%s6356_s1 + $0x258] sm:$0xff]  ;;  %v1246_v24 = vld [vmem:[#allocation2 + $0xaf] sm:$0xff] }
 0x17e   : > { %5041 = vmatmul.msk.bf16.gmra.mxu1 %vm5514_vm2, %v5040_v23  ;;  %v1342_v23 = vld [vmem:[#allocation2 + $0xb2] sm:$0xff]  ;;  %v1255_v48 = vld [vmem:[#allocation2 + $0x127] sm:$0xff] }
 0x17f   : > { %1224 = vst [vmem:[#allocation2 + $0x130] sm:$0xff] %v5599_v44  ;;  %1896 = vmatmul.bf16.gmra.mxu2 %v1381_v0  ;;  %v1408_v32 = vpack.c.bf16 %v5599_v44, %v5586_v63  ;;  %2664 = vmatpush.bf16.msra.mxu1 %v4867_v17  ;;  %v1310_v0 = vld [vmem:[#allocation2 + $0xb1] sm:$0xff]  ;;  %v4880_v63 = vld [vmem:[%s6356_s1 + $0x2c0] sm:$0xff] }
 0x180   : > { %1985 = vmatmul.bf16.gmra.mxu3 %v1382_v21  ;;  %v1341_v21 = vld [vmem:[#allocation2 + $0xaa] sm:$0xff] }
 0x181   : > { %v1390_v28 = vpack.c.bf16 %v1342_v23, %v1341_v21  ;;  %2845 = vmatpush.bf16.msra.mxu3 %v4880_v63 }
 0x182   : > { %v1051_v34 = vpop.f32.mrf.mxu2  ;;  %v875_v38 = vpop.f32.mrf.mxu0 }
 0x183   : > { %v1140_v35 = vpop.f32.mrf.mxu3  ;;  %v1052_v37 = vadd.f32 %v1051_v34, %v963_v29  ;;  %v964_v40 = vpop.f32.mrf.mxu1  ;;  %v876_v50 = vadd.f32 %v5596_v41, %v875_v38 }
 0x185   : > { %v5608_v6 = vadd.f32 %v1140_v35, %v1052_v37  ;;  %v965_v9 = vadd.f32 %v964_v40, %v876_v50  ;;  %v1245_v37 = vld [vmem:[#allocation2 + $0xa7] sm:$0xff] }
 0x186   : > { %v1387_v40 = vpack.c.bf16 %v1246_v24, %v1245_v37  ;;  %v4858_v24 = vld [vmem:[%s6356_s1 + $0x210] sm:$0xff]  ;;  %v1313_v37 = vld [vmem:[#allocation2 + $0xd9] sm:$0xff] }
 0x187   : > { %1225 = vst [vmem:[#allocation2 + $0x138] sm:$0xff] %v5608_v6  ;;  %2576 = vmatpush.bf16.msra.mxu0 %v4858_v24 }
 0x18a   : > { %v1053_v30 = vpop.f32.mrf.mxu2  ;;  %v878_v53 = vpop.f32.mrf.mxu0 }
 0x18b   : > { %v1142_v45 = vpop.f32.mrf.mxu3  ;;  %v1054_v51 = vadd.f32 %v1053_v30, %v965_v9  ;;  %v967_v55 = vpop.f32.mrf.mxu1  ;;  %v879_v14 = vadd.f32 %v5596_v41, %v878_v53  ;;  %v1389_v9 = vpack.c.bf16 %v1310_v0, %v1309_v25  ;;  %v5043_v30 = vpack.c.bf16 %v5484_v18, %v5479_v61 }
 0x18d   : > { %v5613_v59 = vadd.f32 %v1142_v45, %v1054_v51  ;;  %1723 = vmatmul.bf16.gmra.mxu0 %v1383_v39  ;;  %v968_v7 = vadd.f32 %v967_v55, %v879_v14  ;;  %v5654_v39 = vld [vmem:[%s6357_s2 + $0x1] ss:$0 sm:$0xff] }
 0x18e   : > { %1812 = vmatmul.bf16.gmra.mxu1 %v1384_v54 }
 0x18f   : > { %v1194_v4 = vsel %vm1158_vm0, %v5613_v59, 0.0  ;;  %1901 = vmatmul.bf16.gmra.mxu2 %v1385_v62 }
 0x190   : > { %1990 = vmatmul.bf16.gmra.mxu3 %v1386_v3  ;;  %1226 = vst [vmem:[#allocation2 + $0x140] sm:$0xff] %v1194_v4  ;;  %v1312_v3 = vld [vmem:[#allocation2 + $0xd1] sm:$0xff] }
 0x191   : > { %v1344_v4 = vld [vmem:[#allocation2 + $0xd2] sm:$0xff] }
 0x192   : > { %v1056_v52 = vpop.f32.mrf.mxu2  ;;  %v880_v12 = vpop.f32.mrf.mxu0 }
 0x193   : > { %v1145_v54 = vpop.f32.mrf.mxu3  ;;  %v1057_v11 = vadd.f32 %v1056_v52, %v968_v7  ;;  %v969_v57 = vpop.f32.mrf.mxu1  ;;  %v881_v16 = vadd.f32 %v5596_v41, %v880_v12  ;;  %v1391_v52 = vpack.c.bf16 %v1248_v43, %v1247_v22 }
 0x195   : > { %v5630_v15 = vadd.f32 %v1145_v54, %v1057_v11  ;;  %v970_v20 = vadd.f32 %v969_v57, %v881_v16  ;;  %v1311_v54 = vld [vmem:[#allocation2 + $0xc9] sm:$0xff] }
 0x196   : > { %v1393_v57 = vpack.c.bf16 %v1312_v3, %v1311_v54  ;;  %v1252_v54 = vld [vmem:[#allocation2 + $0xff] sm:$0xff] }
 0x197   : > { %1227 = vst [vmem:[#allocation2 + $0x158] sm:$0xff] %v5630_v15 }
 0x19a   : > { %v1058_v26 = vpop.f32.mrf.mxu2  ;;  %v883_v34 = vpop.f32.mrf.mxu0 }
 0x19b   : > { %v1147_v27 = vpop.f32.mrf.mxu3  ;;  %v1059_v29 = vadd.f32 %v1058_v26, %v970_v20  ;;  %v972_v35 = vpop.f32.mrf.mxu1  ;;  %v884_v38 = vadd.f32 %v5596_v41, %v883_v34  ;;  %v4874_v20 = vld [vmem:[%s6356_s1 + $0x290] sm:$0xff] }
 0x19c   : > { %2754 = vmatpush.bf16.msra.mxu2 %v4874_v20 }
 0x19d   : > { %v5638_v50 = vadd.f32 %v1147_v27, %v1059_v29  ;;  %1728 = vmatmul.bf16.gmra.mxu0 %v1387_v40  ;;  %v973_v45 = vadd.f32 %v972_v35, %v884_v38  ;;  %v4866_v29 = vld [vmem:[%s6356_s1 + $0x250] sm:$0xff]  ;;  %v1250_v35 = vld [vmem:[#allocation2 + $0xdf] sm:$0xff] }
 0x19e   : > { %5044 = vmatmul.msk.bf16.gmra.mxu1 %vm5514_vm2, %v5043_v30  ;;  %v1346_v30 = vld [vmem:[#allocation2 + $0xe2] sm:$0xff]  ;;  %v1259_v63 = vld [vmem:[#allocation2 + $0x157] sm:$0xff] }
 0x19f   : > { %1228 = vst [vmem:[#allocation2 + $0x160] sm:$0xff] %v5638_v50  ;;  %1906 = vmatmul.bf16.gmra.mxu2 %v1389_v9  ;;  %v1416_v47 = vpack.c.bf16 %v5638_v50, %v5630_v15  ;;  %2665 = vmatpush.bf16.msra.mxu1 %v4866_v29  ;;  %v1314_v9 = vld [vmem:[#allocation2 + $0xe1] sm:$0xff]  ;;  %v4919_v15 = vld [vmem:[%s6356_s1 + $0x3f8] sm:$0xff] }
 0x1a0   : > { %1995 = vmatmul.bf16.gmra.mxu3 %v1390_v28  ;;  %v1345_v28 = vld [vmem:[#allocation2 + $0xda] sm:$0xff] }
 0x1a1   : > { %v1398_v43 = vpack.c.bf16 %v1346_v30, %v1345_v28  ;;  %3724 = vmatpush.bf16.msrb.mxu3 %v4919_v15 }
 0x1a2   : > { %v1061_v49 = vpop.f32.mrf.mxu2  ;;  %v885_v55 = vpop.f32.mrf.mxu0 }
 0x1a3   : > { %v1150_v51 = vpop.f32.mrf.mxu3  ;;  %v1062_v53 = vadd.f32 %v1061_v49, %v973_v45  ;;  %v974_v56 = vpop.f32.mrf.mxu1  ;;  %v886_v61 = vadd.f32 %v5596_v41, %v885_v55  ;;  %v1343_v41 = vld [vmem:[#allocation2 + $0xca] sm:$0xff] }
 0x1a4   : > { %v1394_v16 = vpack.c.bf16 %v1344_v4, %v1343_v41 }
 0x1a5   : > { %v5647_v14 = vadd.f32 %v1150_v51, %v1062_v53  ;;  %v975_v18 = vadd.f32 %v974_v56, %v886_v61  ;;  %v1249_v53 = vld [vmem:[#allocation2 + $0xd7] sm:$0xff] }
 0x1a6   : > { %v1395_v55 = vpack.c.bf16 %v1250_v35, %v1249_v53  ;;  %v4857_v35 = vld [vmem:[%s6356_s1 + $0x208] sm:$0xff] }
 0x1a7   : > { %1229 = vst [vmem:[#allocation2 + $0x168] sm:$0xff] %v5647_v14  ;;  %2577 = vmatpush.bf16.msra.mxu0 %v4857_v35  ;;  %v1317_v53 = vld [vmem:[#allocation2 + $0x109] sm:$0xff] }
 0x1aa   : > { %v1063_v58 = vpop.f32.mrf.mxu2  ;;  %v1694_v8 = vpop.f32.mrf.mxu0 }
 0x1ab   : > { %v1152_v62 = vpop.f32.mrf.mxu3  ;;  %v1064_v7 = vadd.f32 %v1063_v58, %v975_v18  ;;  %v1783_v10 = vpop.f32.mrf.mxu1  ;;  %v1695_v12 = vadd.f32 %v5654_v39, %v1694_v8  ;;  %v1397_v18 = vpack.c.bf16 %v1314_v9, %v1313_v37  ;;  %v5046_v58 = vpack.c.bf16 %v5530_v31, %v5525_v13 }
 0x1ad   : > { %v5656_v11 = vadd.f32 %v1152_v62, %v1064_v7  ;;  %1733 = vmatmul.bf16.gmra.mxu0 %v1391_v52  ;;  %v1784_v60 = vadd.f32 %v1783_v10, %v1695_v12 }
 0x1ae   : > { %1822 = vmatmul.bf16.gmra.mxu1 %v1392_v5 }
 0x1af   : > { %v1198_v17 = vsel %vm1158_vm0, %v5656_v11, 0.0  ;;  %1911 = vmatmul.bf16.gmra.mxu2 %v1393_v57  ;;  %v1316_v57 = vld [vmem:[#allocation2 + $0x101] sm:$0xff] }
 0x1b0   : > { %2000 = vmatmul.bf16.gmra.mxu3 %v1394_v16  ;;  %1230 = vst [vmem:[#allocation2 + $0x170] sm:$0xff] %v1198_v17  ;;  %v1348_v16 = vld [vmem:[#allocation2 + $0x102] sm:$0xff] }
 0x1b2   : > { %v1872_v5 = vpop.f32.mrf.mxu2  ;;  %v1696_v27 = vpop.f32.mrf.mxu0 }
 0x1b3   : > { %v1961_v25 = vpop.f32.mrf.mxu3  ;;  %v1873_v26 = vadd.f32 %v1872_v5, %v1784_v60  ;;  %v1785_v0 = vpop.f32.mrf.mxu1  ;;  %v1697_v23 = vadd.f32 %v5654_v39, %v1696_v27  ;;  %v1399_v60 = vpack.c.bf16 %v1252_v54, %v1251_v33  ;;  %v1315_v5 = vld [vmem:[#allocation2 + $0xf9] sm:$0xff] }
 0x1b5   : > { %v5674_v21 = vadd.f32 %v1961_v25, %v1873_v26  ;;  %v1786_v34 = vadd.f32 %v1785_v0, %v1697_v23  ;;  %v1347_v25 = vld [vmem:[#allocation2 + $0xfa] sm:$0xff]  ;;  %v1401_v0 = vpack.c.bf16 %v1316_v57, %v1315_v5  ;;  %v1256_v5 = vld [vmem:[#allocation2 + $0x12f] sm:$0xff] }
 0x1b6   : > { %v1402_v23 = vpack.c.bf16 %v1348_v16, %v1347_v25 }
 0x1b7   : > { %2085 = vst [vmem:[#allocation2 + $0x8] sm:$0xff] %v5674_v21 }
 0x1ba   : > { %v1874_v38 = vpop.f32.mrf.mxu2  ;;  %v1699_v49 = vpop.f32.mrf.mxu0 }
 0x1bb   : > { %v1963_v40 = vpop.f32.mrf.mxu3  ;;  %v1875_v45 = vadd.f32 %v1874_v38, %v1786_v34  ;;  %v1788_v51 = vpop.f32.mrf.mxu1  ;;  %v1700_v61 = vadd.f32 %v5654_v39, %v1699_v49  ;;  %v4873_v34 = vld [vmem:[%s6356_s1 + $0x288] sm:$0xff] }
 0x1bc   : > { %2755 = vmatpush.bf16.msra.mxu2 %v4873_v34 }
 0x1bd   : > { %v5681_v56 = vadd.f32 %v1963_v40, %v1875_v45  ;;  %1738 = vmatmul.bf16.gmra.mxu0 %v1395_v55  ;;  %v1789_v3 = vadd.f32 %v1788_v51, %v1700_v61  ;;  %v4865_v45 = vld [vmem:[%s6356_s1 + $0x248] sm:$0xff] }
 0x1be   : > { %5047 = vmatmul.msk.bf16.gmra.mxu1 %vm5514_vm2, %v5046_v58  ;;  %v1254_v51 = vld [vmem:[#allocation2 + $0x10f] sm:$0xff] }
 0x1bf   : > { %2086 = vst [vmem:[#allocation2 + $0x10] sm:$0xff] %v5681_v56  ;;  %1916 = vmatmul.bf16.gmra.mxu2 %v1397_v18  ;;  %v2246_v62 = vpack.c.bf16 %v5681_v56, %v5674_v21  ;;  %2666 = vmatpush.bf16.msra.mxu1 %v4865_v45  ;;  %v1318_v18 = vld [vmem:[#allocation2 + $0x111] sm:$0xff] }
 0x1c0   : > { %2005 = vmatmul.bf16.gmra.mxu3 %v1398_v43  ;;  %v1349_v43 = vld [vmem:[#allocation2 + $0x10a] sm:$0xff]  ;;  %v1350_v58 = vld [vmem:[#allocation2 + $0x112] sm:$0xff] }
 0x1c1   : > { %v1406_v54 = vpack.c.bf16 %v1350_v58, %v1349_v43  ;;  %v4918_v21 = vld [vmem:[%s6356_s1 + $0x3f0] sm:$0xff] }
 0x1c2   : > { %v1877_v4 = vpop.f32.mrf.mxu2  ;;  %v1701_v10 = vpop.f32.mrf.mxu0  ;;  %3725 = vmatpush.bf16.msrb.mxu3 %v4918_v21 }
 0x1c3   : > { %v1966_v7 = vpop.f32.mrf.mxu3  ;;  %v1878_v8 = vadd.f32 %v1877_v4, %v1789_v3  ;;  %v1790_v22 = vpop.f32.mrf.mxu1  ;;  %v1702_v13 = vadd.f32 %v5654_v39, %v1701_v10 }
 0x1c5   : > { %v5691_v52 = vadd.f32 %v1966_v7, %v1878_v8  ;;  %v1791_v31 = vadd.f32 %v1790_v22, %v1702_v13  ;;  %v1253_v8 = vld [vmem:[#allocation2 + $0x107] sm:$0xff] }
 0x1c6   : > { %v1403_v10 = vpack.c.bf16 %v1254_v51, %v1253_v8  ;;  %v4856_v51 = vld [vmem:[%s6356_s1 + $0x200] sm:$0xff] }
 0x1c7   : > { %2087 = vst [vmem:[#allocation2 + $0x18] sm:$0xff] %v5691_v52  ;;  %2578 = vmatpush.bf16.msra.mxu0 %v4856_v51  ;;  %v1321_v8 = vld [vmem:[#allocation2 + $0x139] sm:$0xff] }
 0x1ca   : > { %v1879_v41 = vpop.f32.mrf.mxu2  ;;  %v1704_v20 = vpop.f32.mrf.mxu0 }
 0x1cb   : > { %v1968_v12 = vpop.f32.mrf.mxu3  ;;  %v1880_v17 = vadd.f32 %v1879_v41, %v1791_v31  ;;  %v1793_v24 = vpop.f32.mrf.mxu1  ;;  %v1705_v27 = vadd.f32 %v5654_v39, %v1704_v20  ;;  %v1405_v31 = vpack.c.bf16 %v1318_v18, %v1317_v53  ;;  %v5049_v41 = vpack.c.bf16 %v5569_v46, %v5564_v1 }
 0x1cd   : > { %v5696_v26 = vadd.f32 %v1968_v12, %v1880_v17  ;;  %1743 = vmatmul.bf16.gmra.mxu0 %v1399_v60  ;;  %v1794_v36 = vadd.f32 %v1793_v24, %v1705_v27 }
 0x1ce   : > { %1832 = vmatmul.bf16.gmra.mxu1 %v1400_v19 }
 0x1cf   : > { %v2056_v29 = vsel %vm2044_vm3, %v5696_v26, 0.0  ;;  %1921 = vmatmul.bf16.gmra.mxu2 %v1401_v0  ;;  %v1320_v0 = vld [vmem:[#allocation2 + $0x131] sm:$0xff] }
 0x1d0   : > { %2010 = vmatmul.bf16.gmra.mxu3 %v1402_v23  ;;  %2088 = vst [vmem:[#allocation2 + $0x20] sm:$0xff] %v2056_v29  ;;  %v1352_v23 = vld [vmem:[#allocation2 + $0x132] sm:$0xff] }
 0x1d2   : > { %v1882_v19 = vpop.f32.mrf.mxu2  ;;  %v1706_v40 = vpop.f32.mrf.mxu0 }
 0x1d3   : > { %v1971_v37 = vpop.f32.mrf.mxu3  ;;  %v1883_v38 = vadd.f32 %v1882_v19, %v1794_v36  ;;  %v1795_v9 = vpop.f32.mrf.mxu1  ;;  %v1707_v30 = vadd.f32 %v5654_v39, %v1706_v40  ;;  %v1407_v36 = vpack.c.bf16 %v1256_v5, %v1255_v48  ;;  %v1319_v19 = vld [vmem:[#allocation2 + $0x129] sm:$0xff] }
 0x1d5   : > { %v5714_v28 = vadd.f32 %v1971_v37, %v1883_v38  ;;  %v1796_v49 = vadd.f32 %v1795_v9, %v1707_v30  ;;  %v1351_v37 = vld [vmem:[#allocation2 + $0x12a] sm:$0xff]  ;;  %v1409_v9 = vpack.c.bf16 %v1320_v0, %v1319_v19  ;;  %v1260_v19 = vld [vmem:[#allocation2 + $0x15f] sm:$0xff] }
 0x1d6   : > { %v1410_v30 = vpack.c.bf16 %v1352_v23, %v1351_v37 }
 0x1d7   : > { %2089 = vst [vmem:[#allocation2 + $0x38] sm:$0xff] %v5714_v28 }
 0x1da   : > { %v1884_v55 = vpop.f32.mrf.mxu2  ;;  %v1709_v4 = vpop.f32.mrf.mxu0 }
 0x1db   : > { %v1973_v61 = vpop.f32.mrf.mxu3  ;;  %v1885_v3 = vadd.f32 %v1884_v55, %v1796_v49  ;;  %v1798_v7 = vpop.f32.mrf.mxu1  ;;  %v1710_v13 = vadd.f32 %v5654_v39, %v1709_v4  ;;  %v4872_v49 = vld [vmem:[%s6356_s1 + $0x280] sm:$0xff] }
 0x1dc   : > { %2756 = vmatpush.bf16.msra.mxu2 %v4872_v49 }
 0x1dd   : > { %v5721_v22 = vadd.f32 %v1973_v61, %v1885_v3  ;;  %1748 = vmatmul.bf16.gmra.mxu0 %v1403_v10  ;;  %v1799_v57 = vadd.f32 %v1798_v7, %v1710_v13  ;;  %v4864_v3 = vld [vmem:[%s6356_s1 + $0x240] sm:$0xff] }
 0x1de   : > { %5050 = vmatmul.msk.bf16.gmra.mxu1 %vm5514_vm2, %v5049_v41  ;;  %v1258_v7 = vld [vmem:[#allocation2 + $0x13f] sm:$0xff]  ;;  %v2121_v21 = vld [vmem:[#allocation2 + $0x37] sm:$0xff] }
 0x1df   : > { %2090 = vst [vmem:[#allocation2 + $0x40] sm:$0xff] %v5721_v22  ;;  %1926 = vmatmul.bf16.gmra.mxu2 %v1405_v31  ;;  %v2254_v12 = vpack.c.bf16 %v5721_v22, %v5714_v28  ;;  %2667 = vmatpush.bf16.msra.mxu1 %v4864_v3  ;;  %v1322_v31 = vld [vmem:[#allocation2 + $0x141] sm:$0xff] }
 0x1e0   : > { %2015 = vmatmul.bf16.gmra.mxu3 %v1406_v54  ;;  %v1353_v54 = vld [vmem:[#allocation2 + $0x13a] sm:$0xff]  ;;  %v1354_v41 = vld [vmem:[#allocation2 + $0x142] sm:$0xff] }
 0x1e1   : > { %v1414_v5 = vpack.c.bf16 %v1354_v41, %v1353_v54  ;;  %v4917_v28 = vld [vmem:[%s6356_s1 + $0x3e8] sm:$0xff] }
 0x1e2   : > { %v1887_v16 = vpop.f32.mrf.mxu2  ;;  %v1711_v24 = vpop.f32.mrf.mxu0  ;;  %3726 = vmatpush.bf16.msrb.mxu3 %v4917_v28 }
 0x1e3   : > { %v1976_v17 = vpop.f32.mrf.mxu3  ;;  %v1888_v20 = vadd.f32 %v1887_v16, %v1799_v57  ;;  %v1800_v33 = vpop.f32.mrf.mxu1  ;;  %v1712_v1 = vadd.f32 %v5654_v39, %v1711_v24 }
 0x1e5   : > { %v5731_v60 = vadd.f32 %v1976_v17, %v1888_v20  ;;  %v1801_v46 = vadd.f32 %v1800_v33, %v1712_v1  ;;  %v1257_v20 = vld [vmem:[#allocation2 + $0x137] sm:$0xff] }
 0x1e6   : > { %v1411_v24 = vpack.c.bf16 %v1258_v7, %v1257_v20  ;;  %v4895_v7 = vld [vmem:[%s6356_s1 + $0x338] sm:$0xff]  ;;  %v1325_v20 = vld [vmem:[#allocation2 + $0x169] sm:$0xff] }
 0x1e7   : > { %2091 = vst [vmem:[#allocation2 + $0x48] sm:$0xff] %v5731_v60  ;;  %3457 = vmatpush.bf16.msrb.mxu0 %v4895_v7  ;;  %v2117_v7 = vld [vmem:[#allocation2 + $0x7] sm:$0xff] }
 0x1ea   : > { %v1889_v25 = vpop.f32.mrf.mxu2  ;;  %v1714_v34 = vpop.f32.mrf.mxu0 }
 0x1eb   : > { %v1978_v27 = vpop.f32.mrf.mxu3  ;;  %v1890_v29 = vadd.f32 %v1889_v25, %v1801_v46  ;;  %v1803_v35 = vpop.f32.mrf.mxu1  ;;  %v1715_v40 = vadd.f32 %v5654_v39, %v1714_v34  ;;  %v1413_v46 = vpack.c.bf16 %v1322_v31, %v1321_v8  ;;  %v5052_v25 = vpack.c.bf16 %v5613_v59, %v5608_v6 }
 0x1ed   : > { %v5735_v38 = vadd.f32 %v1978_v27, %v1890_v29  ;;  %1753 = vmatmul.bf16.gmra.mxu0 %v1407_v36  ;;  %v1804_v44 = vadd.f32 %v1803_v35, %v1715_v40 }
 0x1ee   : > { %1842 = vmatmul.bf16.gmra.mxu1 %v1408_v32 }
 0x1ef   : > { %v2060_v45 = vsel %vm2044_vm3, %v5735_v38, 0.0  ;;  %1931 = vmatmul.bf16.gmra.mxu2 %v1409_v9  ;;  %v1324_v9 = vld [vmem:[#allocation2 + $0x161] sm:$0xff] }
 0x1f0   : > { %2020 = vmatmul.bf16.gmra.mxu3 %v1410_v30  ;;  %2092 = vst [vmem:[#allocation2 + $0x50] sm:$0xff] %v2060_v45  ;;  %v1356_v30 = vld [vmem:[#allocation2 + $0x162] sm:$0xff] }
 0x1f2   : > { %v1892_v32 = vpop.f32.mrf.mxu2  ;;  %v1716_v61 = vpop.f32.mrf.mxu0 }
 0x1f3   : > { %v1981_v53 = vpop.f32.mrf.mxu3  ;;  %v1893_v55 = vadd.f32 %v1892_v32, %v1804_v44  ;;  %v1805_v18 = vpop.f32.mrf.mxu1  ;;  %v1717_v58 = vadd.f32 %v5654_v39, %v1716_v61  ;;  %v1415_v44 = vpack.c.bf16 %v1260_v19, %v1259_v63  ;;  %v1323_v32 = vld [vmem:[#allocation2 + $0x159] sm:$0xff] }
 0x1f5   : > { %v5753_v43 = vadd.f32 %v1981_v53, %v1893_v55  ;;  %v1806_v4 = vadd.f32 %v1805_v18, %v1717_v58  ;;  %v1355_v53 = vld [vmem:[#allocation2 + $0x15a] sm:$0xff]  ;;  %v1417_v18 = vpack.c.bf16 %v1324_v9, %v1323_v32 }
 0x1f6   : > { %v1418_v58 = vpack.c.bf16 %v1356_v30, %v1355_v53 }
 0x1f7   : > { %2093 = vst [vmem:[#allocation2 + $0x68] sm:$0xff] %v5753_v43 }
 0x1fa   : > { %v1894_v10 = vpop.f32.mrf.mxu2  ;;  %v1719_v16 = vpop.f32.mrf.mxu0 }
 0x1fb   : > { %v1983_v13 = vpop.f32.mrf.mxu3  ;;  %v1895_v57 = vadd.f32 %v1894_v10, %v1806_v4  ;;  %v1808_v17 = vpop.f32.mrf.mxu1  ;;  %v1720_v1 = vadd.f32 %v5654_v39, %v1719_v16  ;;  %v4911_v4 = vld [vmem:[%s6356_s1 + $0x3b8] sm:$0xff] }
 0x1fc   : > { %3635 = vmatpush.bf16.msrb.mxu2 %v4911_v4 }
 0x1fd   : > { %v5760_v33 = vadd.f32 %v1983_v13, %v1895_v57  ;;  %1758 = vmatmul.bf16.gmra.mxu0 %v1411_v24  ;;  %v1809_v0 = vadd.f32 %v1808_v17, %v1720_v1  ;;  %v4903_v57 = vld [vmem:[%s6356_s1 + $0x378] sm:$0xff]  ;;  %v1262_v17 = vld [vmem:[#allocation2 + $0x16f] sm:$0xff] }
 0x1fe   : > { %5053 = vmatmul.msk.bf16.gmra.mxu1 %vm5514_vm2, %v5052_v25  ;;  %v1358_v25 = vld [vmem:[#allocation2 + $0x172] sm:$0xff]  ;;  %v2125_v28 = vld [vmem:[#allocation2 + $0x67] sm:$0xff] }
 0x1ff   : > { %2094 = vst [vmem:[#allocation2 + $0x70] sm:$0xff] %v5760_v33  ;;  %1936 = vmatmul.bf16.gmra.mxu2 %v1413_v46  ;;  %v2262_v27 = vpack.c.bf16 %v5760_v33, %v5753_v43  ;;  %3546 = vmatpush.bf16.msrb.mxu1 %v4903_v57  ;;  %v1326_v46 = vld [vmem:[#allocation2 + $0x171] sm:$0xff]  ;;  %v4916_v43 = vld [vmem:[%s6356_s1 + $0x3e0] sm:$0xff] }
 0x200   : > { %2025 = vmatmul.bf16.gmra.mxu3 %v1414_v5  ;;  %v1357_v5 = vld [vmem:[#allocation2 + $0x16a] sm:$0xff] }
 0x201   : > { %v1422_v19 = vpack.c.bf16 %v1358_v25, %v1357_v5  ;;  %v4910_v57 = vld [vmem:[%s6356_s1 + $0x3b0] sm:$0xff]  ;;  %3727 = vmatpush.bf16.msrb.mxu3 %v4916_v43 }
 0x202   : > { %v1897_v23 = vpop.f32.mrf.mxu2  ;;  %v1721_v35 = vpop.f32.mrf.mxu0  ;;  %3636 = vmatpush.bf16.msrb.mxu2 %v4910_v57  ;;  %v4902_v25 = vld [vmem:[%s6356_s1 + $0x370] sm:$0xff] }
 0x203   : > { %v1986_v29 = vpop.f32.mrf.mxu3  ;;  %v1898_v34 = vadd.f32 %v1897_v23, %v1809_v0  ;;  %v1810_v48 = vpop.f32.mrf.mxu1  ;;  %v1722_v6 = vadd.f32 %v5654_v39, %v1721_v35  ;;  %3547 = vmatpush.bf16.msrb.mxu1 %v4902_v25 }
 0x205   : > { %v5770_v36 = vadd.f32 %v1986_v29, %v1898_v34  ;;  %v1811_v59 = vadd.f32 %v1810_v48, %v1722_v6  ;;  %v1261_v34 = vld [vmem:[#allocation2 + $0x167] sm:$0xff] }
 0x206   : > { %v1419_v35 = vpack.c.bf16 %v1262_v17, %v1261_v34 }
 0x207   : > { %2095 = vst [vmem:[#allocation2 + $0x78] sm:$0xff] %v5770_v36 }
 0x20a   : > { %v1899_v37 = vpop.f32.mrf.mxu2  ;;  %v1724_v49 = vpop.f32.mrf.mxu0 }
 0x20b   : > { %v1988_v40 = vpop.f32.mrf.mxu3  ;;  %v1900_v45 = vadd.f32 %v1899_v37, %v1811_v59  ;;  %v1813_v51 = vpop.f32.mrf.mxu1  ;;  %v1725_v61 = vadd.f32 %v5654_v39, %v1724_v49  ;;  %v1421_v59 = vpack.c.bf16 %v1326_v46, %v1325_v20  ;;  %v5055_v37 = vpack.c.bf16 %v5656_v11, %v5647_v14  ;;  %v2118_v11 = vld [vmem:[#allocation2 + $0xf] sm:$0xff] }
 0x20c   : > { %v2245_v15 = vpack.c.bf16 %v2118_v11, %v2117_v7 }
 0x20d   : > { %v5774_v55 = vadd.f32 %v1988_v40, %v1900_v45  ;;  %1763 = vmatmul.bf16.gmra.mxu0 %v1415_v44  ;;  %v1814_v50 = vadd.f32 %v1813_v51, %v1725_v61  ;;  %v2182_v61 = vld [vmem:[#allocation2 + $0x11] sm:$0xff] }
 0x20e   : > { %1852 = vmatmul.bf16.gmra.mxu1 %v1416_v47 }
 0x20f   : > { %v2064_v3 = vsel %vm2044_vm3, %v5774_v55, 0.0  ;;  %1941 = vmatmul.bf16.gmra.mxu2 %v1417_v18  ;;  %v2214_v18 = vld [vmem:[#allocation2 + $0x12] sm:$0xff] }
 0x210   : > { %2030 = vmatmul.bf16.gmra.mxu3 %v1418_v58  ;;  %2096 = vst [vmem:[#allocation2 + $0x80] sm:$0xff] %v2064_v3 }
 0x212   : > { %v1902_v47 = vpop.f32.mrf.mxu2  ;;  %v1726_v13 = vpop.f32.mrf.mxu0 }
 0x213   : > { %v1991_v8 = vpop.f32.mrf.mxu3  ;;  %v1903_v10 = vadd.f32 %v1902_v47, %v1814_v50  ;;  %v1815_v31 = vpop.f32.mrf.mxu1  ;;  %v1727_v41 = vadd.f32 %v5654_v39, %v1726_v13  ;;  %v2181_v50 = vld [vmem:[#allocation2 + $0x9] sm:$0xff] }
 0x214   : > { %v2213_v47 = vld [vmem:[#allocation2 + $0xa] sm:$0xff]  ;;  %v2247_v13 = vpack.c.bf16 %v2182_v61, %v2181_v50  ;;  %v2122_v50 = vld [vmem:[#allocation2 + $0x3f] sm:$0xff] }
 0x215   : > { %v5792_v54 = vadd.f32 %v1991_v8, %v1903_v10  ;;  %v1816_v16 = vadd.f32 %v1815_v31, %v1727_v41  ;;  %v2248_v31 = vpack.c.bf16 %v2214_v18, %v2213_v47 }
 0x217   : > { %2097 = vst [vmem:[#allocation2 + $0x98] sm:$0xff] %v5792_v54 }
 0x21a   : > { %v1904_v24 = vpop.f32.mrf.mxu2  ;;  %v1729_v23 = vpop.f32.mrf.mxu0 }
 0x21b   : > { %v1993_v1 = vpop.f32.mrf.mxu3  ;;  %v1905_v0 = vadd.f32 %v1904_v24, %v1816_v16  ;;  %v1818_v29 = vpop.f32.mrf.mxu1  ;;  %v1730_v6 = vadd.f32 %v5654_v39, %v1729_v23  ;;  %v4894_v16 = vld [vmem:[%s6356_s1 + $0x330] sm:$0xff]  ;;  %v2120_v23 = vld [vmem:[#allocation2 + $0x1f] sm:$0xff] }
 0x21c   : > { %3458 = vmatpush.bf16.msrb.mxu0 %v4894_v16 }
 0x21d   : > { %v5799_v48 = vadd.f32 %v1993_v1, %v1905_v0  ;;  %1768 = vmatmul.bf16.gmra.mxu0 %v1419_v35  ;;  %v1819_v9 = vadd.f32 %v1818_v29, %v1730_v6  ;;  %v2183_v29 = vld [vmem:[#allocation2 + $0x19] sm:$0xff]  ;;  %v2184_v6 = vld [vmem:[#allocation2 + $0x21] sm:$0xff] }
 0x21e   : > { %5056 = vmatmul.msk.bf16.gmra.mxu1 %vm5514_vm2, %v5055_v37  ;;  %v2129_v43 = vld [vmem:[#allocation2 + $0x97] sm:$0xff] }
 0x21f   : > { %2098 = vst [vmem:[#allocation2 + $0xa0] sm:$0xff] %v5799_v48  ;;  %1946 = vmatmul.bf16.gmra.mxu2 %v1421_v59  ;;  %v2270_v40 = vpack.c.bf16 %v5799_v48, %v5792_v54  ;;  %v2215_v59 = vld [vmem:[#allocation2 + $0x1a] sm:$0xff] }
 0x220   : > { %2035 = vmatmul.bf16.gmra.mxu3 %v1422_v19  ;;  %v2216_v19 = vld [vmem:[#allocation2 + $0x22] sm:$0xff]  ;;  %v4915_v54 = vld [vmem:[%s6356_s1 + $0x3d8] sm:$0xff] }
 0x221   : > { %3728 = vmatpush.bf16.msrb.mxu3 %v4915_v54 }
 0x222   : > { %v1907_v30 = vpop.f32.mrf.mxu2  ;;  %v1731_v51 = vpop.f32.mrf.mxu0 }
 0x223   : > { %v1996_v45 = vpop.f32.mrf.mxu3  ;;  %v1908_v49 = vadd.f32 %v1907_v30, %v1819_v9  ;;  %v1820_v63 = vpop.f32.mrf.mxu1  ;;  %v1732_v14 = vadd.f32 %v5654_v39, %v1731_v51 }
 0x225   : > { %v5809_v44 = vadd.f32 %v1996_v45, %v1908_v49  ;;  %v1821_v2 = vadd.f32 %v1820_v63, %v1732_v14  ;;  %v2119_v45 = vld [vmem:[#allocation2 + $0x17] sm:$0xff]  ;;  %v2251_v14 = vpack.c.bf16 %v2184_v6, %v2183_v29 }
 0x226   : > { %v2249_v49 = vpack.c.bf16 %v2120_v23, %v2119_v45  ;;  %v4893_v23 = vld [vmem:[%s6356_s1 + $0x328] sm:$0xff] }
 0x227   : > { %2099 = vst [vmem:[#allocation2 + $0xa8] sm:$0xff] %v5809_v44  ;;  %3459 = vmatpush.bf16.msrb.mxu0 %v4893_v23  ;;  %v2187_v45 = vld [vmem:[#allocation2 + $0x49] sm:$0xff] }
 0x22a   : > { %v1909_v32 = vpop.f32.mrf.mxu2  ;;  %v1734_v3 = vpop.f32.mrf.mxu0 }
 0x22b   : > { %v1998_v53 = vpop.f32.mrf.mxu3  ;;  %v1910_v58 = vadd.f32 %v1909_v32, %v1821_v2  ;;  %v1823_v4 = vpop.f32.mrf.mxu1  ;;  %v1735_v10 = vadd.f32 %v5654_v39, %v1734_v3  ;;  %v2252_v2 = vpack.c.bf16 %v2216_v19, %v2215_v59  ;;  %v5058_v32 = vpack.c.bf16 %v5696_v26, %v5691_v52 }
 0x22d   : > { %v5813_v8 = vadd.f32 %v1998_v53, %v1910_v58  ;;  %2579 = vmatmul.bf16.vlgmr.msra.gmra.mxu0 %v2245_v15  ;;  %v1824_v56 = vadd.f32 %v1823_v4, %v1735_v10 }
 0x22e   : > { %2668 = vmatmul.bf16.vlgmr.msra.gmra.mxu1 %v2246_v62 }
 0x22f   : > { %v2068_v41 = vsel %vm2044_vm3, %v5813_v8, 0.0  ;;  %2757 = vmatmul.bf16.vlgmr.msra.gmra.mxu2 %v2247_v13  ;;  %v2186_v13 = vld [vmem:[#allocation2 + $0x41] sm:$0xff] }
 0x230   : > { %2846 = vmatmul.bf16.vlgmr.msra.gmra.mxu3 %v2248_v31  ;;  %2100 = vst [vmem:[#allocation2 + $0xb0] sm:$0xff] %v2068_v41  ;;  %v2218_v31 = vld [vmem:[#allocation2 + $0x42] sm:$0xff] }
 0x232   : > { %v1912_v62 = vpop.f32.mrf.mxu2  ;;  %v1736_v24 = vpop.f32.mrf.mxu0 }
 0x233   : > { %v2001_v17 = vpop.f32.mrf.mxu3  ;;  %v1913_v20 = vadd.f32 %v1912_v62, %v1824_v56  ;;  %v1825_v1 = vpop.f32.mrf.mxu1  ;;  %v1737_v5 = vadd.f32 %v5654_v39, %v1736_v24  ;;  %v2253_v56 = vpack.c.bf16 %v2122_v50, %v2121_v21  ;;  %v2185_v62 = vld [vmem:[#allocation2 + $0x39] sm:$0xff] }
 0x235   : > { %v5831_v46 = vadd.f32 %v2001_v17, %v1913_v20  ;;  %v1826_v0 = vadd.f32 %v1825_v1, %v1737_v5  ;;  %v2217_v17 = vld [vmem:[#allocation2 + $0x3a] sm:$0xff]  ;;  %v2255_v1 = vpack.c.bf16 %v2186_v13, %v2185_v62  ;;  %v2126_v62 = vld [vmem:[#allocation2 + $0x6f] sm:$0xff] }
 0x236   : > { %v2256_v5 = vpack.c.bf16 %v2218_v31, %v2217_v17 }
 0x237   : > { %2101 = vst [vmem:[#allocation2 + $0xc8] sm:$0xff] %v5831_v46 }
 0x23a   : > { %v1914_v34 = vpop.f32.mrf.mxu2  ;;  %v1739_v9 = vpop.f32.mrf.mxu0 }
 0x23b   : > { %v2003_v35 = vpop.f32.mrf.mxu3  ;;  %v1915_v37 = vadd.f32 %v1914_v34, %v1826_v0  ;;  %v1828_v30 = vpop.f32.mrf.mxu1  ;;  %v1740_v63 = vadd.f32 %v5654_v39, %v1739_v9  ;;  %v4909_v0 = vld [vmem:[%s6356_s1 + $0x3a8] sm:$0xff] }
 0x23c   : > { %3637 = vmatpush.bf16.msrb.mxu2 %v4909_v0 }
 0x23d   : > { %v5838_v51 = vadd.f32 %v2003_v35, %v1915_v37  ;;  %2584 = vmatmul.bf16.gmra.mxu0 %v2249_v49  ;;  %v1829_v61 = vadd.f32 %v1828_v30, %v1740_v63  ;;  %v4901_v37 = vld [vmem:[%s6356_s1 + $0x368] sm:$0xff] }
 0x23e   : > { %5059 = vmatmul.msk.bf16.gmra.mxu1 %vm5844_vm4, %v5058_v32  ;;  %v2124_v30 = vld [vmem:[#allocation2 + $0x4f] sm:$0xff] }
 0x23f   : > { %2102 = vst [vmem:[#allocation2 + $0xd0] sm:$0xff] %v5838_v51  ;;  %2762 = vmatmul.bf16.gmra.mxu2 %v2251_v14  ;;  %v2278_v53 = vpack.c.bf16 %v5838_v51, %v5831_v46  ;;  %3548 = vmatpush.bf16.msrb.mxu1 %v4901_v37  ;;  %v2188_v14 = vld [vmem:[#allocation2 + $0x51] sm:$0xff] }
 0x240   : > { %2851 = vmatmul.bf16.gmra.mxu3 %v2252_v2  ;;  %v2219_v2 = vld [vmem:[#allocation2 + $0x4a] sm:$0xff]  ;;  %v2220_v32 = vld [vmem:[#allocation2 + $0x52] sm:$0xff] }
 0x241   : > { %v2260_v50 = vpack.c.bf16 %v2220_v32, %v2219_v2  ;;  %v4914_v46 = vld [vmem:[%s6356_s1 + $0x3d0] sm:$0xff] }
 0x242   : > { %v1917_v18 = vpop.f32.mrf.mxu2  ;;  %v1741_v4 = vpop.f32.mrf.mxu0  ;;  %3729 = vmatpush.bf16.msrb.mxu3 %v4914_v46 }
 0x243   : > { %v2006_v58 = vpop.f32.mrf.mxu3  ;;  %v1918_v3 = vadd.f32 %v1917_v18, %v1829_v61  ;;  %v1830_v7 = vpop.f32.mrf.mxu1  ;;  %v1742_v52 = vadd.f32 %v5654_v39, %v1741_v4 }
 0x245   : > { %v5855_v15 = vadd.f32 %v2006_v58, %v1918_v3  ;;  %v1831_v26 = vadd.f32 %v1830_v7, %v1742_v52  ;;  %v2123_v3 = vld [vmem:[#allocation2 + $0x47] sm:$0xff] }
 0x246   : > { %v2257_v4 = vpack.c.bf16 %v2124_v30, %v2123_v3  ;;  %v4892_v30 = vld [vmem:[%s6356_s1 + $0x320] sm:$0xff] }
 0x247   : > { %2103 = vst [vmem:[#allocation2 + $0xd8] sm:$0xff] %v5855_v15  ;;  %3460 = vmatpush.bf16.msrb.mxu0 %v4892_v30  ;;  %v2191_v3 = vld [vmem:[#allocation2 + $0x79] sm:$0xff] }
 0x24a   : > { %v1919_v47 = vpop.f32.mrf.mxu2  ;;  %v1744_v57 = vpop.f32.mrf.mxu0 }
 0x24b   : > { %v2008_v10 = vpop.f32.mrf.mxu3  ;;  %v1920_v41 = vadd.f32 %v1919_v47, %v1831_v26  ;;  %v1833_v16 = vpop.f32.mrf.mxu1  ;;  %v1745_v24 = vadd.f32 %v5654_v39, %v1744_v57  ;;  %v2259_v26 = vpack.c.bf16 %v2188_v14, %v2187_v45  ;;  %v5061_v47 = vpack.c.bf16 %v5735_v38, %v5731_v60 }
 0x24d   : > { %v5859_v20 = vadd.f32 %v2008_v10, %v1920_v41  ;;  %2589 = vmatmul.bf16.gmra.mxu0 %v2253_v56  ;;  %v1834_v22 = vadd.f32 %v1833_v16, %v1745_v24 }
 0x24e   : > { %2678 = vmatmul.bf16.gmra.mxu1 %v2254_v12 }
 0x24f   : > { %v2072_v25 = vsel %vm2044_vm3, %v5859_v20, 0.0  ;;  %2767 = vmatmul.bf16.gmra.mxu2 %v2255_v1  ;;  %v2190_v1 = vld [vmem:[#allocation2 + $0x71] sm:$0xff] }
 0x250   : > { %2856 = vmatmul.bf16.gmra.mxu3 %v2256_v5  ;;  %2104 = vst [vmem:[#allocation2 + $0xe0] sm:$0xff] %v2072_v25  ;;  %v2222_v5 = vld [vmem:[#allocation2 + $0x72] sm:$0xff] }
 0x252   : > { %v1922_v12 = vpop.f32.mrf.mxu2  ;;  %v1746_v35 = vpop.f32.mrf.mxu0 }
 0x253   : > { %v2011_v29 = vpop.f32.mrf.mxu3  ;;  %v1923_v34 = vadd.f32 %v1922_v12, %v1834_v22  ;;  %v1835_v6 = vpop.f32.mrf.mxu1  ;;  %v1747_v19 = vadd.f32 %v5654_v39, %v1746_v35  ;;  %v2261_v22 = vpack.c.bf16 %v2126_v62, %v2125_v28  ;;  %v2189_v12 = vld [vmem:[#allocation2 + $0x69] sm:$0xff] }
 0x255   : > { %v5877_v59 = vadd.f32 %v2011_v29, %v1923_v34  ;;  %v1836_v9 = vadd.f32 %v1835_v6, %v1747_v19  ;;  %v2221_v29 = vld [vmem:[#allocation2 + $0x6a] sm:$0xff]  ;;  %v2263_v6 = vpack.c.bf16 %v2190_v1, %v2189_v12  ;;  %v2130_v12 = vld [vmem:[#allocation2 + $0x9f] sm:$0xff] }
 0x256   : > { %v2264_v19 = vpack.c.bf16 %v2222_v5, %v2221_v29 }
 0x257   : > { %2105 = vst [vmem:[#allocation2 + $0xf8] sm:$0xff] %v5877_v59 }
 0x25a   : > { %v1924_v49 = vpop.f32.mrf.mxu2  ;;  %v1749_v18 = vpop.f32.mrf.mxu0 }
 0x25b   : > { %v2013_v63 = vpop.f32.mrf.mxu3  ;;  %v1925_v61 = vadd.f32 %v1924_v49, %v1836_v9  ;;  %v1838_v58 = vpop.f32.mrf.mxu1  ;;  %v1750_v52 = vadd.f32 %v5654_v39, %v1749_v18  ;;  %v4908_v9 = vld [vmem:[%s6356_s1 + $0x3a0] sm:$0xff] }
 0x25c   : > { %3638 = vmatpush.bf16.msrb.mxu2 %v4908_v9 }
 0x25d   : > { %v5884_v7 = vadd.f32 %v2013_v63, %v1925_v61  ;;  %2594 = vmatmul.bf16.gmra.mxu0 %v2257_v4  ;;  %v1839_v13 = vadd.f32 %v1838_v58, %v1750_v52  ;;  %v4900_v61 = vld [vmem:[%s6356_s1 + $0x360] sm:$0xff] }
 0x25e   : > { %5062 = vmatmul.msk.bf16.gmra.mxu1 %vm5844_vm4, %v5061_v47  ;;  %v2128_v58 = vld [vmem:[#allocation2 + $0x7f] sm:$0xff]  ;;  %v2137_v46 = vld [vmem:[#allocation2 + $0xf7] sm:$0xff] }
 0x25f   : > { %2106 = vst [vmem:[#allocation2 + $0x100] sm:$0xff] %v5884_v7  ;;  %2772 = vmatmul.bf16.gmra.mxu2 %v2259_v26  ;;  %v2286_v10 = vpack.c.bf16 %v5884_v7, %v5877_v59  ;;  %3549 = vmatpush.bf16.msrb.mxu1 %v4900_v61  ;;  %v2192_v26 = vld [vmem:[#allocation2 + $0x81] sm:$0xff] }
 0x260   : > { %2861 = vmatmul.bf16.gmra.mxu3 %v2260_v50  ;;  %v2223_v50 = vld [vmem:[#allocation2 + $0x7a] sm:$0xff]  ;;  %v2224_v47 = vld [vmem:[#allocation2 + $0x82] sm:$0xff] }
 0x261   : > { %v2268_v62 = vpack.c.bf16 %v2224_v47, %v2223_v50  ;;  %v4913_v59 = vld [vmem:[%s6356_s1 + $0x3c8] sm:$0xff] }
 0x262   : > { %v1927_v31 = vpop.f32.mrf.mxu2  ;;  %v1751_v16 = vpop.f32.mrf.mxu0  ;;  %3730 = vmatpush.bf16.msrb.mxu3 %v4913_v59 }
 0x263   : > { %v2016_v41 = vpop.f32.mrf.mxu3  ;;  %v1928_v57 = vadd.f32 %v1927_v31, %v1839_v13  ;;  %v1840_v21 = vpop.f32.mrf.mxu1  ;;  %v1752_v60 = vadd.f32 %v5654_v39, %v1751_v16 }
 0x265   : > { %v5894_v56 = vadd.f32 %v2016_v41, %v1928_v57  ;;  %v1841_v38 = vadd.f32 %v1840_v21, %v1752_v60  ;;  %v2127_v57 = vld [vmem:[#allocation2 + $0x77] sm:$0xff] }
 0x266   : > { %v2265_v16 = vpack.c.bf16 %v2128_v58, %v2127_v57  ;;  %v4891_v58 = vld [vmem:[%s6356_s1 + $0x318] sm:$0xff]  ;;  %v2195_v57 = vld [vmem:[#allocation2 + $0xa9] sm:$0xff] }
 0x267   : > { %2107 = vst [vmem:[#allocation2 + $0x108] sm:$0xff] %v5894_v56  ;;  %3461 = vmatpush.bf16.msrb.mxu0 %v4891_v58 }
 0x26a   : > { %v1929_v17 = vpop.f32.mrf.mxu2  ;;  %v1754_v0 = vpop.f32.mrf.mxu0 }
 0x26b   : > { %v2018_v24 = vpop.f32.mrf.mxu3  ;;  %v1930_v25 = vadd.f32 %v1929_v17, %v1841_v38  ;;  %v1843_v23 = vpop.f32.mrf.mxu1  ;;  %v1755_v35 = vadd.f32 %v5654_v39, %v1754_v0  ;;  %v2267_v38 = vpack.c.bf16 %v2192_v26, %v2191_v3  ;;  %v5064_v17 = vpack.c.bf16 %v5774_v55, %v5770_v36 }
 0x26d   : > { %v5898_v34 = vadd.f32 %v2018_v24, %v1930_v25  ;;  %2599 = vmatmul.bf16.gmra.mxu0 %v2261_v22  ;;  %v1844_v33 = vadd.f32 %v1843_v23, %v1755_v35 }
 0x26e   : > { %2688 = vmatmul.bf16.gmra.mxu1 %v2262_v27 }
 0x26f   : > { %v2076_v37 = vsel %vm2044_vm3, %v5898_v34, 0.0  ;;  %2777 = vmatmul.bf16.gmra.mxu2 %v2263_v6  ;;  %v2194_v6 = vld [vmem:[#allocation2 + $0xa1] sm:$0xff] }
 0x270   : > { %2866 = vmatmul.bf16.gmra.mxu3 %v2264_v19  ;;  %2108 = vst [vmem:[#allocation2 + $0x110] sm:$0xff] %v2076_v37  ;;  %v2226_v19 = vld [vmem:[#allocation2 + $0xa2] sm:$0xff] }
 0x272   : > { %v1932_v27 = vpop.f32.mrf.mxu2  ;;  %v1756_v63 = vpop.f32.mrf.mxu0 }
 0x273   : > { %v2021_v45 = vpop.f32.mrf.mxu3  ;;  %v1933_v49 = vadd.f32 %v1932_v27, %v1844_v33  ;;  %v1845_v14 = vpop.f32.mrf.mxu1  ;;  %v1757_v32 = vadd.f32 %v5654_v39, %v1756_v63  ;;  %v2269_v33 = vpack.c.bf16 %v2130_v12, %v2129_v43  ;;  %v2193_v27 = vld [vmem:[#allocation2 + $0x99] sm:$0xff] }
 0x275   : > { %v5916_v2 = vadd.f32 %v2021_v45, %v1933_v49  ;;  %v1846_v18 = vadd.f32 %v1845_v14, %v1757_v32  ;;  %v2225_v45 = vld [vmem:[#allocation2 + $0x9a] sm:$0xff]  ;;  %v2271_v14 = vpack.c.bf16 %v2194_v6, %v2193_v27 }
 0x276   : > { %v2272_v32 = vpack.c.bf16 %v2226_v19, %v2225_v45  ;;  %v2134_v45 = vld [vmem:[#allocation2 + $0xcf] sm:$0xff] }
 0x277   : > { %2109 = vst [vmem:[#allocation2 + $0x128] sm:$0xff] %v5916_v2 }
 0x27a   : > { %v1934_v4 = vpop.f32.mrf.mxu2  ;;  %v1759_v31 = vpop.f32.mrf.mxu0 }
 0x27b   : > { %v2023_v52 = vpop.f32.mrf.mxu3  ;;  %v1935_v13 = vadd.f32 %v1934_v4, %v1846_v18  ;;  %v1848_v41 = vpop.f32.mrf.mxu1  ;;  %v1760_v60 = vadd.f32 %v5654_v39, %v1759_v31  ;;  %v4907_v18 = vld [vmem:[%s6356_s1 + $0x398] sm:$0xff] }
 0x27c   : > { %3639 = vmatpush.bf16.msrb.mxu2 %v4907_v18 }
 0x27d   : > { %v5923_v21 = vadd.f32 %v2023_v52, %v1935_v13  ;;  %2604 = vmatmul.bf16.gmra.mxu0 %v2265_v16  ;;  %v1849_v1 = vadd.f32 %v1848_v41, %v1760_v60  ;;  %v4899_v13 = vld [vmem:[%s6356_s1 + $0x358] sm:$0xff]  ;;  %v2132_v41 = vld [vmem:[#allocation2 + $0xaf] sm:$0xff] }
 0x27e   : > { %5065 = vmatmul.msk.bf16.gmra.mxu1 %vm5844_vm4, %v5064_v17  ;;  %v2228_v17 = vld [vmem:[#allocation2 + $0xb2] sm:$0xff]  ;;  %v2141_v59 = vld [vmem:[#allocation2 + $0x127] sm:$0xff] }
 0x27f   : > { %2110 = vst [vmem:[#allocation2 + $0x130] sm:$0xff] %v5923_v21  ;;  %2782 = vmatmul.bf16.gmra.mxu2 %v2267_v38  ;;  %v2294_v24 = vpack.c.bf16 %v5923_v21, %v5916_v2  ;;  %3550 = vmatpush.bf16.msrb.mxu1 %v4899_v13  ;;  %v2196_v38 = vld [vmem:[#allocation2 + $0xb1] sm:$0xff]  ;;  %v4912_v2 = vld [vmem:[%s6356_s1 + $0x3c0] sm:$0xff] }
 0x280   : > { %2871 = vmatmul.bf16.gmra.mxu3 %v2268_v62  ;;  %v2227_v62 = vld [vmem:[#allocation2 + $0xaa] sm:$0xff] }
 0x281   : > { %v2276_v12 = vpack.c.bf16 %v2228_v17, %v2227_v62  ;;  %3731 = vmatpush.bf16.msrb.mxu3 %v4912_v2 }
 0x282   : > { %v1937_v5 = vpop.f32.mrf.mxu2  ;;  %v1761_v23 = vpop.f32.mrf.mxu0 }
 0x283   : > { %v2026_v25 = vpop.f32.mrf.mxu3  ;;  %v1938_v0 = vadd.f32 %v1937_v5, %v1849_v1  ;;  %v1850_v28 = vpop.f32.mrf.mxu1  ;;  %v1762_v36 = vadd.f32 %v5654_v39, %v1761_v23  ;;  %v5031_v39 = vld [vmem:[%s6357_s2 + $0x1] ss:$0 sm:$0xff] }
 0x285   : > { %v5933_v22 = vadd.f32 %v2026_v25, %v1938_v0  ;;  %v1851_v55 = vadd.f32 %v1850_v28, %v1762_v36  ;;  %v2131_v0 = vld [vmem:[#allocation2 + $0xa7] sm:$0xff] }
 0x286   : > { %v2273_v23 = vpack.c.bf16 %v2132_v41, %v2131_v0  ;;  %v4890_v41 = vld [vmem:[%s6356_s1 + $0x310] sm:$0xff]  ;;  %v2199_v0 = vld [vmem:[#allocation2 + $0xd9] sm:$0xff] }
 0x287   : > { %2111 = vst [vmem:[#allocation2 + $0x138] sm:$0xff] %v5933_v22  ;;  %3462 = vmatpush.bf16.msrb.mxu0 %v4890_v41 }
 0x28a   : > { %v1939_v29 = vpop.f32.mrf.mxu2  ;;  %v1764_v9 = vpop.f32.mrf.mxu0 }
 0x28b   : > { %v2028_v35 = vpop.f32.mrf.mxu3  ;;  %v1940_v37 = vadd.f32 %v1939_v29, %v1851_v55  ;;  %v1853_v30 = vpop.f32.mrf.mxu1  ;;  %v1765_v63 = vadd.f32 %v5031_v39, %v1764_v9  ;;  %v2275_v55 = vpack.c.bf16 %v2196_v38, %v2195_v57  ;;  %v5067_v29 = vpack.c.bf16 %v5813_v8, %v5809_v44  ;;  %v5978_v8 = vld [vmem:[%s6357_s2 + $0x2] ss:$0 sm:$0xff] }
 0x28d   : > { %v5937_v49 = vadd.f32 %v2028_v35, %v1940_v37  ;;  %2609 = vmatmul.bf16.gmra.mxu0 %v2269_v33  ;;  %v1854_v48 = vadd.f32 %v1853_v30, %v1765_v63 }
 0x28e   : > { %2698 = vmatmul.bf16.gmra.mxu1 %v2270_v40 }
 0x28f   : > { %v2080_v61 = vsel %vm2044_vm3, %v5937_v49, 0.0  ;;  %2787 = vmatmul.bf16.gmra.mxu2 %v2271_v14 }
 0x290   : > { %2876 = vmatmul.bf16.gmra.mxu3 %v2272_v32  ;;  %2112 = vst [vmem:[#allocation2 + $0x140] sm:$0xff] %v2080_v61  ;;  %v2198_v32 = vld [vmem:[#allocation2 + $0xd1] sm:$0xff] }
 0x291   : > { %v2230_v61 = vld [vmem:[#allocation2 + $0xd2] sm:$0xff] }
 0x292   : > { %v1942_v40 = vpop.f32.mrf.mxu2  ;;  %v1766_v52 = vpop.f32.mrf.mxu0 }
 0x293   : > { %v2031_v3 = vpop.f32.mrf.mxu3  ;;  %v1943_v4 = vadd.f32 %v1942_v40, %v1854_v48  ;;  %v1855_v26 = vpop.f32.mrf.mxu1  ;;  %v1767_v47 = vadd.f32 %v5031_v39, %v1766_v52  ;;  %v2133_v48 = vld [vmem:[#allocation2 + $0xc7] sm:$0xff] }
 0x294   : > { %v2277_v40 = vpack.c.bf16 %v2134_v45, %v2133_v48 }
 0x295   : > { %v5957_v50 = vadd.f32 %v2031_v3, %v1943_v4  ;;  %v1856_v31 = vadd.f32 %v1855_v26, %v1767_v47  ;;  %v2197_v3 = vld [vmem:[#allocation2 + $0xc9] sm:$0xff] }
 0x296   : > { %v2279_v26 = vpack.c.bf16 %v2198_v32, %v2197_v3  ;;  %v2138_v3 = vld [vmem:[#allocation2 + $0xff] sm:$0xff] }
 0x297   : > { %2113 = vst [vmem:[#allocation2 + $0x158] sm:$0xff] %v5957_v50 }
 0x29a   : > { %v1944_v16 = vpop.f32.mrf.mxu2  ;;  %v1769_v5 = vpop.f32.mrf.mxu0 }
 0x29b   : > { %v2033_v60 = vpop.f32.mrf.mxu3  ;;  %v1945_v1 = vadd.f32 %v1944_v16, %v1856_v31  ;;  %v1858_v25 = vpop.f32.mrf.mxu1  ;;  %v1770_v36 = vadd.f32 %v5031_v39, %v1769_v5  ;;  %v4906_v31 = vld [vmem:[%s6356_s1 + $0x390] sm:$0xff] }
 0x29c   : > { %3640 = vmatpush.bf16.msrb.mxu2 %v4906_v31 }
 0x29d   : > { %v5963_v28 = vadd.f32 %v2033_v60, %v1945_v1  ;;  %2614 = vmatmul.bf16.gmra.mxu0 %v2273_v23  ;;  %v1859_v6 = vadd.f32 %v1858_v25, %v1770_v36  ;;  %v4898_v1 = vld [vmem:[%s6356_s1 + $0x350] sm:$0xff]  ;;  %v2136_v25 = vld [vmem:[#allocation2 + $0xdf] sm:$0xff] }
 0x29e   : > { %5068 = vmatmul.msk.bf16.gmra.mxu1 %vm5844_vm4, %v5067_v29  ;;  %v2232_v29 = vld [vmem:[#allocation2 + $0xe2] sm:$0xff]  ;;  %v2145_v2 = vld [vmem:[#allocation2 + $0x157] sm:$0xff] }
 0x29f   : > { %2114 = vst [vmem:[#allocation2 + $0x160] sm:$0xff] %v5963_v28  ;;  %2792 = vmatmul.bf16.gmra.mxu2 %v2275_v55  ;;  %v2302_v35 = vpack.c.bf16 %v5963_v28, %v5957_v50  ;;  %3551 = vmatpush.bf16.msrb.mxu1 %v4898_v1  ;;  %v2200_v55 = vld [vmem:[#allocation2 + $0xe1] sm:$0xff] }
 0x2a0   : > { %2881 = vmatmul.bf16.gmra.mxu3 %v2276_v12  ;;  %v2231_v12 = vld [vmem:[#allocation2 + $0xda] sm:$0xff] }
 0x2a1   : > { %v2284_v45 = vpack.c.bf16 %v2232_v29, %v2231_v12 }
 0x2a2   : > { %v1947_v19 = vpop.f32.mrf.mxu2  ;;  %v1771_v30 = vpop.f32.mrf.mxu0 }
 0x2a3   : > { %v2036_v37 = vpop.f32.mrf.mxu3  ;;  %v1948_v9 = vadd.f32 %v1947_v19, %v1859_v6  ;;  %v1860_v43 = vpop.f32.mrf.mxu1  ;;  %v1772_v27 = vadd.f32 %v5031_v39, %v1771_v30  ;;  %v2229_v39 = vld [vmem:[#allocation2 + $0xca] sm:$0xff] }
 0x2a4   : > { %v2280_v47 = vpack.c.bf16 %v2230_v61, %v2229_v39 }
 0x2a5   : > { %v5972_v33 = vadd.f32 %v2036_v37, %v1948_v9  ;;  %v1861_v44 = vadd.f32 %v1860_v43, %v1772_v27  ;;  %v2135_v9 = vld [vmem:[#allocation2 + $0xd7] sm:$0xff] }
 0x2a6   : > { %v2281_v30 = vpack.c.bf16 %v2136_v25, %v2135_v9  ;;  %v4889_v25 = vld [vmem:[%s6356_s1 + $0x308] sm:$0xff] }
 0x2a7   : > { %2115 = vst [vmem:[#allocation2 + $0x168] sm:$0xff] %v5972_v33  ;;  %3463 = vmatpush.bf16.msrb.mxu0 %v4889_v25  ;;  %v2203_v9 = vld [vmem:[#allocation2 + $0x109] sm:$0xff] }
 0x2aa   : > { %v1949_v63 = vpop.f32.mrf.mxu2  ;;  %v2580_v58 = vpop.f32.mrf.mxu0 }
 0x2ab   : > { %v2038_v14 = vpop.f32.mrf.mxu3  ;;  %v1950_v18 = vadd.f32 %v1949_v63, %v1861_v44  ;;  %v2669_v54 = vpop.f32.mrf.mxu1  ;;  %v2581_v52 = vadd.f32 %v5978_v8, %v2580_v58  ;;  %v2283_v44 = vpack.c.bf16 %v2200_v55, %v2199_v0  ;;  %v5070_v63 = vpack.c.bf16 %v5859_v20, %v5855_v15 }
 0x2ad   : > { %v5980_v4 = vadd.f32 %v2038_v14, %v1950_v18  ;;  %2619 = vmatmul.bf16.gmra.mxu0 %v2277_v40  ;;  %v2670_v51 = vadd.f32 %v2669_v54, %v2581_v52 }
 0x2ae   : > { %2708 = vmatmul.bf16.gmra.mxu1 %v2278_v53 }
 0x2af   : > { %v2084_v13 = vsel %vm2044_vm3, %v5980_v4, 0.0  ;;  %2797 = vmatmul.bf16.gmra.mxu2 %v2279_v26  ;;  %v2202_v26 = vld [vmem:[#allocation2 + $0x101] sm:$0xff] }
 0x2b0   : > { %2886 = vmatmul.bf16.gmra.mxu3 %v2280_v47  ;;  %2116 = vst [vmem:[#allocation2 + $0x170] sm:$0xff] %v2084_v13  ;;  %v2234_v47 = vld [vmem:[#allocation2 + $0x102] sm:$0xff] }
 0x2b2   : > { %v2758_v53 = vpop.f32.mrf.mxu2  ;;  %v2582_v60 = vpop.f32.mrf.mxu0 }
 0x2b3   : > { %v2847_v57 = vpop.f32.mrf.mxu3  ;;  %v2759_v16 = vadd.f32 %v2758_v53, %v2670_v51  ;;  %v2671_v38 = vpop.f32.mrf.mxu1  ;;  %v2583_v17 = vadd.f32 %v5978_v8, %v2582_v60  ;;  %v2285_v51 = vpack.c.bf16 %v2138_v3, %v2137_v46  ;;  %v2201_v53 = vld [vmem:[#allocation2 + $0xf9] sm:$0xff] }
 0x2b5   : > { %v5998_v62 = vadd.f32 %v2847_v57, %v2759_v16  ;;  %v2672_v5 = vadd.f32 %v2671_v38, %v2583_v17  ;;  %v2233_v57 = vld [vmem:[#allocation2 + $0xfa] sm:$0xff]  ;;  %v2287_v38 = vpack.c.bf16 %v2202_v26, %v2201_v53  ;;  %v2142_v53 = vld [vmem:[#allocation2 + $0x12f] sm:$0xff] }
 0x2b6   : > { %v2288_v17 = vpack.c.bf16 %v2234_v47, %v2233_v57 }
 0x2b7   : > { %2971 = vst [vmem:[#allocation2 + $0x8] sm:$0xff] %v5998_v62  ;;  %v2148_v28 = vld [vmem:[#allocation2 + $0x16f] sm:$0xff] }
 0x2ba   : > { %v2760_v23 = vpop.f32.mrf.mxu2  ;;  %v2585_v19 = vpop.f32.mrf.mxu0 }
 0x2bb   : > { %v2849_v36 = vpop.f32.mrf.mxu3  ;;  %v2761_v6 = vadd.f32 %v2760_v23, %v2672_v5  ;;  %v2674_v37 = vpop.f32.mrf.mxu1  ;;  %v2586_v27 = vadd.f32 %v5978_v8, %v2585_v19  ;;  %v4905_v5 = vld [vmem:[%s6356_s1 + $0x388] sm:$0xff] }
 0x2bc   : > { %3641 = vmatpush.bf16.msrb.mxu2 %v4905_v5 }
 0x2bd   : > { %v6005_v43 = vadd.f32 %v2849_v36, %v2761_v6  ;;  %2624 = vmatmul.bf16.gmra.mxu0 %v2281_v30  ;;  %v2675_v32 = vadd.f32 %v2674_v37, %v2586_v27  ;;  %v4897_v6 = vld [vmem:[%s6356_s1 + $0x348] sm:$0xff] }
 0x2be   : > { %5071 = vmatmul.msk.bf16.gmra.mxu1 %vm5844_vm4, %v5070_v63  ;;  %v2140_v37 = vld [vmem:[#allocation2 + $0x10f] sm:$0xff] }
 0x2bf   : > { %2972 = vst [vmem:[#allocation2 + $0x10] sm:$0xff] %v6005_v43  ;;  %2802 = vmatmul.bf16.gmra.mxu2 %v2283_v44  ;;  %v3132_v14 = vpack.c.bf16 %v6005_v43, %v5998_v62  ;;  %3552 = vmatpush.bf16.msrb.mxu1 %v4897_v6  ;;  %v2204_v44 = vld [vmem:[#allocation2 + $0x111] sm:$0xff] }
 0x2c0   : > { %2891 = vmatmul.bf16.gmra.mxu3 %v2284_v45  ;;  %v2235_v45 = vld [vmem:[#allocation2 + $0x10a] sm:$0xff]  ;;  %v2236_v63 = vld [vmem:[#allocation2 + $0x112] sm:$0xff] }
 0x2c1   : > { %v2292_v3 = vpack.c.bf16 %v2236_v63, %v2235_v45 }
 0x2c2   : > { %v2763_v61 = vpop.f32.mrf.mxu2  ;;  %v2587_v54 = vpop.f32.mrf.mxu0 }
 0x2c3   : > { %v2852_v18 = vpop.f32.mrf.mxu3  ;;  %v2764_v58 = vadd.f32 %v2763_v61, %v2675_v32  ;;  %v2676_v48 = vpop.f32.mrf.mxu1  ;;  %v2588_v15 = vadd.f32 %v5978_v8, %v2587_v54 }
 0x2c5   : > { %v6015_v40 = vadd.f32 %v2852_v18, %v2764_v58  ;;  %v2677_v20 = vadd.f32 %v2676_v48, %v2588_v15  ;;  %v2139_v58 = vld [vmem:[#allocation2 + $0x107] sm:$0xff] }
 0x2c6   : > { %v2289_v54 = vpack.c.bf16 %v2140_v37, %v2139_v58  ;;  %v4888_v37 = vld [vmem:[%s6356_s1 + $0x300] sm:$0xff] }
 0x2c7   : > { %2973 = vst [vmem:[#allocation2 + $0x18] sm:$0xff] %v6015_v40  ;;  %3464 = vmatpush.bf16.msrb.mxu0 %v4888_v37  ;;  %v2207_v58 = vld [vmem:[#allocation2 + $0x139] sm:$0xff] }
 0x2ca   : > { %v2765_v39 = vpop.f32.mrf.mxu2  ;;  %v2590_v31 = vpop.f32.mrf.mxu0 }
 0x2cb   : > { %v2854_v52 = vpop.f32.mrf.mxu3  ;;  %v2766_v13 = vadd.f32 %v2765_v39, %v2677_v20  ;;  %v2679_v41 = vpop.f32.mrf.mxu1  ;;  %v2591_v60 = vadd.f32 %v5978_v8, %v2590_v31  ;;  %v2291_v20 = vpack.c.bf16 %v2204_v44, %v2203_v9  ;;  %v5073_v39 = vpack.c.bf16 %v5898_v34, %v5894_v56 }
 0x2cd   : > { %v6020_v16 = vadd.f32 %v2854_v52, %v2766_v13  ;;  %2629 = vmatmul.bf16.gmra.mxu0 %v2285_v51  ;;  %v2680_v7 = vadd.f32 %v2679_v41, %v2591_v60 }
 0x2ce   : > { %2718 = vmatmul.bf16.gmra.mxu1 %v2286_v10 }
 0x2cf   : > { %v2942_v1 = vsel %vm2930_vm5, %v6020_v16, 0.0  ;;  %2807 = vmatmul.bf16.gmra.mxu2 %v2287_v38  ;;  %v2206_v38 = vld [vmem:[#allocation2 + $0x131] sm:$0xff] }
 0x2d0   : > { %2896 = vmatmul.bf16.gmra.mxu3 %v2288_v17  ;;  %2974 = vst [vmem:[#allocation2 + $0x20] sm:$0xff] %v2942_v1  ;;  %v2238_v17 = vld [vmem:[#allocation2 + $0x132] sm:$0xff] }
 0x2d2   : > { %v2768_v10 = vpop.f32.mrf.mxu2  ;;  %v2592_v36 = vpop.f32.mrf.mxu0 }
 0x2d3   : > { %v2857_v0 = vpop.f32.mrf.mxu3  ;;  %v2769_v23 = vadd.f32 %v2768_v10, %v2680_v7  ;;  %v2681_v55 = vpop.f32.mrf.mxu1  ;;  %v2593_v29 = vadd.f32 %v5978_v8, %v2592_v36  ;;  %v2293_v7 = vpack.c.bf16 %v2142_v53, %v2141_v59  ;;  %v2205_v10 = vld [vmem:[#allocation2 + $0x129] sm:$0xff] }
 0x2d5   : > { %v6038_v12 = vadd.f32 %v2857_v0, %v2769_v23  ;;  %v2682_v19 = vadd.f32 %v2681_v55, %v2593_v29  ;;  %v2237_v0 = vld [vmem:[#allocation2 + $0x12a] sm:$0xff]  ;;  %v2295_v55 = vpack.c.bf16 %v2206_v38, %v2205_v10  ;;  %v2146_v10 = vld [vmem:[#allocation2 + $0x15f] sm:$0xff] }
 0x2d6   : > { %v2296_v29 = vpack.c.bf16 %v2238_v17, %v2237_v0 }
 0x2d7   : > { %2975 = vst [vmem:[#allocation2 + $0x38] sm:$0xff] %v6038_v12  ;;  %v3006_v43 = vld [vmem:[#allocation2 + $0x1f] sm:$0xff] }
 0x2da   : > { %v2770_v30 = vpop.f32.mrf.mxu2  ;;  %v2595_v61 = vpop.f32.mrf.mxu0 }
 0x2db   : > { %v2859_v27 = vpop.f32.mrf.mxu3  ;;  %v2771_v32 = vadd.f32 %v2770_v30, %v2682_v19  ;;  %v2684_v18 = vpop.f32.mrf.mxu1  ;;  %v2596_v15 = vadd.f32 %v5978_v8, %v2595_v61  ;;  %v4904_v19 = vld [vmem:[%s6356_s1 + $0x380] sm:$0xff] }
 0x2dc   : > { %3642 = vmatpush.bf16.msrb.mxu2 %v4904_v19 }
 0x2dd   : > { %v6045_v48 = vadd.f32 %v2859_v27, %v2771_v32  ;;  %2634 = vmatmul.bf16.gmra.mxu0 %v2289_v54  ;;  %v2685_v26 = vadd.f32 %v2684_v18, %v2596_v15  ;;  %v4896_v32 = vld [vmem:[%s6356_s1 + $0x340] sm:$0xff] }
 0x2de   : > { %5074 = vmatmul.msk.bf16.gmra.mxu1 %vm5844_vm4, %v5073_v39  ;;  %v2144_v18 = vld [vmem:[#allocation2 + $0x13f] sm:$0xff] }
 0x2df   : > { %2976 = vst [vmem:[#allocation2 + $0x40] sm:$0xff] %v6045_v48  ;;  %2812 = vmatmul.bf16.gmra.mxu2 %v2291_v20  ;;  %v3140_v52 = vpack.c.bf16 %v6045_v48, %v6038_v12  ;;  %3553 = vmatpush.bf16.msrb.mxu1 %v4896_v32  ;;  %v2208_v20 = vld [vmem:[#allocation2 + $0x141] sm:$0xff] }
 0x2e0   : > { %2901 = vmatmul.bf16.gmra.mxu3 %v2292_v3  ;;  %v2239_v3 = vld [vmem:[#allocation2 + $0x13a] sm:$0xff]  ;;  %v2240_v39 = vld [vmem:[#allocation2 + $0x142] sm:$0xff] }
 0x2e1   : > { %v2300_v53 = vpack.c.bf16 %v2240_v39, %v2239_v3 }
 0x2e2   : > { %v2773_v47 = vpop.f32.mrf.mxu2  ;;  %v2597_v41 = vpop.f32.mrf.mxu0 }
 0x2e3   : > { %v2862_v13 = vpop.f32.mrf.mxu3  ;;  %v2774_v31 = vadd.f32 %v2773_v47, %v2685_v26  ;;  %v2686_v46 = vpop.f32.mrf.mxu1  ;;  %v2598_v56 = vadd.f32 %v5978_v8, %v2597_v41 }
 0x2e5   : > { %v6055_v51 = vadd.f32 %v2862_v13, %v2774_v31  ;;  %v2687_v34 = vadd.f32 %v2686_v46, %v2598_v56  ;;  %v2143_v31 = vld [vmem:[#allocation2 + $0x137] sm:$0xff] }
 0x2e6   : > { %v2297_v41 = vpack.c.bf16 %v2144_v18, %v2143_v31  ;;  %v2243_v31 = vld [vmem:[#allocation2 + $0x16a] sm:$0xff] }
 0x2e7   : > { %2977 = vst [vmem:[#allocation2 + $0x48] sm:$0xff] %v6055_v51 }
 0x2ea   : > { %v2775_v57 = vpop.f32.mrf.mxu2  ;;  %v2600_v5 = vpop.f32.mrf.mxu0 }
 0x2eb   : > { %v2864_v60 = vpop.f32.mrf.mxu3  ;;  %v2776_v1 = vadd.f32 %v2775_v57, %v2687_v34  ;;  %v2689_v25 = vpop.f32.mrf.mxu1  ;;  %v2601_v36 = vadd.f32 %v5978_v8, %v2600_v5  ;;  %v2299_v34 = vpack.c.bf16 %v2208_v20, %v2207_v58  ;;  %v5076_v57 = vpack.c.bf16 %v5937_v49, %v5933_v22 }
 0x2ed   : > { %v6059_v23 = vadd.f32 %v2864_v60, %v2776_v1  ;;  %2639 = vmatmul.bf16.gmra.mxu0 %v2293_v7  ;;  %v2690_v21 = vadd.f32 %v2689_v25, %v2601_v36 }
 0x2ee   : > { %2728 = vmatmul.bf16.gmra.mxu1 %v2294_v24 }
 0x2ef   : > { %v2946_v6 = vsel %vm2930_vm5, %v6059_v23, 0.0  ;;  %2817 = vmatmul.bf16.gmra.mxu2 %v2295_v55  ;;  %v2210_v55 = vld [vmem:[#allocation2 + $0x161] sm:$0xff] }
 0x2f0   : > { %2906 = vmatmul.bf16.gmra.mxu3 %v2296_v29  ;;  %2978 = vst [vmem:[#allocation2 + $0x50] sm:$0xff] %v2946_v6  ;;  %v2242_v29 = vld [vmem:[#allocation2 + $0x162] sm:$0xff] }
 0x2f2   : > { %v2778_v24 = vpop.f32.mrf.mxu2  ;;  %v2602_v27 = vpop.f32.mrf.mxu0 }
 0x2f3   : > { %v2867_v9 = vpop.f32.mrf.mxu3  ;;  %v2779_v30 = vadd.f32 %v2778_v24, %v2690_v21  ;;  %v2691_v44 = vpop.f32.mrf.mxu1  ;;  %v2603_v63 = vadd.f32 %v5978_v8, %v2602_v27  ;;  %v2301_v21 = vpack.c.bf16 %v2146_v10, %v2145_v2  ;;  %v2209_v24 = vld [vmem:[#allocation2 + $0x159] sm:$0xff]  ;;  %v3068_v2 = vld [vmem:[#allocation2 + $0x11] sm:$0xff] }
 0x2f5   : > { %v6077_v45 = vadd.f32 %v2867_v9, %v2779_v30  ;;  %v2692_v61 = vadd.f32 %v2691_v44, %v2603_v63  ;;  %v2241_v9 = vld [vmem:[#allocation2 + $0x15a] sm:$0xff]  ;;  %v2303_v44 = vpack.c.bf16 %v2210_v55, %v2209_v24 }
 0x2f6   : > { %v2304_v63 = vpack.c.bf16 %v2242_v29, %v2241_v9 }
 0x2f7   : > { %2979 = vst [vmem:[#allocation2 + $0x68] sm:$0xff] %v6077_v45  ;;  %v3010_v48 = vld [vmem:[#allocation2 + $0x4f] sm:$0xff] }
 0x2fa   : > { %v2780_v54 = vpop.f32.mrf.mxu2  ;;  %v2605_v47 = vpop.f32.mrf.mxu0 }
 0x2fb   : > { %v2869_v15 = vpop.f32.mrf.mxu3  ;;  %v2781_v26 = vadd.f32 %v2780_v54, %v2692_v61  ;;  %v2694_v13 = vpop.f32.mrf.mxu1  ;;  %v2606_v56 = vadd.f32 %v5978_v8, %v2605_v47 }
 0x2fd   : > { %v6084_v46 = vadd.f32 %v2869_v15, %v2781_v26  ;;  %2644 = vmatmul.bf16.gmra.mxu0 %v2297_v41  ;;  %v2695_v38 = vadd.f32 %v2694_v13, %v2606_v56  ;;  %v2212_v13 = vld [vmem:[#allocation2 + $0x171] sm:$0xff] }
 0x2fe   : > { %5077 = vmatmul.msk.bf16.gmra.mxu1 %vm5844_vm4, %v5076_v57  ;;  %v2244_v41 = vld [vmem:[#allocation2 + $0x172] sm:$0xff]  ;;  %v2147_v57 = vld [vmem:[#allocation2 + $0x167] sm:$0xff] }
 0x2ff   : > { %2980 = vst [vmem:[#allocation2 + $0x70] sm:$0xff] %v6084_v46  ;;  %2822 = vmatmul.bf16.gmra.mxu2 %v2299_v34  ;;  %v3148_v60 = vpack.c.bf16 %v6084_v46, %v6077_v45 }
 0x300   : > { %2911 = vmatmul.bf16.gmra.mxu3 %v2300_v53 }
 0x302   : > { %v2783_v17 = vpop.f32.mrf.mxu2  ;;  %v2607_v25 = vpop.f32.mrf.mxu0 }
 0x303   : > { %v2872_v1 = vpop.f32.mrf.mxu3  ;;  %v2784_v5 = vadd.f32 %v2783_v17, %v2695_v38  ;;  %v2696_v59 = vpop.f32.mrf.mxu1  ;;  %v2608_v22 = vadd.f32 %v5978_v8, %v2607_v25  ;;  %v2305_v38 = vpack.c.bf16 %v2148_v28, %v2147_v57  ;;  %v2308_v25 = vpack.c.bf16 %v2244_v41, %v2243_v31  ;;  %v3102_v57 = vld [vmem:[#allocation2 + $0x22] sm:$0xff] }
 0x305   : > { %v6094_v7 = vadd.f32 %v2872_v1, %v2784_v5  ;;  %v2697_v49 = vadd.f32 %v2696_v59, %v2608_v22  ;;  %v5079_v59 = vpack.c.bf16 %v5980_v4, %v5972_v33  ;;  %v3004_v4 = vld [vmem:[#allocation2 + $0xf] sm:$0xff] }
 0x307   : > { %2981 = vst [vmem:[#allocation2 + $0x78] sm:$0xff] %v6094_v7 }
 0x30a   : > { %v2785_v0 = vpop.f32.mrf.mxu2  ;;  %v2610_v19 = vpop.f32.mrf.mxu0 }
 0x30b   : > { %v2874_v36 = vpop.f32.mrf.mxu3  ;;  %v2786_v6 = vadd.f32 %v2785_v0, %v2697_v49  ;;  %v2699_v37 = vpop.f32.mrf.mxu1  ;;  %v2611_v27 = vadd.f32 %v5978_v8, %v2610_v19 }
 0x30d   : > { %v6098_v30 = vadd.f32 %v2874_v36, %v2786_v6  ;;  %2649 = vmatmul.bf16.gmra.mxu0 %v2301_v21  ;;  %v2700_v61 = vadd.f32 %v2699_v37, %v2611_v27  ;;  %v3100_v21 = vld [vmem:[#allocation2 + $0x12] sm:$0xff] }
 0x30e   : > { %2738 = vmatmul.bf16.gmra.mxu1 %v2302_v35  ;;  %v2211_v35 = vld [vmem:[#allocation2 + $0x169] sm:$0xff] }
 0x30f   : > { %v2950_v32 = vsel %vm2930_vm5, %v6098_v30, 0.0  ;;  %2827 = vmatmul.bf16.gmra.mxu2 %v2303_v44  ;;  %v2307_v5 = vpack.c.bf16 %v2212_v13, %v2211_v35  ;;  %v3003_v44 = vld [vmem:[#allocation2 + $0x7] sm:$0xff] }
 0x310   : > { %2916 = vmatmul.bf16.gmra.mxu3 %v2304_v63  ;;  %2982 = vst [vmem:[#allocation2 + $0x80] sm:$0xff] %v2950_v32  ;;  %v3131_v63 = vpack.c.bf16 %v3004_v4, %v3003_v44  ;;  %v3067_v32 = vld [vmem:[#allocation2 + $0x9] sm:$0xff] }
 0x312   : > { %v2788_v18 = vpop.f32.mrf.mxu2  ;;  %v2612_v15 = vpop.f32.mrf.mxu0 }
 0x313   : > { %v2877_v58 = vpop.f32.mrf.mxu3  ;;  %v2789_v54 = vadd.f32 %v2788_v18, %v2700_v61  ;;  %v2701_v20 = vpop.f32.mrf.mxu1  ;;  %v2613_v39 = vadd.f32 %v5978_v8, %v2612_v15  ;;  %v3099_v61 = vld [vmem:[#allocation2 + $0xa] sm:$0xff] }
 0x314   : > { %v3134_v15 = vpack.c.bf16 %v3100_v21, %v3099_v61 }
 0x315   : > { %v6107_v3 = vadd.f32 %v2877_v58, %v2789_v54  ;;  %v2702_v50 = vadd.f32 %v2701_v20, %v2613_v39  ;;  %v3133_v54 = vpack.c.bf16 %v3068_v2, %v3067_v32  ;;  %v3104_v32 = vld [vmem:[#allocation2 + $0x42] sm:$0xff] }
 0x317   : > { %2983 = vst [vmem:[#allocation2 + $0x98] sm:$0xff] %v6107_v3  ;;  %v3014_v46 = vld [vmem:[#allocation2 + $0x7f] sm:$0xff] }
 0x31a   : > { %v2790_v26 = vpop.f32.mrf.mxu2  ;;  %v2615_v34 = vpop.f32.mrf.mxu0 }
 0x31b   : > { %v2879_v47 = vpop.f32.mrf.mxu3  ;;  %v2791_v56 = vadd.f32 %v2790_v26, %v2702_v50  ;;  %v2704_v53 = vpop.f32.mrf.mxu1  ;;  %v2616_v1 = vadd.f32 %v5978_v8, %v2615_v34  ;;  %v3070_v34 = vld [vmem:[#allocation2 + $0x21] sm:$0xff] }
 0x31d   : > { %v6111_v17 = vadd.f32 %v2879_v47, %v2791_v56  ;;  %2654 = vmatmul.bf16.gmra.mxu0 %v2305_v38  ;;  %v2705_v49 = vadd.f32 %v2704_v53, %v2616_v1  ;;  %v3101_v53 = vld [vmem:[#allocation2 + $0x1a] sm:$0xff] }
 0x31e   : > { %5080 = vmatmul.msk.bf16.gmra.mxu1 %vm5844_vm4, %v5079_v59 }
 0x31f   : > { %2984 = vst [vmem:[#allocation2 + $0xa0] sm:$0xff] %v6111_v17  ;;  %2832 = vmatmul.bf16.gmra.mxu2 %v2307_v5  ;;  %v3156_v22 = vpack.c.bf16 %v6111_v17, %v6107_v3 }
 0x320   : > { %2921 = vmatmul.bf16.gmra.mxu3 %v2308_v25  ;;  %v3005_v25 = vld [vmem:[#allocation2 + $0x17] sm:$0xff] }
 0x321   : > { %v3135_v59 = vpack.c.bf16 %v3006_v43, %v3005_v25  ;;  %v3105_v25 = vld [vmem:[#allocation2 + $0x4a] sm:$0xff] }
 0x322   : > { %v2793_v10 = vpop.f32.mrf.mxu2  ;;  %v2617_v55 = vpop.f32.mrf.mxu0 }
 0x323   : > { %v2882_v0 = vpop.f32.mrf.mxu3  ;;  %v2794_v36 = vadd.f32 %v2793_v10, %v2705_v49  ;;  %v2706_v29 = vpop.f32.mrf.mxu1  ;;  %v2618_v33 = vadd.f32 %v5978_v8, %v2617_v55 }
 0x325   : > { %v6121_v6 = vadd.f32 %v2882_v0, %v2794_v36  ;;  %v2707_v11 = vadd.f32 %v2706_v29, %v2618_v33  ;;  %v3138_v36 = vpack.c.bf16 %v3102_v57, %v3101_v53  ;;  %v5082_v29 = vpack.c.bf16 %v6020_v16, %v6015_v40 }
 0x327   : > { %2985 = vst [vmem:[#allocation2 + $0xa8] sm:$0xff] %v6121_v6 }
 0x32a   : > { %v2795_v19 = vpop.f32.mrf.mxu2  ;;  %v2620_v9 = vpop.f32.mrf.mxu0 }
 0x32b   : > { %v2884_v37 = vpop.f32.mrf.mxu3  ;;  %v2796_v24 = vadd.f32 %v2795_v19, %v2707_v11  ;;  %v2709_v27 = vpop.f32.mrf.mxu1  ;;  %v2621_v58 = vadd.f32 %v5978_v8, %v2620_v9  ;;  %v3008_v9 = vld [vmem:[#allocation2 + $0x3f] sm:$0xff] }
 0x32d   : > { %v6125_v18 = vadd.f32 %v2884_v37, %v2796_v24  ;;  %3465 = vmatmul.bf16.vlgmr.msrb.gmra.mxu0 %v3131_v63  ;;  %v2710_v39 = vadd.f32 %v2709_v27, %v2621_v58  ;;  %v3072_v63 = vld [vmem:[#allocation2 + $0x41] sm:$0xff] }
 0x32e   : > { %3554 = vmatmul.bf16.vlgmr.msrb.gmra.mxu1 %v3132_v14  ;;  %v3069_v14 = vld [vmem:[#allocation2 + $0x19] sm:$0xff] }
 0x32f   : > { %v2954_v20 = vsel %vm2930_vm5, %v6125_v18, 0.0  ;;  %3643 = vmatmul.bf16.vlgmr.msrb.gmra.mxu2 %v3133_v54  ;;  %v3137_v0 = vpack.c.bf16 %v3070_v34, %v3069_v14 }
 0x330   : > { %3732 = vmatmul.bf16.vlgmr.msrb.gmra.mxu3 %v3134_v15  ;;  %2986 = vst [vmem:[#allocation2 + $0xb0] sm:$0xff] %v2954_v20  ;;  %v3007_v15 = vld [vmem:[#allocation2 + $0x37] sm:$0xff] }
 0x331   : > { %v3139_v20 = vpack.c.bf16 %v3008_v9, %v3007_v15 }
 0x332   : > { %v2798_v50 = vpop.f32.mrf.mxu2  ;;  %v2622_v26 = vpop.f32.mrf.mxu0 }
 0x333   : > { %v2887_v28 = vpop.f32.mrf.mxu3  ;;  %v2799_v35 = vadd.f32 %v2798_v50, %v2710_v39  ;;  %v2711_v47 = vpop.f32.mrf.mxu1  ;;  %v2623_v31 = vadd.f32 %v5978_v8, %v2622_v26  ;;  %v3071_v39 = vld [vmem:[#allocation2 + $0x39] sm:$0xff] }
 0x334   : > { %v3103_v50 = vld [vmem:[#allocation2 + $0x3a] sm:$0xff]  ;;  %v3141_v26 = vpack.c.bf16 %v3072_v63, %v3071_v39  ;;  %v3108_v39 = vld [vmem:[#allocation2 + $0x72] sm:$0xff] }
 0x335   : > { %v6134_v13 = vadd.f32 %v2887_v28, %v2799_v35  ;;  %v2712_v62 = vadd.f32 %v2711_v47, %v2623_v31  ;;  %v3142_v47 = vpack.c.bf16 %v3104_v32, %v3103_v50 }
 0x337   : > { %2987 = vst [vmem:[#allocation2 + $0xc8] sm:$0xff] %v6134_v13  ;;  %v3018_v17 = vld [vmem:[#allocation2 + $0xaf] sm:$0xff] }
 0x33a   : > { %v2800_v41 = vpop.f32.mrf.mxu2  ;;  %v2625_v1 = vpop.f32.mrf.mxu0 }
 0x33b   : > { %v2889_v56 = vpop.f32.mrf.mxu3  ;;  %v2801_v38 = vadd.f32 %v2800_v41, %v2712_v62  ;;  %v2714_v5 = vpop.f32.mrf.mxu1  ;;  %v2626_v10 = vadd.f32 %v5978_v8, %v2625_v1 }
 0x33d   : > { %v6138_v49 = vadd.f32 %v2889_v56, %v2801_v38  ;;  %3470 = vmatmul.bf16.gmra.mxu0 %v3135_v59  ;;  %v2715_v11 = vadd.f32 %v2714_v5, %v2626_v10  ;;  %v3074_v5 = vld [vmem:[#allocation2 + $0x51] sm:$0xff] }
 0x33e   : > { %5083 = vmatmul.msk.bf16.gmra.mxu1 %vm6144_vm6, %v5082_v29  ;;  %v3106_v59 = vld [vmem:[#allocation2 + $0x52] sm:$0xff]  ;;  %v3009_v29 = vld [vmem:[#allocation2 + $0x47] sm:$0xff] }
 0x33f   : > { %2988 = vst [vmem:[#allocation2 + $0xd0] sm:$0xff] %v6138_v49  ;;  %3648 = vmatmul.bf16.gmra.mxu2 %v3137_v0  ;;  %v3164_v33 = vpack.c.bf16 %v6138_v49, %v6134_v13 }
 0x340   : > { %3737 = vmatmul.bf16.gmra.mxu3 %v3138_v36 }
 0x342   : > { %v2803_v4 = vpop.f32.mrf.mxu2  ;;  %v2627_v2 = vpop.f32.mrf.mxu0 }
 0x343   : > { %v2892_v19 = vpop.f32.mrf.mxu3  ;;  %v2804_v37 = vadd.f32 %v2803_v4, %v2715_v11  ;;  %v2716_v21 = vpop.f32.mrf.mxu1  ;;  %v2628_v40 = vadd.f32 %v5978_v8, %v2627_v2  ;;  %v3143_v11 = vpack.c.bf16 %v3010_v48, %v3009_v29  ;;  %v3146_v2 = vpack.c.bf16 %v3106_v59, %v3105_v25  ;;  %v3109_v29 = vld [vmem:[#allocation2 + $0x7a] sm:$0xff] }
 0x345   : > { %v6155_v24 = vadd.f32 %v2892_v19, %v2804_v37  ;;  %v2717_v16 = vadd.f32 %v2716_v21, %v2628_v40  ;;  %v5085_v21 = vpack.c.bf16 %v6059_v23, %v6055_v51 }
 0x347   : > { %2989 = vst [vmem:[#allocation2 + $0xd8] sm:$0xff] %v6155_v24 }
 0x34a   : > { %v2805_v27 = vpop.f32.mrf.mxu2  ;;  %v2630_v58 = vpop.f32.mrf.mxu0 }
 0x34b   : > { %v2894_v44 = vpop.f32.mrf.mxu3  ;;  %v2806_v61 = vadd.f32 %v2805_v27, %v2717_v16  ;;  %v2719_v54 = vpop.f32.mrf.mxu1  ;;  %v2631_v35 = vadd.f32 %v5978_v8, %v2630_v58  ;;  %v3012_v58 = vld [vmem:[#allocation2 + $0x6f] sm:$0xff] }
 0x34d   : > { %v6159_v28 = vadd.f32 %v2894_v44, %v2806_v61  ;;  %3475 = vmatmul.bf16.gmra.mxu0 %v3139_v20  ;;  %v2720_v62 = vadd.f32 %v2719_v54, %v2631_v35  ;;  %v3076_v20 = vld [vmem:[#allocation2 + $0x71] sm:$0xff] }
 0x34e   : > { %3564 = vmatmul.bf16.gmra.mxu1 %v3140_v52  ;;  %v3073_v52 = vld [vmem:[#allocation2 + $0x49] sm:$0xff] }
 0x34f   : > { %v2958_v31 = vsel %vm2930_vm5, %v6159_v28, 0.0  ;;  %3653 = vmatmul.bf16.gmra.mxu2 %v3141_v26  ;;  %v3145_v37 = vpack.c.bf16 %v3074_v5, %v3073_v52 }
 0x350   : > { %3742 = vmatmul.bf16.gmra.mxu3 %v3142_v47  ;;  %2990 = vst [vmem:[#allocation2 + $0xe0] sm:$0xff] %v2958_v31  ;;  %v3011_v47 = vld [vmem:[#allocation2 + $0x67] sm:$0xff] }
 0x351   : > { %v3147_v31 = vpack.c.bf16 %v3012_v58, %v3011_v47 }
 0x352   : > { %v2808_v43 = vpop.f32.mrf.mxu2  ;;  %v2632_v56 = vpop.f32.mrf.mxu0 }
 0x353   : > { %v2897_v14 = vpop.f32.mrf.mxu3  ;;  %v2809_v41 = vadd.f32 %v2808_v43, %v2720_v62  ;;  %v2721_v34 = vpop.f32.mrf.mxu1  ;;  %v2633_v57 = vadd.f32 %v5978_v8, %v2632_v56  ;;  %v3075_v62 = vld [vmem:[#allocation2 + $0x69] sm:$0xff] }
 0x354   : > { %v3107_v43 = vld [vmem:[#allocation2 + $0x6a] sm:$0xff]  ;;  %v3149_v56 = vpack.c.bf16 %v3076_v20, %v3075_v62  ;;  %v3112_v62 = vld [vmem:[#allocation2 + $0xa2] sm:$0xff] }
 0x355   : > { %v6168_v53 = vadd.f32 %v2897_v14, %v2809_v41  ;;  %v2722_v12 = vadd.f32 %v2721_v34, %v2633_v57  ;;  %v3150_v34 = vpack.c.bf16 %v3108_v39, %v3107_v43 }
 0x357   : > { %2991 = vst [vmem:[#allocation2 + $0xf8] sm:$0xff] %v6168_v53 }
 0x35a   : > { %v2810_v38 = vpop.f32.mrf.mxu2  ;;  %v2635_v0 = vpop.f32.mrf.mxu0 }
 0x35b   : > { %v2899_v1 = vpop.f32.mrf.mxu3  ;;  %v2811_v10 = vadd.f32 %v2810_v38, %v2722_v12  ;;  %v2724_v36 = vpop.f32.mrf.mxu1  ;;  %v2636_v19 = vadd.f32 %v5978_v8, %v2635_v0 }
 0x35d   : > { %v6172_v4 = vadd.f32 %v2899_v1, %v2811_v10  ;;  %3480 = vmatmul.bf16.gmra.mxu0 %v3143_v11  ;;  %v2725_v16 = vadd.f32 %v2724_v36, %v2636_v19  ;;  %v3078_v36 = vld [vmem:[#allocation2 + $0x81] sm:$0xff] }
 0x35e   : > { %5086 = vmatmul.msk.bf16.gmra.mxu1 %vm6144_vm6, %v5085_v21  ;;  %v3110_v11 = vld [vmem:[#allocation2 + $0x82] sm:$0xff]  ;;  %v3013_v21 = vld [vmem:[#allocation2 + $0x77] sm:$0xff] }
 0x35f   : > { %2992 = vst [vmem:[#allocation2 + $0x100] sm:$0xff] %v6172_v4  ;;  %3658 = vmatmul.bf16.gmra.mxu2 %v3145_v37  ;;  %v3172_v40 = vpack.c.bf16 %v6172_v4, %v6168_v53 }
 0x360   : > { %3747 = vmatmul.bf16.gmra.mxu3 %v3146_v2 }
 0x362   : > { %v2813_v9 = vpop.f32.mrf.mxu2  ;;  %v2637_v63 = vpop.f32.mrf.mxu0 }
 0x363   : > { %v2902_v27 = vpop.f32.mrf.mxu3  ;;  %v2814_v44 = vadd.f32 %v2813_v9, %v2725_v16  ;;  %v2726_v32 = vpop.f32.mrf.mxu1  ;;  %v2638_v51 = vadd.f32 %v5978_v8, %v2637_v63  ;;  %v3151_v16 = vpack.c.bf16 %v3014_v46, %v3013_v21  ;;  %v3154_v63 = vpack.c.bf16 %v3110_v11, %v3109_v29  ;;  %v3113_v21 = vld [vmem:[#allocation2 + $0xaa] sm:$0xff] }
 0x365   : > { %v6182_v61 = vadd.f32 %v2902_v27, %v2814_v44  ;;  %v2727_v23 = vadd.f32 %v2726_v32, %v2638_v51  ;;  %v5088_v32 = vpack.c.bf16 %v6098_v30, %v6094_v7 }
 0x367   : > { %2993 = vst [vmem:[#allocation2 + $0x108] sm:$0xff] %v6182_v61 }
 0x36a   : > { %v2815_v54 = vpop.f32.mrf.mxu2  ;;  %v2640_v35 = vpop.f32.mrf.mxu0 }
 0x36b   : > { %v2904_v15 = vpop.f32.mrf.mxu3  ;;  %v2816_v50 = vadd.f32 %v2815_v54, %v2727_v23  ;;  %v2729_v26 = vpop.f32.mrf.mxu1  ;;  %v2641_v41 = vadd.f32 %v5978_v8, %v2640_v35  ;;  %v3016_v35 = vld [vmem:[#allocation2 + $0x9f] sm:$0xff] }
 0x36d   : > { %v6186_v14 = vadd.f32 %v2904_v15, %v2816_v50  ;;  %3485 = vmatmul.bf16.gmra.mxu0 %v3147_v31  ;;  %v2730_v12 = vadd.f32 %v2729_v26, %v2641_v41  ;;  %v3080_v31 = vld [vmem:[#allocation2 + $0xa1] sm:$0xff] }
 0x36e   : > { %3574 = vmatmul.bf16.gmra.mxu1 %v3148_v60  ;;  %v3077_v60 = vld [vmem:[#allocation2 + $0x79] sm:$0xff] }
 0x36f   : > { %v2962_v57 = vsel %vm2930_vm5, %v6186_v14, 0.0  ;;  %3663 = vmatmul.bf16.gmra.mxu2 %v3149_v56  ;;  %v3153_v44 = vpack.c.bf16 %v3078_v36, %v3077_v60 }
 0x370   : > { %3752 = vmatmul.bf16.gmra.mxu3 %v3150_v34  ;;  %2994 = vst [vmem:[#allocation2 + $0x110] sm:$0xff] %v2962_v57  ;;  %v3015_v34 = vld [vmem:[#allocation2 + $0x97] sm:$0xff] }
 0x371   : > { %v3155_v57 = vpack.c.bf16 %v3016_v35, %v3015_v34 }
 0x372   : > { %v2818_v48 = vpop.f32.mrf.mxu2  ;;  %v2642_v1 = vpop.f32.mrf.mxu0 }
 0x373   : > { %v2907_v52 = vpop.f32.mrf.mxu3  ;;  %v2819_v38 = vadd.f32 %v2818_v48, %v2730_v12  ;;  %v2731_v5 = vpop.f32.mrf.mxu1  ;;  %v2643_v59 = vadd.f32 %v5978_v8, %v2642_v1  ;;  %v3079_v12 = vld [vmem:[#allocation2 + $0x99] sm:$0xff] }
 0x374   : > { %v3111_v48 = vld [vmem:[#allocation2 + $0x9a] sm:$0xff]  ;;  %v3157_v1 = vpack.c.bf16 %v3080_v31, %v3079_v12  ;;  %v3084_v12 = vld [vmem:[#allocation2 + $0xd1] sm:$0xff] }
 0x375   : > { %v6195_v25 = vadd.f32 %v2907_v52, %v2819_v38  ;;  %v2732_v45 = vadd.f32 %v2731_v5, %v2643_v59  ;;  %v3158_v5 = vpack.c.bf16 %v3112_v62, %v3111_v48  ;;  %v3116_v48 = vld [vmem:[#allocation2 + $0xd2] sm:$0xff] }
 0x377   : > { %2995 = vst [vmem:[#allocation2 + $0x128] sm:$0xff] %v6195_v25 }
 0x37a   : > { %v2820_v10 = vpop.f32.mrf.mxu2  ;;  %v2645_v37 = vpop.f32.mrf.mxu0 }
 0x37b   : > { %v2909_v0 = vpop.f32.mrf.mxu3  ;;  %v2821_v19 = vadd.f32 %v2820_v10, %v2732_v45  ;;  %v2734_v2 = vpop.f32.mrf.mxu1  ;;  %v2646_v27 = vadd.f32 %v5978_v8, %v2645_v37 }
 0x37d   : > { %v6199_v9 = vadd.f32 %v2909_v0, %v2821_v19  ;;  %3490 = vmatmul.bf16.gmra.mxu0 %v3151_v16  ;;  %v2735_v23 = vadd.f32 %v2734_v2, %v2646_v27  ;;  %v3082_v2 = vld [vmem:[#allocation2 + $0xb1] sm:$0xff] }
 0x37e   : > { %5089 = vmatmul.msk.bf16.gmra.mxu1 %vm6144_vm6, %v5088_v32  ;;  %v3114_v16 = vld [vmem:[#allocation2 + $0xb2] sm:$0xff]  ;;  %v3017_v32 = vld [vmem:[#allocation2 + $0xa7] sm:$0xff] }
 0x37f   : > { %2996 = vst [vmem:[#allocation2 + $0x130] sm:$0xff] %v6199_v9  ;;  %3668 = vmatmul.bf16.gmra.mxu2 %v3153_v44  ;;  %v3180_v51 = vpack.c.bf16 %v6199_v9, %v6195_v25 }
 0x380   : > { %3757 = vmatmul.bf16.gmra.mxu3 %v3154_v63 }
 0x382   : > { %v2823_v58 = vpop.f32.mrf.mxu2  ;;  %v2647_v20 = vpop.f32.mrf.mxu0 }
 0x383   : > { %v2912_v54 = vpop.f32.mrf.mxu3  ;;  %v2824_v15 = vadd.f32 %v2823_v58, %v2735_v23  ;;  %v2736_v39 = vpop.f32.mrf.mxu1  ;;  %v2648_v7 = vadd.f32 %v5978_v8, %v2647_v20  ;;  %v3159_v23 = vpack.c.bf16 %v3018_v17, %v3017_v32  ;;  %v3162_v20 = vpack.c.bf16 %v3114_v16, %v3113_v21  ;;  %v3085_v32 = vld [vmem:[#allocation2 + $0xd9] sm:$0xff] }
 0x385   : > { %v6209_v50 = vadd.f32 %v2912_v54, %v2824_v15  ;;  %v2737_v30 = vadd.f32 %v2736_v39, %v2648_v7  ;;  %v5091_v39 = vpack.c.bf16 %v6125_v18, %v6121_v6  ;;  %v6244_v6 = vld [vmem:[%s6357_s2 + $0x3] ss:$0 sm:$0xff] }
 0x387   : > { %2997 = vst [vmem:[#allocation2 + $0x138] sm:$0xff] %v6209_v50 }
 0x38a   : > { %v2825_v26 = vpop.f32.mrf.mxu2  ;;  %v2650_v41 = vpop.f32.mrf.mxu0 }
 0x38b   : > { %v2914_v47 = vpop.f32.mrf.mxu3  ;;  %v2826_v43 = vadd.f32 %v2825_v26, %v2737_v30  ;;  %v2739_v56 = vpop.f32.mrf.mxu1  ;;  %v2651_v38 = vadd.f32 %v5978_v8, %v2650_v41 }
 0x38d   : > { %v6213_v52 = vadd.f32 %v2914_v47, %v2826_v43  ;;  %3495 = vmatmul.bf16.gmra.mxu0 %v3155_v57  ;;  %v2740_v45 = vadd.f32 %v2739_v56, %v2651_v38  ;;  %v3020_v56 = vld [vmem:[#allocation2 + $0xcf] sm:$0xff] }
 0x38e   : > { %3584 = vmatmul.bf16.gmra.mxu1 %v3156_v22  ;;  %v3081_v22 = vld [vmem:[#allocation2 + $0xa9] sm:$0xff] }
 0x38f   : > { %v2966_v59 = vsel %vm2930_vm5, %v6213_v52, 0.0  ;;  %3673 = vmatmul.bf16.gmra.mxu2 %v3157_v1  ;;  %v3161_v15 = vpack.c.bf16 %v3082_v2, %v3081_v22 }
 0x390   : > { %3762 = vmatmul.bf16.gmra.mxu3 %v3158_v5  ;;  %2998 = vst [vmem:[#allocation2 + $0x140] sm:$0xff] %v2966_v59  ;;  %v3019_v59 = vld [vmem:[#allocation2 + $0xc7] sm:$0xff] }
 0x392   : > { %v2828_v46 = vpop.f32.mrf.mxu2  ;;  %v2652_v0 = vpop.f32.mrf.mxu0 }
 0x393   : > { %v2917_v60 = vpop.f32.mrf.mxu3  ;;  %v2829_v10 = vadd.f32 %v2828_v46, %v2740_v45  ;;  %v2741_v36 = vpop.f32.mrf.mxu1  ;;  %v2653_v11 = vadd.f32 %v5978_v8, %v2652_v0  ;;  %v5032_v8 = vld [vmem:[%s6357_s2 + $0x2] ss:$0 sm:$0xff]  ;;  %v3163_v46 = vpack.c.bf16 %v3020_v56, %v3019_v59 }
 0x395   : > { %v6222_v29 = vadd.f32 %v2917_v60, %v2829_v10  ;;  %v2742_v3 = vadd.f32 %v2741_v36, %v2653_v11  ;;  %v3083_v60 = vld [vmem:[#allocation2 + $0xc9] sm:$0xff] }
 0x396   : > { %v3115_v10 = vld [vmem:[#allocation2 + $0xca] sm:$0xff]  ;;  %v3165_v36 = vpack.c.bf16 %v3084_v12, %v3083_v60 }
 0x397   : > { %2999 = vst [vmem:[#allocation2 + $0x158] sm:$0xff] %v6222_v29  ;;  %v3166_v11 = vpack.c.bf16 %v3116_v48, %v3115_v10 }
 0x39a   : > { %v2830_v19 = vpop.f32.mrf.mxu2  ;;  %v2655_v44 = vpop.f32.mrf.mxu0 }
 0x39b   : > { %v2919_v37 = vpop.f32.mrf.mxu3  ;;  %v2831_v27 = vadd.f32 %v2830_v19, %v2742_v3  ;;  %v2744_v63 = vpop.f32.mrf.mxu1  ;;  %v2656_v54 = vadd.f32 %v5032_v8, %v2655_v44 }
 0x39d   : > { %v6226_v58 = vadd.f32 %v2919_v37, %v2831_v27  ;;  %3500 = vmatmul.bf16.gmra.mxu0 %v3159_v23  ;;  %v2745_v30 = vadd.f32 %v2744_v63, %v2656_v54  ;;  %v3022_v63 = vld [vmem:[#allocation2 + $0xdf] sm:$0xff] }
 0x39e   : > { %5092 = vmatmul.msk.bf16.gmra.mxu1 %vm6144_vm6, %v5091_v39  ;;  %v3117_v23 = vld [vmem:[#allocation2 + $0xda] sm:$0xff] }
 0x39f   : > { %3000 = vst [vmem:[#allocation2 + $0x160] sm:$0xff] %v6226_v58  ;;  %3678 = vmatmul.bf16.gmra.mxu2 %v3161_v15  ;;  %v3188_v7 = vpack.c.bf16 %v6226_v58, %v6222_v29  ;;  %v3021_v39 = vld [vmem:[#allocation2 + $0xd7] sm:$0xff] }
 0x3a0   : > { %3767 = vmatmul.bf16.gmra.mxu3 %v3162_v20 }
 0x3a2   : > { %v2833_v35 = vpop.f32.mrf.mxu2  ;;  %v2657_v31 = vpop.f32.mrf.mxu0 }
 0x3a3   : > { %v2922_v26 = vpop.f32.mrf.mxu3  ;;  %v2834_v47 = vadd.f32 %v2833_v35, %v2745_v30  ;;  %v2746_v62 = vpop.f32.mrf.mxu1  ;;  %v2658_v41 = vadd.f32 %v5032_v8, %v2657_v31  ;;  %v3118_v8 = vld [vmem:[#allocation2 + $0xe2] sm:$0xff]  ;;  %v3167_v35 = vpack.c.bf16 %v3022_v63, %v3021_v39 }
 0x3a4   : > { %v3170_v31 = vpack.c.bf16 %v3118_v8, %v3117_v23 }
 0x3a5   : > { %v6238_v43 = vadd.f32 %v2922_v26, %v2834_v47  ;;  %v2747_v18 = vadd.f32 %v2746_v62, %v2658_v41  ;;  %v5094_v41 = vpack.c.bf16 %v6159_v28, %v6155_v24  ;;  %v3024_v24 = vld [vmem:[#allocation2 + $0xff] sm:$0xff] }
 0x3a7   : > { %3001 = vst [vmem:[#allocation2 + $0x168] sm:$0xff] %v6238_v43 }
 0x3aa   : > { %v2835_v34 = vpop.f32.mrf.mxu2  ;;  %v3466_v1 = vpop.f32.mrf.mxu0 }
 0x3ab   : > { %v2924_v57 = vpop.f32.mrf.mxu3  ;;  %v2836_v38 = vadd.f32 %v2835_v34, %v2747_v18  ;;  %v3555_v5 = vpop.f32.mrf.mxu1  ;;  %v3467_v45 = vadd.f32 %v6244_v6, %v3466_v1 }
 0x3ad   : > { %v6247_v0 = vadd.f32 %v2924_v57, %v2836_v38  ;;  %v3556_v3 = vadd.f32 %v3555_v5, %v3467_v45  ;;  %3505 = vmatmul.bf16.gmra.mxu0 %v3163_v46 }
 0x3ae   : > { %3594 = vmatmul.bf16.gmra.mxu1 %v3164_v33  ;;  %v3086_v33 = vld [vmem:[#allocation2 + $0xe1] sm:$0xff] }
 0x3af   : > { %v2970_v17 = vsel %vm2930_vm5, %v6247_v0, 0.0  ;;  %3683 = vmatmul.bf16.gmra.mxu2 %v3165_v36  ;;  %v3169_v47 = vpack.c.bf16 %v3086_v33, %v3085_v32  ;;  %v3088_v36 = vld [vmem:[#allocation2 + $0x101] sm:$0xff] }
 0x3b0   : > { %3772 = vmatmul.bf16.gmra.mxu3 %v3166_v11  ;;  %3002 = vst [vmem:[#allocation2 + $0x170] sm:$0xff] %v2970_v17  ;;  %v3120_v11 = vld [vmem:[#allocation2 + $0x102] sm:$0xff] }
 0x3b2   : > { %v3644_v22 = vpop.f32.mrf.mxu2  ;;  %v3468_v2 = vpop.f32.mrf.mxu0 }
 0x3b3   : > { %v3733_v19 = vpop.f32.mrf.mxu3  ;;  %v3645_v37 = vadd.f32 %v3644_v22, %v3556_v3  ;;  %v3557_v21 = vpop.f32.mrf.mxu1  ;;  %v3469_v16 = vadd.f32 %v6244_v6, %v3468_v2 }
 0x3b5   : > { %v3734_v27 = vadd.f32 %v3733_v19, %v3645_v37  ;;  %v3558_v44 = vadd.f32 %v3557_v21, %v3469_v16  ;;  %v3023_v19 = vld [vmem:[#allocation2 + $0xf7] sm:$0xff] }
 0x3b6   : > { %v3171_v2 = vpack.c.bf16 %v3024_v24, %v3023_v19  ;;  %v3087_v21 = vld [vmem:[#allocation2 + $0xf9] sm:$0xff] }
 0x3b7   : > { %v3857_v18 = vmax.f32 %v3734_v27, 0.0  ;;  %v3119_v16 = vld [vmem:[#allocation2 + $0xfa] sm:$0xff]  ;;  %v3034_v58 = vld [vmem:[#allocation2 + $0x16f] sm:$0xff] }
 0x3b8   : > { %v3174_v63 = vpack.c.bf16 %v3120_v11, %v3119_v16  ;;  %v3092_v16 = vld [vmem:[#allocation2 + $0x131] sm:$0xff] }
 0x3ba   : > { %v3646_v13 = vpop.f32.mrf.mxu2  ;;  %v3471_v15 = vpop.f32.mrf.mxu0 }
 0x3bb   : > { %v3735_v49 = vpop.f32.mrf.mxu3  ;;  %v3647_v54 = vadd.f32 %v3646_v13, %v3558_v44  ;;  %v3560_v20 = vpop.f32.mrf.mxu1  ;;  %v3472_v30 = vadd.f32 %v6244_v6, %v3471_v15  ;;  %v3173_v44 = vpack.c.bf16 %v3088_v36, %v3087_v21 }
 0x3bd   : > { %v3736_v26 = vadd.f32 %v3735_v49, %v3647_v54  ;;  %v3561_v62 = vadd.f32 %v3560_v20, %v3472_v30  ;;  %3510 = vmatmul.bf16.gmra.mxu0 %v3167_v35 }
 0x3be   : > { %5095 = vmatmul.msk.bf16.gmra.mxu1 %vm6144_vm6, %v5094_v41 }
 0x3bf   : > { %v3858_v56 = vmax.f32 %v3736_v26, 0.0  ;;  %3688 = vmatmul.bf16.gmra.mxu2 %v3169_v47  ;;  %v3026_v26 = vld [vmem:[#allocation2 + $0x10f] sm:$0xff] }
 0x3c0   : > { %3777 = vmatmul.bf16.gmra.mxu3 %v3170_v31  ;;  %v3089_v47 = vld [vmem:[#allocation2 + $0x109] sm:$0xff] }
 0x3c1   : > { %v3889_v34 = vadd.f32 %v3858_v56, %v3857_v18  ;;  %v3121_v31 = vld [vmem:[#allocation2 + $0x10a] sm:$0xff] }
 0x3c2   : > { %v3649_v57 = vpop.f32.mrf.mxu2  ;;  %v3473_v38 = vpop.f32.mrf.mxu0 }
 0x3c3   : > { %v3738_v12 = vpop.f32.mrf.mxu3  ;;  %v3650_v48 = vadd.f32 %v3649_v57, %v3561_v62  ;;  %v3562_v1 = vpop.f32.mrf.mxu1  ;;  %v3474_v5 = vadd.f32 %v6244_v6, %v3473_v38  ;;  %v3122_v62 = vld [vmem:[#allocation2 + $0x112] sm:$0xff] }
 0x3c5   : > { %v3739_v59 = vadd.f32 %v3738_v12, %v3650_v48  ;;  %v3563_v45 = vadd.f32 %v3562_v1, %v3474_v5  ;;  %v3178_v1 = vpack.c.bf16 %v3122_v62, %v3121_v31 }
 0x3c7   : > { %v3859_v46 = vmax.f32 %v3739_v59, 0.0  ;;  %v5097_v59 = vpack.c.bf16 %v6186_v14, %v6182_v61  ;;  %v3028_v14 = vld [vmem:[#allocation2 + $0x12f] sm:$0xff] }
 0x3c9   : > { %v3890_v60 = vadd.f32 %v3889_v34, %v3859_v46  ;;  %v3025_v34 = vld [vmem:[#allocation2 + $0x107] sm:$0xff] }
 0x3ca   : > { %v3651_v28 = vpop.f32.mrf.mxu2  ;;  %v3476_v17 = vpop.f32.mrf.mxu0  ;;  %v3175_v12 = vpack.c.bf16 %v3026_v26, %v3025_v34 }
 0x3cb   : > { %v3740_v10 = vpop.f32.mrf.mxu3  ;;  %v3652_v3 = vadd.f32 %v3651_v28, %v3563_v45  ;;  %v3565_v22 = vpop.f32.mrf.mxu1  ;;  %v3477_v37 = vadd.f32 %v6244_v6, %v3476_v17 }
 0x3cd   : > { %v3741_v27 = vadd.f32 %v3740_v10, %v3652_v3  ;;  %v3566_v32 = vadd.f32 %v3565_v22, %v3477_v37  ;;  %3515 = vmatmul.bf16.gmra.mxu0 %v3171_v2 }
 0x3ce   : > { %3604 = vmatmul.bf16.gmra.mxu1 %v3172_v40  ;;  %v3090_v40 = vld [vmem:[#allocation2 + $0x111] sm:$0xff] }
 0x3cf   : > { %v3828_v13 = vsel %vm3816_vm7, %v3741_v27, 0.0  ;;  %3693 = vmatmul.bf16.gmra.mxu2 %v3173_v44  ;;  %v3177_v38 = vpack.c.bf16 %v3090_v40, %v3089_v47  ;;  %v3124_v27 = vld [vmem:[#allocation2 + $0x132] sm:$0xff] }
 0x3d0   : > { %3782 = vmatmul.bf16.gmra.mxu3 %v3174_v63  ;;  %v3860_v49 = vmax.f32 %v3828_v13, 0.0  ;;  %v3027_v13 = vld [vmem:[#allocation2 + $0x127] sm:$0xff] }
 0x3d2   : > { %v3891_v33 = vadd.f32 %v3890_v60, %v3860_v49  ;;  %v3654_v23 = vpop.f32.mrf.mxu2  ;;  %v3478_v15 = vpop.f32.mrf.mxu0 }
 0x3d3   : > { %v3743_v8 = vpop.f32.mrf.mxu3  ;;  %v3655_v54 = vadd.f32 %v3654_v23, %v3566_v32  ;;  %v3567_v20 = vpop.f32.mrf.mxu1  ;;  %v3479_v39 = vadd.f32 %v6244_v6, %v3478_v15  ;;  %v3123_v15 = vld [vmem:[#allocation2 + $0x12a] sm:$0xff] }
 0x3d4   : > { %v3892_v37 = vrot.slane %v3891_v33, 4 }
 0x3d5   : > { %v3744_v30 = vadd.f32 %v3743_v8, %v3655_v54  ;;  %v3568_v35 = vadd.f32 %v3567_v20, %v3479_v39  ;;  %v3179_v8 = vpack.c.bf16 %v3028_v14, %v3027_v13  ;;  %v3091_v54 = vld [vmem:[#allocation2 + $0x129] sm:$0xff] }
 0x3d6   : > { %v3893_v49 = vadd.f32 %v3892_v37, %v3891_v33  ;;  %v3181_v39 = vpack.c.bf16 %v3092_v16, %v3091_v54 }
 0x3d7   : > { %v3861_v45 = vmax.f32 %v3744_v30, 0.0  ;;  %v3182_v30 = vpack.c.bf16 %v3124_v27, %v3123_v15 }
 0x3d8   : > { %v3894_v33 = vrot.slane %v3893_v49, 2 }
 0x3da   : > { %v3656_v53 = vpop.f32.mrf.mxu2  ;;  %v3481_v18 = vpop.f32.mrf.mxu0 }
 0x3db   : > { %v3745_v4 = vpop.f32.mrf.mxu3  ;;  %v3657_v41 = vadd.f32 %v3656_v53, %v3568_v35  ;;  %v3570_v56 = vpop.f32.mrf.mxu1  ;;  %v3482_v57 = vadd.f32 %v6244_v6, %v3481_v18  ;;  %v3895_v18 = vadd.f32 %v3894_v33, %v3893_v49 }
 0x3dd   : > { %v3746_v48 = vadd.f32 %v3745_v4, %v3657_v41  ;;  %v3571_v5 = vadd.f32 %v3570_v56, %v3482_v57  ;;  %3520 = vmatmul.bf16.gmra.mxu0 %v3175_v12 }
 0x3de   : > { %5098 = vmatmul.msk.bf16.gmra.mxu1 %vm6144_vm6, %v5097_v59 }
 0x3df   : > { %v3862_v46 = vmax.f32 %v3746_v48, 0.0  ;;  %3698 = vmatmul.bf16.gmra.mxu2 %v3177_v38  ;;  %v3030_v48 = vld [vmem:[#allocation2 + $0x13f] sm:$0xff] }
 0x3e0   : > { %3787 = vmatmul.bf16.gmra.mxu3 %v3178_v1  ;;  %v3093_v38 = vld [vmem:[#allocation2 + $0x139] sm:$0xff] }
 0x3e1   : > { %v3898_v60 = vadd.f32 %v3862_v46, %v3861_v45  ;;  %v3094_v45 = vld [vmem:[#allocation2 + $0x141] sm:$0xff] }
 0x3e2   : > { %v3659_v24 = vpop.f32.mrf.mxu2  ;;  %v3483_v36 = vpop.f32.mrf.mxu0  ;;  %v3125_v46 = vld [vmem:[#allocation2 + $0x13a] sm:$0xff]  ;;  %v3185_v37 = vpack.c.bf16 %v3094_v45, %v3093_v38 }
 0x3e3   : > { %v3748_v28 = vpop.f32.mrf.mxu3  ;;  %v3660_v10 = vadd.f32 %v3659_v24, %v3571_v5  ;;  %v3572_v11 = vpop.f32.mrf.mxu1  ;;  %v3484_v3 = vadd.f32 %v6244_v6, %v3483_v36  ;;  %v3029_v36 = vld [vmem:[#allocation2 + $0x137] sm:$0xff] }
 0x3e5   : > { %v3749_v17 = vadd.f32 %v3748_v28, %v3660_v10  ;;  %v3573_v22 = vadd.f32 %v3572_v11, %v3484_v3 }
 0x3e7   : > { %v3863_v19 = vmax.f32 %v3749_v17, 0.0 }
 0x3e9   : > { %v3899_v61 = vadd.f32 %v3898_v60, %v3863_v19  ;;  %v3126_v60 = vld [vmem:[#allocation2 + $0x142] sm:$0xff] }
 0x3ea   : > { %v3661_v2 = vpop.f32.mrf.mxu2  ;;  %v3486_v63 = vpop.f32.mrf.mxu0 }
 0x3eb   : > { %v3750_v21 = vpop.f32.mrf.mxu3  ;;  %v3662_v44 = vadd.f32 %v3661_v2, %v3573_v22  ;;  %v3575_v32 = vpop.f32.mrf.mxu1  ;;  %v3487_v23 = vadd.f32 %v6244_v6, %v3486_v63  ;;  %v3183_v22 = vpack.c.bf16 %v3030_v48, %v3029_v36  ;;  %v6291_v63 = vld [vmem:[%s6358_s3] ss:$0 sm:$0xff] }
 0x3ed   : > { %v3751_v20 = vadd.f32 %v3750_v21, %v3662_v44  ;;  %v3576_v35 = vadd.f32 %v3575_v32, %v3487_v23  ;;  %3525 = vmatmul.bf16.gmra.mxu0 %v3179_v8  ;;  %v5100_v21 = vpack.c.bf16 %v6213_v52, %v6209_v50 }
 0x3ee   : > { %3614 = vmatmul.bf16.gmra.mxu1 %v3180_v51  ;;  %v3896_v51 = vrot.slane %v3895_v18, 1 }
 0x3ef   : > { %v3832_v26 = vsel %vm3816_vm7, %v3751_v20, 0.0  ;;  %3703 = vmatmul.bf16.gmra.mxu2 %v3181_v39 }
 0x3f0   : > { %3792 = vmatmul.bf16.gmra.mxu3 %v3182_v30  ;;  %v3864_v47 = vmax.f32 %v3832_v26, 0.0  ;;  %v3897_v11 = vadd.f32 %v3896_v51, %v3895_v18  ;;  %v3127_v51 = vld [vmem:[#allocation2 + $0x15a] sm:$0xff] }
 0x3f2   : > { %v3900_v53 = vadd.f32 %v3899_v61, %v3864_v47  ;;  %v3664_v4 = vpop.f32.mrf.mxu2  ;;  %v3488_v62 = vpop.f32.mrf.mxu0  ;;  %v3186_v61 = vpack.c.bf16 %v3126_v60, %v3125_v46  ;;  %v3961_v44 = vmul.f32 0.035714287, %v3897_v11 }
 0x3f3   : > { %v3753_v40 = vpop.f32.mrf.mxu3  ;;  %v3665_v31 = vadd.f32 %v3664_v4, %v3576_v35  ;;  %v3577_v41 = vpop.f32.mrf.mxu1  ;;  %v3489_v34 = vadd.f32 %v6244_v6, %v3488_v62  ;;  %v3128_v62 = vld [vmem:[#allocation2 + $0x162] sm:$0xff] }
 0x3f4   : > { %v3901_v56 = vrot.slane %v3900_v53, 4  ;;  %v3973_v15 = vmul.f32 %v6291_v63, %v3961_v44  ;;  %v3190_v38 = vpack.c.bf16 %v3128_v62, %v3127_v51 }
 0x3f5   : > { %v3754_v57 = vadd.f32 %v3753_v40, %v3665_v31  ;;  %v3578_v9 = vadd.f32 %v3577_v41, %v3489_v34  ;;  %v3096_v31 = vld [vmem:[#allocation2 + $0x161] sm:$0xff]  ;;  %v3031_v34 = vld [vmem:[#allocation2 + $0x157] sm:$0xff] }
 0x3f6   : > { %v3902_v25 = vadd.f32 %v3901_v56, %v3900_v53  ;;  %v3032_v53 = vld [vmem:[#allocation2 + $0x15f] sm:$0xff] }
 0x3f7   : > { %v3865_v16 = vmax.f32 %v3754_v57, 0.0 }
 0x3f8   : > { %v3903_v12 = vrot.slane %v3902_v25, 2 }
 0x3fa   : > { %v3904_v1 = vadd.f32 %v3903_v12, %v3902_v25  ;;  %v3666_v5 = vpop.f32.mrf.mxu2  ;;  %v3491_v28 = vpop.f32.mrf.mxu0  ;;  %v3187_v25 = vpack.c.bf16 %v3032_v53, %v3031_v34 }
 0x3fb   : > { %v3755_v59 = vpop.f32.mrf.mxu3  ;;  %v3667_v24 = vadd.f32 %v3666_v5, %v3578_v9  ;;  %v3580_v10 = vpop.f32.mrf.mxu1  ;;  %v3492_v17 = vadd.f32 %v6244_v6, %v3491_v28  ;;  %v3095_v9 = vld [vmem:[#allocation2 + $0x159] sm:$0xff] }
 0x3fc   : > { %v3905_v3 = vrot.slane %v3904_v1, 1  ;;  %v3189_v48 = vpack.c.bf16 %v3096_v31, %v3095_v9 }
 0x3fd   : > { %v3756_v19 = vadd.f32 %v3755_v59, %v3667_v24  ;;  %v3581_v2 = vadd.f32 %v3580_v10, %v3492_v17  ;;  %3530 = vmatmul.bf16.gmra.mxu0 %v3183_v22 }
 0x3fe   : > { %v3906_v14 = vadd.f32 %v3905_v3, %v3904_v1  ;;  %5101 = vmatmul.msk.bf16.gmra.mxu1 %vm6144_vm6, %v5100_v21  ;;  %v3130_v21 = vld [vmem:[#allocation2 + $0x172] sm:$0xff] }
 0x3ff   : > { %v3866_v27 = vmax.f32 %v3756_v19, 0.0  ;;  %3708 = vmatmul.bf16.gmra.mxu2 %v3185_v37 }
 0x400   : > { %3797 = vmatmul.bf16.gmra.mxu3 %v3186_v61  ;;  %v3962_v32 = vmul.f32 0.035714287, %v3906_v14  ;;  %v3098_v14 = vld [vmem:[#allocation2 + $0x171] sm:$0xff] }
 0x401   : > { %v3907_v13 = vadd.f32 %v3866_v27, %v3865_v16 }
 0x402   : > { %v3974_v49 = vmul.f32 %v6291_v63, %v3962_v32  ;;  %v3669_v23 = vpop.f32.mrf.mxu2  ;;  %v3493_v52 = vpop.f32.mrf.mxu0  ;;  %v3033_v32 = vld [vmem:[#allocation2 + $0x167] sm:$0xff] }
 0x403   : > { %v3758_v8 = vpop.f32.mrf.mxu3  ;;  %v3670_v50 = vadd.f32 %v3669_v23, %v3581_v2  ;;  %v3582_v54 = vpop.f32.mrf.mxu1  ;;  %v3494_v39 = vadd.f32 %v6244_v6, %v3493_v52  ;;  %v3129_v2 = vld [vmem:[#allocation2 + $0x16a] sm:$0xff]  ;;  %v3191_v23 = vpack.c.bf16 %v3034_v58, %v3033_v32 }
 0x404   : > { %v3989_v20 = vrot.slane %v3974_v49, 7  ;;  %v3194_v52 = vpack.c.bf16 %v3130_v21, %v3129_v2 }
 0x405   : > { %v3759_v30 = vadd.f32 %v3758_v8, %v3670_v50  ;;  %v3583_v35 = vadd.f32 %v3582_v54, %v3494_v39 }
 0x406   : > { %v6296_v26 = vsel %vm3990_vm8, %v3989_v20, %v3973_v15  ;;  %v5103_v20 = vpack.c.bf16 %v6247_v0, %v6238_v43 }
 0x407   : > { %v3867_v33 = vmax.f32 %v3759_v30, 0.0 }
 0x409   : > { %v3908_v47 = vadd.f32 %v3907_v13, %v3867_v33 }
 0x40a   : > { %v3671_v4 = vpop.f32.mrf.mxu2  ;;  %v3496_v18 = vpop.f32.mrf.mxu0 }
 0x40b   : > { %v3760_v40 = vpop.f32.mrf.mxu3  ;;  %v3672_v41 = vadd.f32 %v3671_v4, %v3583_v35  ;;  %v3585_v56 = vpop.f32.mrf.mxu1  ;;  %v3497_v57 = vadd.f32 %v6244_v6, %v3496_v18 }
 0x40d   : > { %v3761_v12 = vadd.f32 %v3760_v40, %v3672_v41  ;;  %v3586_v1 = vadd.f32 %v3585_v56, %v3497_v57  ;;  %3535 = vmatmul.bf16.gmra.mxu0 %v3187_v25 }
 0x40e   : > { %3624 = vmatmul.bf16.gmra.mxu1 %v3188_v7  ;;  %v3097_v7 = vld [vmem:[#allocation2 + $0x169] sm:$0xff] }
 0x40f   : > { %v3836_v5 = vsel %vm3816_vm7, %v3761_v12, 0.0  ;;  %3713 = vmatmul.bf16.gmra.mxu2 %v3189_v48  ;;  %v3193_v50 = vpack.c.bf16 %v3098_v14, %v3097_v7 }
 0x410   : > { %3802 = vmatmul.bf16.gmra.mxu3 %v3190_v38  ;;  %v3868_v59 = vmax.f32 %v3836_v5, 0.0 }
 0x412   : > { %v3909_v45 = vadd.f32 %v3908_v47, %v3868_v59  ;;  %v3674_v46 = vpop.f32.mrf.mxu2  ;;  %v3498_v28 = vpop.f32.mrf.mxu0 }
 0x413   : > { %v3763_v60 = vpop.f32.mrf.mxu3  ;;  %v3675_v24 = vadd.f32 %v3674_v46, %v3586_v1  ;;  %v3587_v10 = vpop.f32.mrf.mxu1  ;;  %v3499_v11 = vadd.f32 %v6244_v6, %v3498_v28 }
 0x414   : > { %v3910_v36 = vrot.slane %v3909_v45, 4 }
 0x415   : > { %v3764_v3 = vadd.f32 %v3763_v60, %v3675_v24  ;;  %v3588_v22 = vadd.f32 %v3587_v10, %v3499_v11 }
 0x416   : > { %v3911_v17 = vadd.f32 %v3910_v36, %v3909_v45 }
 0x417   : > { %v3869_v39 = vmax.f32 %v3764_v3, 0.0 }
 0x418   : > { %v3912_v29 = vrot.slane %v3911_v17, 2 }
 0x41a   : > { %v3913_v19 = vadd.f32 %v3912_v29, %v3911_v17  ;;  %v3676_v37 = vpop.f32.mrf.mxu2  ;;  %v3501_v27 = vpop.f32.mrf.mxu0 }
 0x41b   : > { %v3765_v61 = vpop.f32.mrf.mxu3  ;;  %v3677_v16 = vadd.f32 %v3676_v37, %v3588_v22  ;;  %v3590_v44 = vpop.f32.mrf.mxu1  ;;  %v3502_v49 = vadd.f32 %v6244_v6, %v3501_v27 }
 0x41c   : > { %v3914_v13 = vrot.slane %v3913_v19, 1 }
 0x41d   : > { %v3766_v8 = vadd.f32 %v3765_v61, %v3677_v16  ;;  %v3591_v15 = vadd.f32 %v3590_v44, %v3502_v49  ;;  %3540 = vmatmul.bf16.gmra.mxu0 %v3191_v23 }
 0x41e   : > { %v3915_v54 = vadd.f32 %v3914_v13, %v3913_v19  ;;  %5104 = vmatmul.msk.bf16.gmra.mxu1 %vm6144_vm6, %v5103_v20 }
 0x41f   : > { %v3870_v30 = vmax.f32 %v3766_v8, 0.0  ;;  %3718 = vmatmul.bf16.gmra.mxu2 %v3193_v50 }
 0x420   : > { %3807 = vmatmul.bf16.gmra.mxu3 %v3194_v52  ;;  %v3963_v35 = vmul.f32 0.035714287, %v3915_v54 }
 0x421   : > { %v3916_v33 = vadd.f32 %v3870_v30, %v3869_v39 }
 0x422   : > { %v3975_v47 = vmul.f32 %v6291_v63, %v3963_v35  ;;  %v3679_v53 = vpop.f32.mrf.mxu2  ;;  %v3503_v31 = vpop.f32.mrf.mxu0 }
 0x423   : > { %v3768_v4 = vpop.f32.mrf.mxu3  ;;  %v3680_v40 = vadd.f32 %v3679_v53, %v3591_v15  ;;  %v3592_v62 = vpop.f32.mrf.mxu1  ;;  %v3504_v43 = vadd.f32 %v6244_v6, %v3503_v31 }
 0x424   : > { %v3992_v41 = vrot.slane %v3975_v47, 6 }
 0x425   : > { %v3769_v0 = vadd.f32 %v3768_v4, %v3680_v40  ;;  %v3593_v55 = vadd.f32 %v3592_v62, %v3504_v43 }
 0x426   : > { %v3994_v18 = vsel %vm3993_vm9, %v3992_v41, %v6296_v26 }
 0x427   : > { %v3871_v56 = vmax.f32 %v3769_v0, 0.0 }
 0x429   : > { %v3917_v34 = vadd.f32 %v3916_v33, %v3871_v56 }
 0x42a   : > { %v3681_v57 = vpop.f32.mrf.mxu2  ;;  %v3506_v51 = vpop.f32.mrf.mxu0 }
 0x42b   : > { %v3770_v25 = vpop.f32.mrf.mxu3  ;;  %v3682_v9 = vadd.f32 %v3681_v57, %v3593_v55  ;;  %v3595_v12 = vpop.f32.mrf.mxu1  ;;  %v3507_v48 = vadd.f32 %v6244_v6, %v3506_v51 }
 0x42d   : > { %v3771_v38 = vadd.f32 %v3770_v25, %v3682_v9  ;;  %v3596_v1 = vadd.f32 %v3595_v12, %v3507_v48 }
 0x42f   : > { %v3840_v5 = vsel %vm3816_vm7, %v3771_v38, 0.0 }
 0x430   : > { %v3872_v59 = vmax.f32 %v3840_v5, 0.0 }
 0x432   : > { %v3918_v45 = vadd.f32 %v3917_v34, %v3872_v59  ;;  %v3684_v46 = vpop.f32.mrf.mxu2  ;;  %v3508_v26 = vpop.f32.mrf.mxu0 }
 0x433   : > { %v3773_v60 = vpop.f32.mrf.mxu3  ;;  %v3685_v24 = vadd.f32 %v3684_v46, %v3596_v1  ;;  %v3597_v28 = vpop.f32.mrf.mxu1  ;;  %v3509_v36 = vadd.f32 %v6244_v6, %v3508_v26 }
 0x434   : > { %v3919_v10 = vrot.slane %v3918_v45, 4 }
 0x435   : > { %v3774_v11 = vadd.f32 %v3773_v60, %v3685_v24  ;;  %v3598_v17 = vadd.f32 %v3597_v28, %v3509_v36 }
 0x436   : > { %v3920_v3 = vadd.f32 %v3919_v10, %v3918_v45 }
 0x437   : > { %v3873_v44 = vmax.f32 %v3774_v11, 0.0 }
 0x438   : > { %v3921_v22 = vrot.slane %v3920_v3, 2 }
 0x43a   : > { %v3922_v29 = vadd.f32 %v3921_v22, %v3920_v3  ;;  %v3686_v58 = vpop.f32.mrf.mxu2  ;;  %v3511_v37 = vpop.f32.mrf.mxu0 }
 0x43b   : > { %v3775_v7 = vpop.f32.mrf.mxu3  ;;  %v3687_v19 = vadd.f32 %v3686_v58, %v3598_v17  ;;  %v3600_v61 = vpop.f32.mrf.mxu1  ;;  %v3512_v2 = vadd.f32 %v6244_v6, %v3511_v37 }
 0x43c   : > { %v3923_v14 = vrot.slane %v3922_v29, 1 }
 0x43d   : > { %v3776_v21 = vadd.f32 %v3775_v7, %v3687_v19  ;;  %v3601_v27 = vadd.f32 %v3600_v61, %v3512_v2 }
 0x43e   : > { %v3924_v16 = vadd.f32 %v3923_v14, %v3922_v29 }
 0x43f   : > { %v3874_v32 = vmax.f32 %v3776_v21, 0.0 }
 0x440   : > { %v3964_v13 = vmul.f32 0.035714287, %v3924_v16 }
 0x441   : > { %v3925_v49 = vadd.f32 %v3874_v32, %v3873_v44 }
 0x442   : > { %v3976_v23 = vmul.f32 %v6291_v63, %v3964_v13  ;;  %v3689_v8 = vpop.f32.mrf.mxu2  ;;  %v3513_v54 = vpop.f32.mrf.mxu0 }
 0x443   : > { %v3778_v50 = vpop.f32.mrf.mxu3  ;;  %v3690_v52 = vadd.f32 %v3689_v8, %v3601_v27  ;;  %v3602_v15 = vpop.f32.mrf.mxu1  ;;  %v3514_v20 = vadd.f32 %v6244_v6, %v3513_v54 }
 0x444   : > { %v3995_v39 = vrot.slane %v3976_v23, 5 }
 0x445   : > { %v3779_v30 = vadd.f32 %v3778_v50, %v3690_v52  ;;  %v3603_v35 = vadd.f32 %v3602_v15, %v3514_v20 }
 0x446   : > { %v3997_v33 = vsel %vm3996_vm10, %v3995_v39, %v3994_v18 }
 0x447   : > { %v3875_v47 = vmax.f32 %v3779_v30, 0.0 }
 0x449   : > { %v3926_v53 = vadd.f32 %v3925_v49, %v3875_v47 }
 0x44a   : > { %v3691_v4 = vpop.f32.mrf.mxu2  ;;  %v3516_v62 = vpop.f32.mrf.mxu0 }
 0x44b   : > { %v3780_v40 = vpop.f32.mrf.mxu3  ;;  %v3692_v31 = vadd.f32 %v3691_v4, %v3603_v35  ;;  %v3605_v41 = vpop.f32.mrf.mxu1  ;;  %v3517_v43 = vadd.f32 %v6244_v6, %v3516_v62 }
 0x44d   : > { %v3781_v0 = vadd.f32 %v3780_v40, %v3692_v31  ;;  %v3606_v55 = vadd.f32 %v3605_v41, %v3517_v43 }
 0x44f   : > { %v3844_v56 = vsel %vm3816_vm7, %v3781_v0, 0.0 }
 0x450   : > { %v3876_v34 = vmax.f32 %v3844_v56, 0.0 }
 0x452   : > { %v3927_v57 = vadd.f32 %v3926_v53, %v3876_v34  ;;  %v3694_v25 = vpop.f32.mrf.mxu2  ;;  %v3518_v18 = vpop.f32.mrf.mxu0 }
 0x453   : > { %v3783_v9 = vpop.f32.mrf.mxu3  ;;  %v3695_v51 = vadd.f32 %v3694_v25, %v3606_v55  ;;  %v3607_v12 = vpop.f32.mrf.mxu1  ;;  %v3519_v38 = vadd.f32 %v6244_v6, %v3518_v18 }
 0x454   : > { %v3928_v48 = vrot.slane %v3927_v57, 4 }
 0x455   : > { %v3784_v1 = vadd.f32 %v3783_v9, %v3695_v51  ;;  %v3608_v59 = vadd.f32 %v3607_v12, %v3519_v38 }
 0x456   : > { %v3929_v5 = vadd.f32 %v3928_v48, %v3927_v57 }
 0x457   : > { %v3877_v29 = vmax.f32 %v3784_v1, 0.0 }
 0x458   : > { %v3930_v45 = vrot.slane %v3929_v5, 2 }
 0x45a   : > { %v3931_v46 = vadd.f32 %v3930_v45, %v3929_v5  ;;  %v3696_v60 = vpop.f32.mrf.mxu2  ;;  %v3521_v28 = vpop.f32.mrf.mxu0 }
 0x45b   : > { %v3785_v24 = vpop.f32.mrf.mxu3  ;;  %v3697_v26 = vadd.f32 %v3696_v60, %v3608_v59  ;;  %v3610_v10 = vpop.f32.mrf.mxu1  ;;  %v3522_v11 = vadd.f32 %v6244_v6, %v3521_v28 }
 0x45c   : > { %v3932_v36 = vrot.slane %v3931_v46, 1 }
 0x45d   : > { %v3786_v3 = vadd.f32 %v3785_v24, %v3697_v26  ;;  %v3611_v22 = vadd.f32 %v3610_v10, %v3522_v11 }
 0x45e   : > { %v3933_v17 = vadd.f32 %v3932_v36, %v3931_v46 }
 0x45f   : > { %v3878_v58 = vmax.f32 %v3786_v3, 0.0 }
 0x460   : > { %v3965_v7 = vmul.f32 0.035714287, %v3933_v17 }
 0x461   : > { %v3934_v19 = vadd.f32 %v3878_v58, %v3877_v29 }
 0x462   : > { %v3699_v37 = vpop.f32.mrf.mxu2  ;;  %v3977_v14 = vmul.f32 %v6291_v63, %v3965_v7  ;;  %v3523_v21 = vpop.f32.mrf.mxu0 }
 0x463   : > { %v3788_v61 = vpop.f32.mrf.mxu3  ;;  %v3700_v2 = vadd.f32 %v3699_v37, %v3611_v22  ;;  %v3612_v16 = vpop.f32.mrf.mxu1  ;;  %v3524_v32 = vadd.f32 %v6244_v6, %v3523_v21 }
 0x464   : > { %v3998_v27 = vrot.slane %v3977_v14, 4 }
 0x465   : > { %v3789_v44 = vadd.f32 %v3788_v61, %v3700_v2  ;;  %v3613_v8 = vadd.f32 %v3612_v16, %v3524_v32 }
 0x466   : > { %v4000_v13 = vsel %vm3999_vm11, %v3998_v27, %v3997_v33 }
 0x467   : > { %v3879_v49 = vmax.f32 %v3789_v44, 0.0 }
 0x469   : > { %v3935_v23 = vadd.f32 %v3934_v19, %v3879_v49 }
 0x46a   : > { %v3701_v50 = vpop.f32.mrf.mxu2  ;;  %v3526_v15 = vpop.f32.mrf.mxu0 }
 0x46b   : > { %v3790_v52 = vpop.f32.mrf.mxu3  ;;  %v3702_v54 = vadd.f32 %v3701_v50, %v3613_v8  ;;  %v3615_v20 = vpop.f32.mrf.mxu1  ;;  %v3527_v46 = vadd.f32 %v6244_v6, %v3526_v15 }
 0x46d   : > { %v3791_v39 = vadd.f32 %v3790_v52, %v3702_v54  ;;  %v3616_v3 = vadd.f32 %v3615_v20, %v3527_v46 }
 0x46f   : > { %v3848_v30 = vsel %vm3816_vm7, %v3791_v39, 0.0 }
 0x470   : > { %v3880_v35 = vmax.f32 %v3848_v30, 0.0 }
 0x472   : > { %v3936_v47 = vadd.f32 %v3935_v23, %v3880_v35  ;;  %v3704_v53 = vpop.f32.mrf.mxu2  ;;  %v3528_v40 = vpop.f32.mrf.mxu0 }
 0x473   : > { %v3793_v4 = vpop.f32.mrf.mxu3  ;;  %v3617_v31 = vpop.f32.mrf.mxu1  ;;  %v3529_v59 = vadd.f32 %v6244_v6, %v3528_v40  ;;  %v3705_v58 = vadd.f32 %v3704_v53, %v3616_v3 }
 0x474   : > { %v3937_v62 = vrot.slane %v3936_v47, 4 }
 0x475   : > { %v3618_v28 = vadd.f32 %v3617_v31, %v3529_v59  ;;  %v3794_v2 = vadd.f32 %v3793_v4, %v3705_v58 }
 0x476   : > { %v3938_v33 = vadd.f32 %v3937_v62, %v3936_v47 }
 0x478   : > { %v3939_v41 = vrot.slane %v3938_v33, 2 }
 0x47a   : > { %v3940_v43 = vadd.f32 %v3939_v41, %v3938_v33  ;;  %v3706_v0 = vpop.f32.mrf.mxu2  ;;  %v3531_v56 = vpop.f32.mrf.mxu0 }
 0x47b   : > { %v3795_v55 = vpop.f32.mrf.mxu3  ;;  %v3620_v34 = vpop.f32.mrf.mxu1  ;;  %v3532_v60 = vadd.f32 %v6244_v6, %v3531_v56  ;;  %v3707_v17 = vadd.f32 %v3706_v0, %v3618_v28 }
 0x47c   : > { %v3941_v57 = vrot.slane %v3940_v43, 1 }
 0x47d   : > { %v3621_v22 = vadd.f32 %v3620_v34, %v3532_v60  ;;  %v3796_v19 = vadd.f32 %v3795_v55, %v3707_v17 }
 0x47e   : > { %v3942_v25 = vadd.f32 %v3941_v57, %v3940_v43 }
 0x47f   : > { %v3882_v44 = vmax.f32 %v3796_v19, 0.0 }
 0x480   : > { %v3966_v9 = vmul.f32 0.035714287, %v3942_v25 }
 0x482   : > { %v3709_v51 = vpop.f32.mrf.mxu2  ;;  %v3978_v12 = vmul.f32 %v6291_v63, %v3966_v9  ;;  %v3533_v48 = vpop.f32.mrf.mxu0 }
 0x483   : > { %v3798_v18 = vpop.f32.mrf.mxu3  ;;  %v3622_v38 = vpop.f32.mrf.mxu1  ;;  %v3534_v45 = vadd.f32 %v6244_v6, %v3533_v48  ;;  %v3710_v7 = vadd.f32 %v3709_v51, %v3621_v22 }
 0x484   : > { %v4001_v1 = vrot.slane %v3978_v12, 3 }
 0x485   : > { %v3623_v11 = vadd.f32 %v3622_v38, %v3534_v45  ;;  %v3799_v21 = vadd.f32 %v3798_v18, %v3710_v7 }
 0x486   : > { %v6330_v5 = vsel %vm4002_vm12, %v4001_v1, %v4000_v13  ;;  %v3881_v13 = vmax.f32 %v3794_v2, 0.0 }
 0x487   : > { %v3883_v49 = vmax.f32 %v3799_v21, 0.0 }
 0x488   : > { %v3943_v23 = vadd.f32 %v3882_v44, %v3881_v13  ;;  %v5029_v44 = vld [vmem:[#allocation3] ss:$0 sm:$0xff] }
 0x48a   : > { %v3711_v24 = vpop.f32.mrf.mxu2  ;;  %v3536_v10 = vpop.f32.mrf.mxu0  ;;  %v3944_v54 = vadd.f32 %v3943_v23, %v3883_v49 }
 0x48b   : > { %v3800_v26 = vpop.f32.mrf.mxu3  ;;  %v3625_v36 = vpop.f32.mrf.mxu1  ;;  %v3712_v29 = vadd.f32 %v3711_v24, %v3623_v11  ;;  %v3537_v30 = vadd.f32 %v6244_v6, %v3536_v10 }
 0x48d   : > { %v3801_v37 = vadd.f32 %v3800_v26, %v3712_v29  ;;  %v3626_v40 = vadd.f32 %v3625_v36, %v3537_v30 }
 0x48f   : > { %v3852_v32 = vsel %vm3816_vm7, %v3801_v37, 0.0 }
 0x490   : > { %v3884_v8 = vmax.f32 %v3852_v32, 0.0 }
 0x492   : > { %v3714_v61 = vpop.f32.mrf.mxu2  ;;  %v3538_v16 = vpop.f32.mrf.mxu0  ;;  %v3945_v39 = vadd.f32 %v3944_v54, %v3884_v8 }
 0x493   : > { %v3803_v14 = vpop.f32.mrf.mxu3  ;;  %v3627_v27 = vpop.f32.mrf.mxu1  ;;  %v3539_v20 = vadd.f32 %v6244_v6, %v3538_v16  ;;  %v3715_v0 = vadd.f32 %v3714_v61, %v3626_v40 }
 0x494   : > { %v3946_v4 = vrot.slane %v3945_v39, 4 }
 0x495   : > { %v3628_v53 = vadd.f32 %v3627_v27, %v3539_v20  ;;  %v3804_v25 = vadd.f32 %v3803_v14, %v3715_v0 }
 0x496   : > { %v3947_v56 = vadd.f32 %v3946_v4, %v3945_v39 }
 0x497   : > { %v3885_v59 = vmax.f32 %v3804_v25, 0.0 }
 0x498   : > { %v3948_v18 = vrot.slane %v3947_v56, 2 }
 0x49a   : > { %v3716_v50 = vpop.f32.mrf.mxu2  ;;  %v3541_v15 = vpop.f32.mrf.mxu0  ;;  %v3949_v60 = vadd.f32 %v3948_v18, %v3947_v56 }
 0x49b   : > { %v3805_v52 = vpop.f32.mrf.mxu3  ;;  %v3542_v35 = vadd.f32 %v6244_v6, %v3541_v15  ;;  %v3630_v47 = vpop.f32.mrf.mxu1  ;;  %v3717_v31 = vadd.f32 %v3716_v50, %v3628_v53 }
 0x49c   : > { %v3950_v36 = vrot.slane %v3949_v60, 1 }
 0x49d   : > { %v3631_v62 = vadd.f32 %v3630_v47, %v3542_v35  ;;  %v3806_v57 = vadd.f32 %v3805_v52, %v3717_v31 }
 0x49e   : > { %v3951_v17 = vadd.f32 %v3950_v36, %v3949_v60 }
 0x49f   : > { %v3886_v48 = vmax.f32 %v3806_v57, 0.0 }
 0x4a0   : > { %v3967_v58 = vmul.f32 0.035714287, %v3951_v17 }
 0x4a1   : > { %v3952_v26 = vadd.f32 %v3886_v48, %v3885_v59 }
 0x4a2   : > { %v3719_v33 = vpop.f32.mrf.mxu2  ;;  %v3543_v43 = vpop.f32.mrf.mxu0  ;;  %v3979_v37 = vmul.f32 %v6291_v63, %v3967_v58 }
 0x4a3   : > { %v3808_v41 = vpop.f32.mrf.mxu3  ;;  %v3720_v55 = vadd.f32 %v3719_v33, %v3631_v62  ;;  %v3544_v34 = vadd.f32 %v6244_v6, %v3543_v43  ;;  %v3632_v51 = vpop.f32.mrf.mxu1 }
 0x4a4   : > { %v4004_v2 = vrot.slane %v3979_v37, 2 }
 0x4a5   : > { %v3809_v9 = vadd.f32 %v3808_v41, %v3720_v55  ;;  %v3633_v12 = vadd.f32 %v3632_v51, %v3544_v34 }
 0x4a6   : > { %v4006_v16 = vsel %vm4005_vm13, %v4004_v2, %v6330_v5 }
 0x4a7   : > { %v3887_v45 = vmax.f32 %v3809_v9, 0.0 }
 0x4a9   : > { %v3953_v10 = vadd.f32 %v3952_v26, %v3887_v45 }
 0x4aa   : > { %v3721_v38 = vpop.f32.mrf.mxu2 }
 0x4ab   : > { %v3722_v1 = vadd.f32 %v3721_v38, %v3633_v12  ;;  %v3810_v46 = vpop.f32.mrf.mxu3 }
 0x4ad   : > { %v3811_v24 = vadd.f32 %v3810_v46, %v3722_v1 }
 0x4af   : > { %v3856_v28 = vsel %vm3816_vm7, %v3811_v24, 0.0 }
 0x4b0   : > { %v3888_v6 = vmax.f32 %v3856_v28, 0.0 }
 0x4b2   : > { %v3954_v11 = vadd.f32 %v3953_v10, %v3888_v6 }
 0x4b4   : > { %v3955_v3 = vrot.slane %v3954_v11, 4 }
 0x4b6   : > { %v3956_v22 = vadd.f32 %v3955_v3, %v3954_v11 }
 0x4b8   : > { %v3957_v29 = vrot.slane %v3956_v22, 2 }
 0x4ba   : > { %v3958_v7 = vadd.f32 %v3957_v29, %v3956_v22 }
 0x4bc   : > { %v3959_v19 = vrot.slane %v3958_v7, 1 }
 0x4be   : > { %v3960_v61 = vadd.f32 %v3959_v19, %v3958_v7 }
 0x4c0   : > { %v3968_v14 = vmul.f32 0.035714287, %v3960_v61 }
 0x4c2   : > { %v3980_v42 = vmul.f32 %v6291_v63, %v3968_v14 }
 0x4c4   : > { %v4007_v21 = vrot.slane %v3980_v42, 1 }
 0x4c6   : > { %v4009_v27 = vsel %vm4008_vm14, %v4007_v21, %v4006_v16 }
 0x4c7   : > { %4011 = vadd.xlane.f32.xlu0 %v4009_v27 }
 0x53a   : > { %v4012_v32 = vpop.xlane.xlu0 %4011 }
 0x53b   : > { %v4017_v13 = vadd.f32 %v5029_v44, %v4012_v32 }
 0x53d   : > { %4019 = vst.msk [vmem:[%s229_s16] sm:$0xff] %vm4018_vm15, %v4017_v13 }
 0x53e PF: > { %s17_s20 = sadd.s32 1, %s5111_s20  }
 0x53f   : > { %p14_p5 = scmp.ge.s32.totalorder %s17_s20, 4  }
 0x541   :  { %16 = sbr.rel (!%p14_p5) target bundleno = 3 (0x3), region = 76 }

</bundles_post_ra>
